<compile_context>
chip_gen: v6e
topology: v6e:2x2x1
jax: 0.10.0
libtpu: 0.0.40
codegen_flags: <defaults>
</compile_context>

<pallas_src>
import jax
import jax.numpy as jnp
from jax.experimental import pallas as pl
from jax.experimental.pallas import tpu as pltpu


# ----------------------------------------------------------------------------
# Pallas kernel: one image per grid step, fully fused block.
# ----------------------------------------------------------------------------
def _make_block_kernel(H, W, stride, has_expand, use_res):
    Ho, Wo = H // stride, W // stride  # TF-SAME output size (even H/W assumed)

    def kernel(*refs):
        if has_expand:
            (x_ref, w_exp_ref, b_exp_ref, w_dw_ref, b_dw_ref,
             w_pw_ref, b_pw_ref, out_ref, yp_ref) = refs
        else:
            (x_ref, w_dw_ref, b_dw_ref,
             w_pw_ref, b_pw_ref, out_ref, yp_ref) = refs

        c_mid = w_dw_ref.shape[1]

        x = x_ref[0]                                      # [H*W, C_in]  f32

        # ---- 1x1 expand + folded BN + ReLU6 (one big bf16 MXU matmul) ------
        if has_expand:
            y = jnp.dot(x.astype(jnp.bfloat16), w_exp_ref[...],
                        preferred_element_type=jnp.float32)
            y = jnp.clip(y + b_exp_ref[...], 0.0, 6.0)    # [H*W, C_mid]
        else:
            y = x                                         # expand_ratio == 1

        # ---- depthwise 3x3, TF-SAME: zero-pad in VMEM scratch, 9-tap MAC ---
        yp_ref[...] = jnp.zeros_like(yp_ref)              # [(H+2),(W+2),C_mid]
        yp_ref[1:H + 1, 1:W + 1, :] = y.reshape(H, W, c_mid)

        w_dw = w_dw_ref[...]                              # hoisted once [9,C]
        acc = jnp.zeros((H, W, c_mid), jnp.float32)
        t = 0
        for kh in range(3):
            for kw in range(3):
                acc = acc + yp_ref[kh:kh + H, kw:kw + W, :] * w_dw[t][None, None, :]
                t += 1
        z = jnp.clip(acc + b_dw_ref[...][None], 0.0, 6.0)  # [H, W, C_mid]

        if stride == 1:
            z_flat = z.reshape(H * W, c_mid)
        else:
            # TF-SAME stride-s on even H/W == odd-index subsample of the
            # stride-1 result.  TODO(synk): odd H/W with stride>1 not handled.
            z = z.reshape(Ho, stride, Wo, stride, c_mid)[:, stride - 1, :, stride - 1, :]
            z_flat = z.reshape(Ho * Wo, c_mid)

        # ---- 1x1 project + folded BN (linear bottleneck, bf16 MXU matmul) --
        out = jnp.dot(z_flat.astype(jnp.bfloat16), w_pw_ref[...],
                      preferred_element_type=jnp.float32)
        out = out + b_pw_ref[...]                         # [Ho*Wo, C_out]

        if use_res:                                       # stride==1, inp==oup
            out = out + x

        out_ref[0] = out.astype(out_ref.dtype)

    return kernel


def _run_block(x_flat, w_exp, b_exp, w_dw, b_dw, w_pw, b_pw,
               *, H, W, stride, has_expand, use_res):
    N, _, c_in = x_flat.shape
    c_mid = w_dw.shape[1]
    c_out = w_pw.shape[1]
    Ho, Wo = H // stride, W // stride

    kernel = _make_block_kernel(H, W, stride, has_expand, use_res)

    in_specs = [pl.BlockSpec((1, H * W, c_in), lambda n: (n, 0, 0))]
    args = [x_flat]
    if has_expand:
        in_specs += [pl.BlockSpec((c_in, c_mid), lambda n: (0, 0)),
                     pl.BlockSpec((1, c_mid), lambda n: (0, 0))]
        args += [w_exp, b_exp]
    in_specs += [pl.BlockSpec((9, c_mid), lambda n: (0, 0)),
                 pl.BlockSpec((1, c_mid), lambda n: (0, 0)),
                 pl.BlockSpec((c_mid, c_out), lambda n: (0, 0)),
                 pl.BlockSpec((1, c_out), lambda n: (0, 0))]
    args += [w_dw, b_dw, w_pw, b_pw]

    return pl.pallas_call(
        kernel,
        out_shape=jax.ShapeDtypeStruct((N, Ho * Wo, c_out), jnp.float32),
        grid=(N,),
        in_specs=in_specs,
        out_specs=pl.BlockSpec((1, Ho * Wo, c_out), lambda n: (n, 0, 0)),
        scratch_shapes=[pltpu.VMEM((H + 2, W + 2, c_mid), jnp.float32)],
        compiler_params=pltpu.CompilerParams(
            dimension_semantics=("parallel",)),
    )(*args)


# ----------------------------------------------------------------------------
# Module wrapper: parameter creation + frozen-BN folding + NCHW plumbing.
# ----------------------------------------------------------------------------
class InvertedResidualBottleneck:
    """JAX/Pallas inference-mode equivalent of _inverted_residual_bottleneck."""

    # TODO(synk): BatchNorm is folded as frozen/inference BN (running stats);
    # training-mode batch statistics are not reproduced.

    def __init__(self, inp, oup, stride, expand_ratio, key):
        self.inp, self.oup = inp, oup
        self.stride = stride
        self.expand_ratio = expand_ratio
        self.use_res_connect = (stride == 1 and inp == oup)
        self.has_expand = expand_ratio > 1
        c_mid = inp * expand_ratio
        self.c_mid = c_mid

        k = jax.random.split(key, 15)
        eps = 1e-5

        def bn_fold(kg, kb, km, kv, c):
            gamma = 1.0 + 0.05 * jax.random.normal(kg, (c,), jnp.float32)
            beta = 0.05 * jax.random.normal(kb, (c,), jnp.float32)
            mean = 0.05 * jax.random.normal(km, (c,), jnp.float32)
            var = jnp.abs(1.0 + 0.05 * jax.random.normal(kv, (c,), jnp.float32))
            scale = gamma / jnp.sqrt(var + eps)
            bias = beta - scale * mean          # proper frozen-BN fold
            return scale, bias

        if self.has_expand:
            w_exp = 0.1 * jax.random.normal(k[0], (inp, c_mid), jnp.float32)
            s_exp, b_exp = bn_fold(k[1], k[2], k[3], k[4], c_mid)
            self.w_exp = (w_exp * s_exp[None, :]).astype(jnp.bfloat16)
            self.b_exp = b_exp.reshape(1, c_mid)
        else:
            self.w_exp = None
            self.b_exp = None

        w_dw = 0.1 * jax.random.normal(k[5], (9, c_mid), jnp.float32)
        s_dw, b_dw = bn_fold(k[6], k[7], k[8], k[9], c_mid)
        self.w_dw = (w_dw * s_dw[None, :]).astype(jnp.float32)   # VPU stage: f32
        self.b_dw = b_dw.reshape(1, c_mid)

        w_pw = 0.1 * jax.random.normal(k[10], (c_mid, oup), jnp.float32)
        s_pw, b_pw = bn_fold(k[11], k[12], k[13], k[14], oup)
        self.w_pw = (w_pw * s_pw[None, :]).astype(jnp.bfloat16)
        self.b_pw = b_pw.reshape(1, oup)

    def forward(self, x_nchw):
        N, C, H, W = x_nchw.shape
        assert C == self.inp
        assert H % self.stride == 0 and W % self.stride == 0
        # NCHW -> channels-last, flattened spatial (lane dim = channels)
        x_flat = jnp.transpose(x_nchw, (0, 2, 3, 1)).reshape(N, H * W, C)
        out = _run_block(x_flat, self.w_exp, self.b_exp,
                         self.w_dw, self.b_dw, self.w_pw, self.b_pw,
                         H=H, W=W, stride=self.stride,
                         has_expand=self.has_expand,
                         use_res=self.use_res_connect)
        Ho, Wo = H // self.stride, W // self.stride
        return jnp.transpose(out.reshape(N, Ho, Wo, self.oup), (0, 3, 1, 2))


if __name__ == "__main__":
    key = jax.random.PRNGKey(0)
    k_x, k_p = jax.random.split(key)

    N, C_IN, H, W = 2, 32, 16, 16
    C_OUT, STRIDE, EXPAND = 32, 1, 6          # stride=1, inp==oup -> residual

    x = jax.random.normal(k_x, (N, C_IN, H, W), jnp.float32)
    block = InvertedResidualBottleneck(C_IN, C_OUT, STRIDE, EXPAND, k_p)

    out = jax.block_until_ready(block.forward(x))
    assert out.shape == (N, C_OUT, H // STRIDE, W // STRIDE)
    assert bool(jnp.all(jnp.isfinite(out)))
    print("KERNEL_OK")
</pallas_src>

<mosaic_0001>
module attributes {stable_mosaic.version = 11 : i64} {
  func.func @kernel(%arg0: i32, %arg1: memref<1x256x32xf32, #tpu.memory_space<vmem>>, %arg2: memref<32x192xbf16, #tpu.memory_space<vmem>>, %arg3: memref<1x192xf32, #tpu.memory_space<vmem>>, %arg4: memref<9x192xf32, #tpu.memory_space<vmem>>, %arg5: memref<1x192xf32, #tpu.memory_space<vmem>>, %arg6: memref<192x32xbf16, #tpu.memory_space<vmem>>, %arg7: memref<1x32xf32, #tpu.memory_space<vmem>>, %arg8: memref<1x256x32xf32, #tpu.memory_space<vmem>>, %arg9: memref<18x18x192xf32, #tpu.memory_space<vmem>>) attributes {dimension_semantics = [#tpu.dimension_semantics<parallel>], iteration_bounds = array<i64: 2>, scalar_prefetch = 0 : i64, scratch_operands = 1 : i64, tpu.core_type = #tpu.core_type<tc>, window_params = [{transform_indices = @transform_0, window_bounds = array<i64: 1, 256, 32>}, {pipeline_mode = #tpu.pipeline_mode<synchronous>, transform_indices = @transform_1, window_bounds = array<i64: 32, 192>}, {pipeline_mode = #tpu.pipeline_mode<synchronous>, transform_indices = @transform_2, window_bounds = array<i64: 1, 192>}, {pipeline_mode = #tpu.pipeline_mode<synchronous>, transform_indices = @transform_3, window_bounds = array<i64: 9, 192>}, {pipeline_mode = #tpu.pipeline_mode<synchronous>, transform_indices = @transform_4, window_bounds = array<i64: 1, 192>}, {pipeline_mode = #tpu.pipeline_mode<synchronous>, transform_indices = @transform_5, window_bounds = array<i64: 192, 32>}, {pipeline_mode = #tpu.pipeline_mode<synchronous>, transform_indices = @transform_6, window_bounds = array<i64: 1, 32>}, {transform_indices = @transform_7, window_bounds = array<i64: 1, 256, 32>}]} {
    %c0 = arith.constant 0 : index
    %c0_0 = arith.constant 0 : index
    %c0_1 = arith.constant 0 : index
    %0 = vector.load %arg1[%c0, %c0_0, %c0_1] : memref<1x256x32xf32, #tpu.memory_space<vmem>>, vector<1x256x32xf32>
    %1 = vector.shape_cast %0 : vector<1x256x32xf32> to vector<256x32xf32>
    %2 = arith.truncf %1 : vector<256x32xf32> to vector<256x32xbf16>
    %c0_2 = arith.constant 0 : index
    %c0_3 = arith.constant 0 : index
    %3 = vector.load %arg2[%c0_2, %c0_3] : memref<32x192xbf16, #tpu.memory_space<vmem>>, vector<32x192xbf16>
    %cst = arith.constant dense<0.000000e+00> : vector<256x192xf32>
    %4 = tpu.matmul %2, %3, %cst {dimension_numbers = #tpu.dot_dimension_numbers<[1], [0], [0], [1], [0, 0, 1, 1], [], []>} : vector<256x32xbf16>, vector<32x192xbf16>, vector<256x192xf32> -> vector<256x192xf32>
    %c0_4 = arith.constant 0 : index
    %c0_5 = arith.constant 0 : index
    %5 = vector.load %arg3[%c0_4, %c0_5] : memref<1x192xf32, #tpu.memory_space<vmem>>, vector<1x192xf32>
    %6 = vector.broadcast %5 : vector<1x192xf32> to vector<256x192xf32>
    %7 = arith.addf %4, %6 : vector<256x192xf32>
    %cst_6 = arith.constant 0.000000e+00 : f32
    %cst_7 = arith.constant 6.000000e+00 : f32
    %8 = vector.broadcast %cst_6 : f32 to vector<256x192xf32>
    %9 = arith.maximumf %8, %7 : vector<256x192xf32>
    %10 = vector.broadcast %cst_7 : f32 to vector<256x192xf32>
    %11 = arith.minimumf %10, %9 : vector<256x192xf32>
    %cst_8 = arith.constant 0.000000e+00 : f32
    %12 = vector.broadcast %cst_8 : f32 to vector<18x18x192xf32>
    %c0_9 = arith.constant 0 : index
    %c0_10 = arith.constant 0 : index
    %c0_11 = arith.constant 0 : index
    %13 = vector.load %arg9[%c0_9, %c0_10, %c0_11] : memref<18x18x192xf32, #tpu.memory_space<vmem>>, vector<18x18x192xf32>
    tpu.vector_store %arg9[%c0_9, %c0_10, %c0_11], %12 {strides = array<i32>} : memref<18x18x192xf32, #tpu.memory_space<vmem>>, vector<18x18x192xf32>,
    %14 = vector.shape_cast %11 : vector<256x192xf32> to vector<16x16x192xf32>
    %c1 = arith.constant 1 : index
    %c1_12 = arith.constant 1 : index
    %c0_13 = arith.constant 0 : index
    %15 = vector.load %arg9[%c1, %c1_12, %c0_13] : memref<18x18x192xf32, #tpu.memory_space<vmem>>, vector<16x16x192xf32>
    tpu.vector_store %arg9[%c1, %c1_12, %c0_13], %14 {strides = array<i32>} : memref<18x18x192xf32, #tpu.memory_space<vmem>>, vector<16x16x192xf32>,
    %c0_14 = arith.constant 0 : index
    %c0_15 = arith.constant 0 : index
    %16 = vector.load %arg4[%c0_14, %c0_15] : memref<9x192xf32, #tpu.memory_space<vmem>>, vector<9x192xf32>
    %cst_16 = arith.constant 0.000000e+00 : f32
    %17 = vector.broadcast %cst_16 : f32 to vector<16x16x192xf32>
    %c0_17 = arith.constant 0 : index
    %c0_18 = arith.constant 0 : index
    %c0_19 = arith.constant 0 : index
    %18 = vector.load %arg9[%c0_17, %c0_18, %c0_19] : memref<18x18x192xf32, #tpu.memory_space<vmem>>, vector<16x16x192xf32>
    %19 = vector.extract_strided_slice %16 {offsets = [0, 0], sizes = [1, 192], strides = [1, 1]} : vector<9x192xf32> to vector<1x192xf32>
    %20 = vector.shape_cast %19 : vector<1x192xf32> to vector<192xf32>
    %21 = vector.shape_cast %20 : vector<192xf32> to vector<1x1x192xf32>
    %22 = vector.broadcast %21 : vector<1x1x192xf32> to vector<16x16x192xf32>
    %23 = arith.mulf %18, %22 : vector<16x16x192xf32>
    %24 = arith.addf %17, %23 : vector<16x16x192xf32>
    %c0_20 = arith.constant 0 : index
    %c1_21 = arith.constant 1 : index
    %c0_22 = arith.constant 0 : index
    %25 = vector.load %arg9[%c0_20, %c1_21, %c0_22] : memref<18x18x192xf32, #tpu.memory_space<vmem>>, vector<16x16x192xf32>
    %26 = vector.extract_strided_slice %16 {offsets = [1, 0], sizes = [1, 192], strides = [1, 1]} : vector<9x192xf32> to vector<1x192xf32>
    %27 = vector.shape_cast %26 : vector<1x192xf32> to vector<192xf32>
    %28 = vector.shape_cast %27 : vector<192xf32> to vector<1x1x192xf32>
    %29 = vector.broadcast %28 : vector<1x1x192xf32> to vector<16x16x192xf32>
    %30 = arith.mulf %25, %29 : vector<16x16x192xf32>
    %31 = arith.addf %24, %30 : vector<16x16x192xf32>
    %c0_23 = arith.constant 0 : index
    %c2 = arith.constant 2 : index
    %c0_24 = arith.constant 0 : index
    %32 = vector.load %arg9[%c0_23, %c2, %c0_24] : memref<18x18x192xf32, #tpu.memory_space<vmem>>, vector<16x16x192xf32>
    %33 = vector.extract_strided_slice %16 {offsets = [2, 0], sizes = [1, 192], strides = [1, 1]} : vector<9x192xf32> to vector<1x192xf32>
    %34 = vector.shape_cast %33 : vector<1x192xf32> to vector<192xf32>
    %35 = vector.shape_cast %34 : vector<192xf32> to vector<1x1x192xf32>
    %36 = vector.broadcast %35 : vector<1x1x192xf32> to vector<16x16x192xf32>
    %37 = arith.mulf %32, %36 : vector<16x16x192xf32>
    %38 = arith.addf %31, %37 : vector<16x16x192xf32>
    %c1_25 = arith.constant 1 : index
    %c0_26 = arith.constant 0 : index
    %c0_27 = arith.constant 0 : index
    %39 = vector.load %arg9[%c1_25, %c0_26, %c0_27] : memref<18x18x192xf32, #tpu.memory_space<vmem>>, vector<16x16x192xf32>
    %40 = vector.extract_strided_slice %16 {offsets = [3, 0], sizes = [1, 192], strides = [1, 1]} : vector<9x192xf32> to vector<1x192xf32>
    %41 = vector.shape_cast %40 : vector<1x192xf32> to vector<192xf32>
    %42 = vector.shape_cast %41 : vector<192xf32> to vector<1x1x192xf32>
    %43 = vector.broadcast %42 : vector<1x1x192xf32> to vector<16x16x192xf32>
    %44 = arith.mulf %39, %43 : vector<16x16x192xf32>
    %45 = arith.addf %38, %44 : vector<16x16x192xf32>
    %c1_28 = arith.constant 1 : index
    %c1_29 = arith.constant 1 : index
    %c0_30 = arith.constant 0 : index
    %46 = vector.load %arg9[%c1_28, %c1_29, %c0_30] : memref<18x18x192xf32, #tpu.memory_space<vmem>>, vector<16x16x192xf32>
    %47 = vector.extract_strided_slice %16 {offsets = [4, 0], sizes = [1, 192], strides = [1, 1]} : vector<9x192xf32> to vector<1x192xf32>
    %48 = vector.shape_cast %47 : vector<1x192xf32> to vector<192xf32>
    %49 = vector.shape_cast %48 : vector<192xf32> to vector<1x1x192xf32>
    %50 = vector.broadcast %49 : vector<1x1x192xf32> to vector<16x16x192xf32>
    %51 = arith.mulf %46, %50 : vector<16x16x192xf32>
    %52 = arith.addf %45, %51 : vector<16x16x192xf32>
    %c1_31 = arith.constant 1 : index
    %c2_32 = arith.constant 2 : index
    %c0_33 = arith.constant 0 : index
    %53 = vector.load %arg9[%c1_31, %c2_32, %c0_33] : memref<18x18x192xf32, #tpu.memory_space<vmem>>, vector<16x16x192xf32>
    %54 = vector.extract_strided_slice %16 {offsets = [5, 0], sizes = [1, 192], strides = [1, 1]} : vector<9x192xf32> to vector<1x192xf32>
    %55 = vector.shape_cast %54 : vector<1x192xf32> to vector<192xf32>
    %56 = vector.shape_cast %55 : vector<192xf32> to vector<1x1x192xf32>
    %57 = vector.broadcast %56 : vector<1x1x192xf32> to vector<16x16x192xf32>
    %58 = arith.mulf %53, %57 : vector<16x16x192xf32>
    %59 = arith.addf %52, %58 : vector<16x16x192xf32>
    %c2_34 = arith.constant 2 : index
    %c0_35 = arith.constant 0 : index
    %c0_36 = arith.constant 0 : index
    %60 = vector.load %arg9[%c2_34, %c0_35, %c0_36] : memref<18x18x192xf32, #tpu.memory_space<vmem>>, vector<16x16x192xf32>
    %61 = vector.extract_strided_slice %16 {offsets = [6, 0], sizes = [1, 192], strides = [1, 1]} : vector<9x192xf32> to vector<1x192xf32>
    %62 = vector.shape_cast %61 : vector<1x192xf32> to vector<192xf32>
    %63 = vector.shape_cast %62 : vector<192xf32> to vector<1x1x192xf32>
    %64 = vector.broadcast %63 : vector<1x1x192xf32> to vector<16x16x192xf32>
    %65 = arith.mulf %60, %64 : vector<16x16x192xf32>
    %66 = arith.addf %59, %65 : vector<16x16x192xf32>
    %c2_37 = arith.constant 2 : index
    %c1_38 = arith.constant 1 : index
    %c0_39 = arith.constant 0 : index
    %67 = vector.load %arg9[%c2_37, %c1_38, %c0_39] : memref<18x18x192xf32, #tpu.memory_space<vmem>>, vector<16x16x192xf32>
    %68 = vector.extract_strided_slice %16 {offsets = [7, 0], sizes = [1, 192], strides = [1, 1]} : vector<9x192xf32> to vector<1x192xf32>
    %69 = vector.shape_cast %68 : vector<1x192xf32> to vector<192xf32>
    %70 = vector.shape_cast %69 : vector<192xf32> to vector<1x1x192xf32>
    %71 = vector.broadcast %70 : vector<1x1x192xf32> to vector<16x16x192xf32>
    %72 = arith.mulf %67, %71 : vector<16x16x192xf32>
    %73 = arith.addf %66, %72 : vector<16x16x192xf32>
    %c2_40 = arith.constant 2 : index
    %c2_41 = arith.constant 2 : index
    %c0_42 = arith.constant 0 : index
    %74 = vector.load %arg9[%c2_40, %c2_41, %c0_42] : memref<18x18x192xf32, #tpu.memory_space<vmem>>, vector<16x16x192xf32>
    %75 = vector.extract_strided_slice %16 {offsets = [8, 0], sizes = [1, 192], strides = [1, 1]} : vector<9x192xf32> to vector<1x192xf32>
    %76 = vector.shape_cast %75 : vector<1x192xf32> to vector<192xf32>
    %77 = vector.shape_cast %76 : vector<192xf32> to vector<1x1x192xf32>
    %78 = vector.broadcast %77 : vector<1x1x192xf32> to vector<16x16x192xf32>
    %79 = arith.mulf %74, %78 : vector<16x16x192xf32>
    %80 = arith.addf %73, %79 : vector<16x16x192xf32>
    %c0_43 = arith.constant 0 : index
    %c0_44 = arith.constant 0 : index
    %81 = vector.load %arg5[%c0_43, %c0_44] : memref<1x192xf32, #tpu.memory_space<vmem>>, vector<1x192xf32>
    %82 = vector.shape_cast %81 : vector<1x192xf32> to vector<1x1x192xf32>
    %83 = vector.broadcast %82 : vector<1x1x192xf32> to vector<16x16x192xf32>
    %84 = arith.addf %80, %83 : vector<16x16x192xf32>
    %cst_45 = arith.constant 0.000000e+00 : f32
    %cst_46 = arith.constant 6.000000e+00 : f32
    %85 = vector.broadcast %cst_45 : f32 to vector<16x16x192xf32>
    %86 = arith.maximumf %85, %84 : vector<16x16x192xf32>
    %87 = vector.broadcast %cst_46 : f32 to vector<16x16x192xf32>
    %88 = arith.minimumf %87, %86 : vector<16x16x192xf32>
    %89 = vector.shape_cast %88 : vector<16x16x192xf32> to vector<256x192xf32>
    %90 = arith.truncf %89 : vector<256x192xf32> to vector<256x192xbf16>
    %c0_47 = arith.constant 0 : index
    %c0_48 = arith.constant 0 : index
    %91 = vector.load %arg6[%c0_47, %c0_48] : memref<192x32xbf16, #tpu.memory_space<vmem>>, vector<192x32xbf16>
    %cst_49 = arith.constant dense<0.000000e+00> : vector<256x32xf32>
    %92 = tpu.matmul %90, %91, %cst_49 {dimension_numbers = #tpu.dot_dimension_numbers<[1], [0], [0], [1], [0, 0, 1, 1], [], []>} : vector<256x192xbf16>, vector<192x32xbf16>, vector<256x32xf32> -> vector<256x32xf32>
    %c0_50 = arith.constant 0 : index
    %c0_51 = arith.constant 0 : index
    %93 = vector.load %arg7[%c0_50, %c0_51] : memref<1x32xf32, #tpu.memory_space<vmem>>, vector<1x32xf32>
    %94 = vector.broadcast %93 : vector<1x32xf32> to vector<256x32xf32>
    %95 = arith.addf %92, %94 : vector<256x32xf32>
    %96 = arith.addf %95, %1 : vector<256x32xf32>
    %c0_52 = arith.constant 0 : index
    %c0_53 = arith.constant 0 : index
    %c0_54 = arith.constant 0 : index
    %97 = vector.load %arg8[%c0_52, %c0_53, %c0_54] : memref<1x256x32xf32, #tpu.memory_space<vmem>>, vector<1x256x32xf32>
    %98 = vector.shape_cast %97 : vector<1x256x32xf32> to vector<256x32xf32>
    %99 = vector.shape_cast %96 : vector<256x32xf32> to vector<1x256x32xf32>
    tpu.vector_store %arg8[%c0_52, %c0_53, %c0_54], %99 {strides = array<i32>} : memref<1x256x32xf32, #tpu.memory_space<vmem>>, vector<1x256x32xf32>,
    return
  }
  func.func @transform_0(%arg0: i32) -> (i32, i32, i32) {
    %c0_i32 = arith.constant 0 : i32
    %c0_i32_0 = arith.constant 0 : i32
    %c0_i32_1 = arith.constant 0 : i32
    return %arg0, %c0_i32, %c0_i32_0 : i32, i32, i32
  }
  func.func @transform_1(%arg0: i32) -> (i32, i32) {
    %c0_i32 = arith.constant 0 : i32
    %c0_i32_0 = arith.constant 0 : i32
    %c0_i32_1 = arith.constant 0 : i32
    return %c0_i32, %c0_i32_0 : i32, i32
  }
  func.func @transform_2(%arg0: i32) -> (i32, i32) {
    %c0_i32 = arith.constant 0 : i32
    %c0_i32_0 = arith.constant 0 : i32
    %c0_i32_1 = arith.constant 0 : i32
    return %c0_i32, %c0_i32_0 : i32, i32
  }
  func.func @transform_3(%arg0: i32) -> (i32, i32) {
    %c0_i32 = arith.constant 0 : i32
    %c0_i32_0 = arith.constant 0 : i32
    %c0_i32_1 = arith.constant 0 : i32
    return %c0_i32, %c0_i32_0 : i32, i32
  }
  func.func @transform_4(%arg0: i32) -> (i32, i32) {
    %c0_i32 = arith.constant 0 : i32
    %c0_i32_0 = arith.constant 0 : i32
    %c0_i32_1 = arith.constant 0 : i32
    return %c0_i32, %c0_i32_0 : i32, i32
  }
  func.func @transform_5(%arg0: i32) -> (i32, i32) {
    %c0_i32 = arith.constant 0 : i32
    %c0_i32_0 = arith.constant 0 : i32
    %c0_i32_1 = arith.constant 0 : i32
    return %c0_i32, %c0_i32_0 : i32, i32
  }
  func.func @transform_6(%arg0: i32) -> (i32, i32) {
    %c0_i32 = arith.constant 0 : i32
    %c0_i32_0 = arith.constant 0 : i32
    %c0_i32_1 = arith.constant 0 : i32
    return %c0_i32, %c0_i32_0 : i32, i32
  }
  func.func @transform_7(%arg0: i32) -> (i32, i32, i32) {
    %c0_i32 = arith.constant 0 : i32
    %c0_i32_0 = arith.constant 0 : i32
    %c0_i32_1 = arith.constant 0 : i32
    return %arg0, %c0_i32, %c0_i32_0 : i32, i32, i32
  }
}

</mosaic_0001>

<bundles_post_ra>
// kernel: tpu_custom_call.1
= control target key start
LH: loop header
LB: loop body
LE: loop exit
PB: predicated region body
PF: predicated region fallthrough
CT: control target
= control target key end

     0   :  { %s5995_s24 = smov 0   ;;  %s8676_s0 = inlined_call_operand.vmem [shape: f32[2,256,32], index: 0, kind: input, shape index: {}]   ;;  %s8677_s1 = inlined_call_operand.vmem [shape: bf16[32,192], index: 1, kind: input, shape index: {}]   ;;  %s8678_s2 = inlined_call_operand.vmem [shape: f32[1,192], index: 2, kind: input, shape index: {}]   ;;  %s8679_s3 = inlined_call_operand.vmem [shape: f32[9,192], index: 3, kind: input, shape index: {}]   ;;  %s8680_s4 = inlined_call_operand.vmem [shape: f32[1,192], index: 4, kind: input, shape index: {}]   ;;  %s8681_s5 = inlined_call_operand.vmem [shape: bf16[192,32], index: 5, kind: input, shape index: {}]   ;;  %s8682_s6 = inlined_call_operand.vmem [shape: f32[1,32], index: 6, kind: input, shape index: {}]   ;;  %s8683_s7 = inlined_call_operand.vmem [shape: f32[2,256,32], index: 7, kind: output, shape index: {}]  }
   0x1 LB: > { %s5786_s25 = sadd.s32 4294967295, %s5951_s24   ;;  %p5790_p0 = scmp.ge.s32.totalorder %s5951_s24, 1  ;;  %s5951_s24 = sphi %s5995_s24, %s17_s24  }
   0x2   : > { %p237_p1 = scmp.lt.s32.totalorder %s5951_s24, 3 }
   0x4   : > { %p238_p2 = pnand %p5790_p0, %p237_p1 }
   0x6   : > { %241 = sbr.rel (%p238_p2) target bundleno = 1111 (0x457), region = 48 }
   0xb   : > { %v5884_v0 = vld [vmem:[%s8677_s1 + $0x14] ss:$8 sps:$4 sm:$0xff]   ;;  %p269_p3 = scmp.lt.s32.totalorder %s5786_s25, 1  ;;  %v5886_v1 = vld [vmem:[%s8677_s1 + $0x10] ss:$8 sps:$4 sm:$0xff]   ;;  %v5953_v2 = vmov 0  }
   0xc   : > { %445 = vmatprep.mubr.bf16.mxu0 %v5953_v2  ;;  %5850 = vmatprep.subr.bf16.mxu1 %v5953_v2  ;;  %v5887_v3 = vld [vmem:[%s8677_s1 + $0x4] ss:$8 sps:$4 sm:$0xff]   ;;  %v5889_v4 = vld [vmem:[%s8677_s1] ss:$8 sps:$4 sm:$0xff]   ;;  %vm364_vm0 = vcmask 261120   ;;  %v5954_v32 = vmov 0.0  }
   0xd   : > { %425 = vmatprep.subr.bf16.mxu0 %v5884_v0  ;;  %s8703_s25 = smov (!%p269_p3, %s5786_s25), 1  ;;  %742 = vst [vmem:[#allocation2 + $0x30] sm:$0xff] %v5954_v32  ;;  %734 = vst [vmem:[#allocation2] sm:$0xff] %v5954_v32  ;;  %v5890_v35 = vld [vmem:[%s8681_s5 + $0x38] sm:$0xff]   ;;  %vm735_vm1 = vcmask 523264   ;;  %v5891_v37 = vld [vmem:[%s8681_s5 + $0x30] sm:$0xff]  }
   0xe   : > { %426 = vmatpush1.bf16.msra.mxu0 %v5886_v1  ;;  %s5848_s11 = sshll.u32 %s8703_s25, 8  ;;  %739 = vst [vmem:[#allocation2 + $0x20] sm:$0x3] %v5954_v32  ;;  %746 = vst [vmem:[#allocation2 + $0x50] sm:$0x3] %v5954_v32  ;;  %5862 = vmatpush1.bf16.msra.mxu1 %v5890_v35  ;;  %vm740_vm2 = vcmask 517120  }
   0xf   : > { %427 = vmatprep.subr.bf16.mxu0 %v5887_v3  ;;  %s6025_s14 = scalar_lea.vmem %s8676_s0, %s5848_s11  ;;  %748 = vst [vmem:[#allocation2 + $0x60] sm:$0xff] %v5954_v32  ;;  %752 = vst [vmem:[#allocation2 + $0x80] sm:$0x3] %v5954_v32  ;;  %5851 = vmatprep.subr.bf16.mxu1 %v5953_v2  ;;  %v5892_v40 = vld [vmem:[%s8681_s5 + $0x28] sm:$0xff]   ;;  %v5893_v42 = vld [vmem:[%s8681_s5 + $0x20] sm:$0xff]   ;;  %v334_v3 = vlaneseq  ;;  %vm1668_vm3 = vcmask 1046528   ;;  %s8521_s18 = scalar_lea.vmem %s8683_s7, %s5848_s11 }
  0x10   : > { %v280_v5 = vld [vmem:[%s6025_s14] sm:$0xff]  ;;  %v281_v6 = vld [vmem:[%s6025_s14 + $0x8] sm:$0xff]  ;;  %v282_v8 = vld [vmem:[%s6025_s14 + $0x10] sm:$0xff]  ;;  %754 = vst [vmem:[#allocation2 + $0x90] sm:$0xff] %v5954_v32  ;;  %vm2221_vm4 = vcmask 1045504   ;;  %vm1103_vm5 = vcmask 523265  }
  0x11   : > { %v312_v7 = vpack.c.bf16 %v281_v6, %v280_v5  ;;  %v283_v9 = vld [vmem:[%s6025_s14 + $0x18] sm:$0xff]  ;;  %v284_v11 = vld [vmem:[%s6025_s14 + $0x20] sm:$0xff]  ;;  %v285_v12 = vld [vmem:[%s6025_s14 + $0x28] sm:$0xff]  ;;  %758 = vst [vmem:[#allocation2 + $0xb0] sm:$0x3] %v5954_v32  ;;  %vm908_vm6 = vcmask 1040384  }
  0x12   : > { %428 = vmatpush1.bf16.msra.mxu0 %v5889_v4  ;;  %v313_v10 = vpack.c.bf16 %v283_v9, %v282_v8  ;;  %v314_v13 = vpack.c.bf16 %v285_v12, %v284_v11  ;;  %v286_v14 = vld [vmem:[%s6025_s14 + $0x30] sm:$0xff]  ;;  %v287_v15 = vld [vmem:[%s6025_s14 + $0x38] sm:$0xff]  ;;  %v288_v17 = vld [vmem:[%s6025_s14 + $0x40] sm:$0xff]  ;;  %760 = vst [vmem:[#allocation2 + $0xc0] sm:$0xff] %v5954_v32  ;;  %5863 = vmatpush1.bf16.msra.mxu1 %v5891_v37  ;;  %v6293_v4 = vshrl.u32 %v334_v3, 7  ;;  %vm1108_vm7 = vcmask 516096  }
  0x13   : > { %5506 = vmatprep.subr.bf16.mxu0 %v5953_v2  ;;  %v315_v16 = vpack.c.bf16 %v287_v15, %v286_v14  ;;  %v289_v18 = vld [vmem:[%s6025_s14 + $0x48] sm:$0xff]  ;;  %v290_v20 = vld [vmem:[%s6025_s14 + $0x50] sm:$0xff]  ;;  %v291_v21 = vld [vmem:[%s6025_s14 + $0x58] sm:$0xff]  ;;  %764 = vst [vmem:[#allocation2 + $0xe0] sm:$0x3] %v5954_v32  ;;  %5852 = vmatprep.subr.bf16.mxu1 %v5953_v2 }
  0x14   : > { %v316_v19 = vpack.c.bf16 %v289_v18, %v288_v17  ;;  %v317_v22 = vpack.c.bf16 %v291_v21, %v290_v20  ;;  %v292_v23 = vld [vmem:[%s6025_s14 + $0x60] sm:$0xff]  ;;  %v293_v24 = vld [vmem:[%s6025_s14 + $0x68] sm:$0xff]  ;;  %v294_v26 = vld [vmem:[%s6025_s14 + $0x70] sm:$0xff]  ;;  %766 = vst [vmem:[#allocation2 + $0xf0] sm:$0xff] %v5954_v32  ;;  %v6301_v6 = vsub.s32 1, %v6293_v4  ;;  %v2023_v9 = vsub.s32 2, %v6293_v4 }
  0x15   : > { %5799 = vmatmul.mubr.msk.bf16.vlgmr.msra.gmra.mxu0 %vm364_vm0, %v312_v7  ;;  %v318_v25 = vpack.c.bf16 %v293_v24, %v292_v23  ;;  %v295_v27 = vld [vmem:[%s6025_s14 + $0x78] sm:$0xff]  ;;  %v296_v29 = vld [vmem:[%s6025_s14 + $0x80] sm:$0xff]  ;;  %v297_v30 = vld [vmem:[%s6025_s14 + $0x88] sm:$0xff]  ;;  %770 = vst [vmem:[#allocation2 + $0x110] sm:$0x3] %v5954_v32  ;;  %v6314_v14 = vsub.s32 0, %v6293_v4 }
  0x16   : > { %455 = vmatprep.mubr.bf16.mxu0 %v5953_v2  ;;  %v319_v28 = vpack.c.bf16 %v295_v27, %v294_v26  ;;  %v320_v31 = vpack.c.bf16 %v297_v30, %v296_v29  ;;  %772 = vst [vmem:[#allocation2 + $0x120] sm:$0xff] %v5954_v32  ;;  %776 = vst [vmem:[#allocation2 + $0x140] sm:$0x3] %v5954_v32  ;;  %v298_v33 = vld [vmem:[%s6025_s14 + $0x90] sm:$0xff]  ;;  %v299_v34 = vld [vmem:[%s6025_s14 + $0x98] sm:$0xff]  ;;  %5507 = vmatpush1.bf16.msra.mxu0 %v5890_v35 }
  0x17   : > { %778 = vst [vmem:[#allocation2 + $0x150] sm:$0xff] %v5954_v32  ;;  %782 = vst [vmem:[#allocation2 + $0x170] sm:$0x3] %v5954_v32  ;;  %v321_v36 = vpack.c.bf16 %v299_v34, %v298_v33  ;;  %5508 = vmatprep.subr.bf16.mxu0 %v5953_v2  ;;  %v300_v38 = vld [vmem:[%s6025_s14 + $0xa0] sm:$0xff]  ;;  %v301_v39 = vld [vmem:[%s6025_s14 + $0xa8] sm:$0xff]  ;;  %5864 = vmatpush1.bf16.msra.mxu1 %v5892_v40 }
  0x18   : > { %784 = vst [vmem:[#allocation2 + $0x180] sm:$0xff] %v5954_v32  ;;  %788 = vst [vmem:[#allocation2 + $0x1a0] sm:$0x3] %v5954_v32  ;;  %v322_v41 = vpack.c.bf16 %v301_v39, %v300_v38  ;;  %5853 = vmatprep.subr.bf16.mxu1 %v5953_v2  ;;  %v302_v43 = vld [vmem:[%s6025_s14 + $0xb0] sm:$0xff]  ;;  %v303_v44 = vld [vmem:[%s6025_s14 + $0xb8] sm:$0xff] }
  0x19   : > { %790 = vst [vmem:[#allocation2 + $0x1b0] sm:$0xff] %v5954_v32  ;;  %794 = vst [vmem:[#allocation2 + $0x1d0] sm:$0x3] %v5954_v32  ;;  %v5894_v45 = vld [vmem:[%s8681_s5 + $0x18] sm:$0xff]   ;;  %v323_v46 = vpack.c.bf16 %v303_v44, %v302_v43  ;;  %v5895_v47 = vld [vmem:[%s8681_s5 + $0x10] sm:$0xff]  }
  0x1a   : > { %796 = vst [vmem:[#allocation2 + $0x1e0] sm:$0xff] %v5954_v32  ;;  %800 = vst [vmem:[#allocation2 + $0x200] sm:$0x3] %v5954_v32  ;;  %5509 = vmatpush1.bf16.msra.mxu0 %v5891_v37  ;;  %v304_v48 = vld [vmem:[%s6025_s14 + $0xc0] sm:$0xff]  ;;  %v305_v49 = vld [vmem:[%s6025_s14 + $0xc8] sm:$0xff] }
  0x1b   : > { %802 = vst [vmem:[#allocation2 + $0x210] sm:$0xff] %v5954_v32  ;;  %806 = vst [vmem:[#allocation2 + $0x230] sm:$0x3] %v5954_v32  ;;  %5510 = vmatprep.subr.bf16.mxu0 %v5953_v2  ;;  %5865 = vmatpush1.bf16.msra.mxu1 %v5893_v42  ;;  %v5896_v50 = vld [vmem:[%s8681_s5 + $0x8] sm:$0xff]   ;;  %v324_v51 = vpack.c.bf16 %v305_v49, %v304_v48  ;;  %v5897_v52 = vld [vmem:[%s8681_s5] sm:$0xff]  }
  0x1c   : > { %808 = vst [vmem:[#allocation2 + $0x240] sm:$0xff] %v5954_v32  ;;  %812 = vst [vmem:[#allocation2 + $0x260] sm:$0x3] %v5954_v32  ;;  %5854 = vmatprep.subr.bf16.mxu1 %v5953_v2  ;;  %v306_v53 = vld [vmem:[%s6025_s14 + $0xd0] sm:$0xff]  ;;  %v307_v54 = vld [vmem:[%s6025_s14 + $0xd8] sm:$0xff] }
  0x1d   : > { %5800 = vmatmul.mubr.msk.bf16.gmra.mxu0 %vm364_vm0, %v313_v10  ;;  %814 = vst [vmem:[#allocation2 + $0x270] sm:$0xff] %v5954_v32  ;;  %818 = vst [vmem:[#allocation2 + $0x290] sm:$0x3] %v5954_v32  ;;  %v5898_v55 = vld [vmem:[%s8681_s5 + $0x58] sm:$0xff]   ;;  %v325_v56 = vpack.c.bf16 %v307_v54, %v306_v53  ;;  %v5899_v57 = vld [vmem:[%s8681_s5 + $0x50] sm:$0xff]  }
  0x1e   : > { %465 = vmatprep.mubr.bf16.mxu0 %v5953_v2  ;;  %820 = vst [vmem:[#allocation2 + $0x2a0] sm:$0xff] %v5954_v32  ;;  %824 = vst [vmem:[#allocation2 + $0x2c0] sm:$0x3] %v5954_v32  ;;  %5511 = vmatpush1.bf16.msra.mxu0 %v5892_v40  ;;  %v308_v58 = vld [vmem:[%s6025_s14 + $0xe0] sm:$0xff]  ;;  %v309_v59 = vld [vmem:[%s6025_s14 + $0xe8] sm:$0xff]  ;;  %v2776_v40 = vsub.s32 4, %v6293_v4 }
  0x1f   : > { %826 = vst [vmem:[#allocation2 + $0x2d0] sm:$0xff] %v5954_v32  ;;  %830 = vst [vmem:[#allocation2 + $0x2f0] sm:$0x3] %v5954_v32  ;;  %5512 = vmatprep.subr.bf16.mxu0 %v5953_v2  ;;  %5866 = vmatpush1.bf16.msra.mxu1 %v5894_v45  ;;  %v5900_v60 = vld [vmem:[%s8681_s5 + $0x48] sm:$0xff]   ;;  %v326_v61 = vpack.c.bf16 %v309_v59, %v308_v58  ;;  %v5901_v62 = vld [vmem:[%s8681_s5 + $0x40] sm:$0xff]  }
  0x20   : > { %832 = vst [vmem:[#allocation2 + $0x300] sm:$0xff] %v5954_v32  ;;  %836 = vst [vmem:[#allocation2 + $0x320] sm:$0x3] %v5954_v32  ;;  %5855 = vmatprep.subr.bf16.mxu1 %v5953_v2  ;;  %v310_v63 = vld [vmem:[%s6025_s14 + $0xf0] sm:$0xff]  ;;  %v311_v0 = vld [vmem:[%s6025_s14 + $0xf8] sm:$0xff] }
  0x21   : > { %838 = vst [vmem:[#allocation2 + $0x330] sm:$0xff] %v5954_v32  ;;  %842 = vst [vmem:[#allocation2 + $0x350] sm:$0x3] %v5954_v32  ;;  %v327_v1 = vpack.c.bf16 %v311_v0, %v310_v63  ;;  %v6298_v5 = vld [vmem:[%s8679_s3 + $0x8] sm:$0xff]  ;;  %v332_v26 = vld [vmem:[%s8678_s2] sm:$0x3] }
  0x22   : > { %743 = vst.msk [vmem:[#allocation2 + $0x38] sm:$0xff] %vm735_vm1, %v5954_v32  ;;  %736 = vst.msk [vmem:[#allocation2 + $0x8] sm:$0xff] %vm735_vm1, %v5954_v32  ;;  %5513 = vmatpush1.bf16.msra.mxu0 %v5893_v42  ;;  %v6311_v12 = vrot.slane %v6298_v5, %v2023_v9  ;;  %v6323_v17 = vrot.slane %v6298_v5, %v6314_v14  ;;  %v1957_v37 = vld [vmem:[#allocation2] sm:$0xfc]  ;;  %v6341_v38 = vrot.slane %v332_v26, %v6314_v14 }
  0x23   : > { %738 = vst.msk [vmem:[#allocation2 + $0x18] sm:$0xff] %vm735_vm1, %v5954_v32  ;;  %745 = vst.msk [vmem:[#allocation2 + $0x48] sm:$0xff] %vm735_vm1, %v5954_v32  ;;  %5514 = vmatprep.subr.bf16.mxu0 %v5953_v2  ;;  %5867 = vmatpush1.bf16.msra.mxu1 %v5895_v47  ;;  %v6344_v39 = vrot.slane %v332_v26, %v6301_v6  ;;  %v3328_v42 = vsub.s32 5, %v6293_v4 }
  0x24   : > { %749 = vst.msk [vmem:[#allocation2 + $0x68] sm:$0xff] %vm735_vm1, %v5954_v32  ;;  %751 = vst.msk [vmem:[#allocation2 + $0x78] sm:$0xff] %vm735_vm1, %v5954_v32  ;;  %5856 = vmatprep.subr.bf16.mxu1 %v5953_v2 }
  0x25   : > { %5801 = vmatmul.mubr.msk.bf16.gmra.mxu0 %vm364_vm0, %v314_v13  ;;  %755 = vst.msk [vmem:[#allocation2 + $0x98] sm:$0xff] %vm735_vm1, %v5954_v32  ;;  %757 = vst.msk [vmem:[#allocation2 + $0xa8] sm:$0xff] %vm735_vm1, %v5954_v32  ;;  %v6378_v3 = vrot.slane %v6298_v5, %v3328_v42 }
  0x26   : > { %475 = vmatprep.mubr.bf16.mxu0 %v5953_v2  ;;  %761 = vst.msk [vmem:[#allocation2 + $0xc8] sm:$0xff] %vm735_vm1, %v5954_v32  ;;  %763 = vst.msk [vmem:[#allocation2 + $0xd8] sm:$0xff] %vm735_vm1, %v5954_v32  ;;  %5515 = vmatpush1.bf16.msra.mxu0 %v5894_v45  ;;  %v1959_v45 = vld [vmem:[#allocation2 + $0x20] sm:$0x3] }
  0x27   : > { %767 = vst.msk [vmem:[#allocation2 + $0xf8] sm:$0xff] %vm735_vm1, %v5954_v32  ;;  %769 = vst.msk [vmem:[#allocation2 + $0x108] sm:$0xff] %vm735_vm1, %v5954_v32  ;;  %5516 = vmatprep.subr.bf16.mxu0 %v5953_v2  ;;  %5868 = vmatpush1.bf16.msra.mxu1 %v5896_v50 }
  0x28   : > { %773 = vst.msk [vmem:[#allocation2 + $0x128] sm:$0xff] %vm735_vm1, %v5954_v32  ;;  %775 = vst.msk [vmem:[#allocation2 + $0x138] sm:$0xff] %vm735_vm1, %v5954_v32  ;;  %5857 = vmatprep.subr.bf16.mxu1 %v5953_v2 }
  0x29   : > { %779 = vst.msk [vmem:[#allocation2 + $0x158] sm:$0xff] %vm735_vm1, %v5954_v32  ;;  %781 = vst.msk [vmem:[#allocation2 + $0x168] sm:$0xff] %vm735_vm1, %v5954_v32  ;;  %v1405_v8 = vld [vmem:[#allocation2 + $0x8] sm:$0xfe] }
  0x2a   : > { %785 = vst.msk [vmem:[#allocation2 + $0x188] sm:$0xff] %vm735_vm1, %v5954_v32  ;;  %787 = vst.msk [vmem:[#allocation2 + $0x198] sm:$0xff] %vm735_vm1, %v5954_v32  ;;  %5517 = vmatpush1.bf16.msra.mxu0 %v5895_v47  ;;  %v1207_v7 = vld [vmem:[#allocation2 + $0x18] sm:$0xff]  ;;  %v1958_v13 = vld [vmem:[#allocation2 + $0x8] sm:$0xfc] }
  0x2b   : > { %791 = vst.msk [vmem:[#allocation2 + $0x1b8] sm:$0xff] %vm735_vm1, %v5954_v32  ;;  %793 = vst.msk [vmem:[#allocation2 + $0x1c8] sm:$0xff] %vm735_vm1, %v5954_v32  ;;  %5518 = vmatprep.subr.bf16.mxu0 %v5953_v2  ;;  %5869 = vmatpush1.bf16.msra.mxu1 %v5897_v52  ;;  %v2030_v20 = vmul.f32 %v6311_v12, %v1958_v13  ;;  %v1205_v21 = vld [vmem:[#allocation2 + $0x8] sm:$0xff]  ;;  %v2032_v23 = vmul.f32 %v6311_v12, %v1207_v7 }
  0x2c   : > { %797 = vst.msk [vmem:[#allocation2 + $0x1e8] sm:$0xff] %vm735_vm1, %v5954_v32  ;;  %799 = vst.msk [vmem:[#allocation2 + $0x1f8] sm:$0xff] %vm735_vm1, %v5954_v32  ;;  %5858 = vmatprep.subr.bf16.mxu1 %v5953_v2 }
  0x2d   : > { %5802 = vmatmul.mubr.msk.bf16.gmra.mxu0 %vm364_vm0, %v315_v16  ;;  %803 = vst.msk [vmem:[#allocation2 + $0x218] sm:$0xff] %vm735_vm1, %v5954_v32  ;;  %805 = vst.msk [vmem:[#allocation2 + $0x228] sm:$0xff] %vm735_vm1, %v5954_v32  ;;  %v6319_v16 = vld [vmem:[%s8679_s3] sm:$0xff]  ;;  %v2225_v30 = vrot.slane %v2030_v20, 2  ;;  %v2226_v35 = vrot.slane %v2032_v23, 2 }
  0x2e   : > { %485 = vmatprep.mubr.bf16.mxu0 %v5953_v2  ;;  %809 = vst.msk [vmem:[#allocation2 + $0x248] sm:$0xff] %vm735_vm1, %v5954_v32  ;;  %811 = vst.msk [vmem:[#allocation2 + $0x258] sm:$0xff] %vm735_vm1, %v5954_v32  ;;  %5519 = vmatpush1.bf16.msra.mxu0 %v5896_v50  ;;  %v6333_v27 = vrot.slane %v6319_v16, %v6301_v6 }
  0x2f   : > { %815 = vst.msk [vmem:[#allocation2 + $0x278] sm:$0xff] %vm735_vm1, %v5954_v32  ;;  %817 = vst.msk [vmem:[#allocation2 + $0x288] sm:$0xff] %vm735_vm1, %v5954_v32  ;;  %5520 = vmatprep.subr.bf16.mxu0 %v5953_v2  ;;  %5870 = vmatpush2.bf16.msra.mxu1 %v5898_v55 }
  0x30   : > { %821 = vst.msk [vmem:[#allocation2 + $0x2a8] sm:$0xff] %vm735_vm1, %v5954_v32  ;;  %823 = vst.msk [vmem:[#allocation2 + $0x2b8] sm:$0xff] %vm735_vm1, %v5954_v32  ;;  %5859 = vmatprep.subr.bf16.mxu1 %v5953_v2  ;;  %v1478_v43 = vmul.f32 0.0, %v6333_v27 }
  0x31   : > { %827 = vst.msk [vmem:[#allocation2 + $0x2d8] sm:$0xff] %vm735_vm1, %v5954_v32  ;;  %829 = vst.msk [vmem:[#allocation2 + $0x2e8] sm:$0xff] %vm735_vm1, %v5954_v32 }
  0x32   : > { %833 = vst.msk [vmem:[#allocation2 + $0x308] sm:$0xff] %vm735_vm1, %v5954_v32  ;;  %835 = vst.msk [vmem:[#allocation2 + $0x318] sm:$0xff] %vm735_vm1, %v5954_v32  ;;  %5521 = vmatpush1.bf16.msra.mxu0 %v5897_v52 }
  0x33   : > { %839 = vst.msk [vmem:[#allocation2 + $0x338] sm:$0xff] %vm735_vm1, %v5954_v32  ;;  %841 = vst.msk [vmem:[#allocation2 + $0x348] sm:$0xff] %vm735_vm1, %v5954_v32  ;;  %5530 = vmatprep.subr.bf16.mxu0 %v5953_v2  ;;  %5871 = vmatpush2.bf16.msra.mxu1 %v5899_v57 }
  0x34   : > { %747 = vst.msk [vmem:[#allocation2 + $0x58] sm:$0x3] %vm740_vm2, %v5954_v32  ;;  %741 = vst.msk [vmem:[#allocation2 + $0x28] sm:$0x3] %vm740_vm2, %v5954_v32  ;;  %5860 = vmatprep.subr.bf16.mxu1 %v5953_v2 }
  0x35   : > { %5803 = vmatmul.mubr.msk.bf16.gmra.mxu0 %vm364_vm0, %v316_v19  ;;  %753 = vst.msk [vmem:[#allocation2 + $0x88] sm:$0x3] %vm740_vm2, %v5954_v32  ;;  %759 = vst.msk [vmem:[#allocation2 + $0xb8] sm:$0x3] %vm740_vm2, %v5954_v32 }
  0x36   : > { %495 = vmatprep.mubr.bf16.mxu0 %v5953_v2  ;;  %765 = vst.msk [vmem:[#allocation2 + $0xe8] sm:$0x3] %vm740_vm2, %v5954_v32  ;;  %771 = vst.msk [vmem:[#allocation2 + $0x118] sm:$0x3] %vm740_vm2, %v5954_v32  ;;  %5531 = vmatpush2.bf16.msra.mxu0 %v5898_v55 }
  0x37   : > { %777 = vst.msk [vmem:[#allocation2 + $0x148] sm:$0x3] %vm740_vm2, %v5954_v32  ;;  %783 = vst.msk [vmem:[#allocation2 + $0x178] sm:$0x3] %vm740_vm2, %v5954_v32  ;;  %5532 = vmatprep.subr.bf16.mxu0 %v5953_v2  ;;  %5872 = vmatpush2.bf16.msra.mxu1 %v5900_v60 }
  0x38   : > { %789 = vst.msk [vmem:[#allocation2 + $0x1a8] sm:$0x3] %vm740_vm2, %v5954_v32  ;;  %795 = vst.msk [vmem:[#allocation2 + $0x1d8] sm:$0x3] %vm740_vm2, %v5954_v32  ;;  %5861 = vmatprep.subr.bf16.mxu1 %v5953_v2 }
  0x39   : > { %801 = vst.msk [vmem:[#allocation2 + $0x208] sm:$0x3] %vm740_vm2, %v5954_v32  ;;  %807 = vst.msk [vmem:[#allocation2 + $0x238] sm:$0x3] %vm740_vm2, %v5954_v32 }
  0x3a   : > { %813 = vst.msk [vmem:[#allocation2 + $0x268] sm:$0x3] %vm740_vm2, %v5954_v32  ;;  %819 = vst.msk [vmem:[#allocation2 + $0x298] sm:$0x3] %vm740_vm2, %v5954_v32  ;;  %5533 = vmatpush2.bf16.msra.mxu0 %v5899_v57 }
  0x3b   : > { %825 = vst.msk [vmem:[#allocation2 + $0x2c8] sm:$0x3] %vm740_vm2, %v5954_v32  ;;  %831 = vst.msk [vmem:[#allocation2 + $0x2f8] sm:$0x3] %vm740_vm2, %v5954_v32  ;;  %5534 = vmatprep.subr.bf16.mxu0 %v5953_v2  ;;  %5873 = vmatpush2.bf16.msra.mxu1 %v5901_v62  ;;  %v1407_v15 = vld [vmem:[#allocation2 + $0x28] sm:$0x1] }
  0x3c   : > { %837 = vst.msk [vmem:[#allocation2 + $0x328] sm:$0x3] %vm740_vm2, %v5954_v32  ;;  %843 = vst.msk [vmem:[#allocation2 + $0x358] sm:$0x3] %vm740_vm2, %v5954_v32  ;;  %v1960_v24 = vld [vmem:[#allocation2 + $0x28] sm:$0x3] }
  0x3d   : > { %5804 = vmatmul.mubr.msk.bf16.gmra.mxu0 %vm364_vm0, %v317_v22  ;;  %v1406_v32 = vld [vmem:[#allocation2 + $0x20] sm:$0x1]  ;;  %v2034_v34 = vmul.f32 %v6311_v12, %v1960_v24 }
  0x3e   : > { %505 = vmatprep.mubr.bf16.mxu0 %v5953_v2  ;;  %5535 = vmatpush2.bf16.msra.mxu0 %v5900_v60  ;;  %v1480_v44 = vmul.f32 %v6333_v27, %v1406_v32  ;;  %v6371_v60 = vrot.slane %v6298_v5, %v2776_v40 }
  0x3f   : > { %5536 = vmatprep.subr.bf16.mxu0 %v5953_v2  ;;  %v2230_v52 = vrot.slane %v2034_v34, 2 }
  0x42   : > { %5537 = vmatpush2.bf16.msra.mxu0 %v5901_v62  ;;  %v1675_v62 = vrot.slane %v1480_v44, 1  ;;  %v6397_v44 = vrot.slane %v6319_v16, %v2776_v40  ;;  %v6412_v40 = vrot.slane %v6319_v16, %v3328_v42 }
  0x45   : > { %5805 = vmatmul.mubr.msk.bf16.gmra.mxu0 %vm364_vm0, %v318_v25  ;;  %v1404_v25 = vld [vmem:[#allocation2] sm:$0xfe] }
  0x46   : > { %515 = vmatprep.mubr.bf16.mxu0 %v5953_v2 }
  0x4d   : > { %5806 = vmatmul.mubr.msk.bf16.gmra.mxu0 %vm364_vm0, %v319_v28  ;;  %v1277_v28 = vmul.f32 %v6323_v17, %v1205_v21 }
  0x4e   : > { %525 = vmatprep.mubr.bf16.mxu0 %v5953_v2 }
  0x55   : > { %5807 = vmatmul.mubr.msk.bf16.gmra.mxu0 %vm364_vm0, %v320_v31  ;;  %v2576_v31 = vsub.s32 3, %v6293_v4 }
  0x56   : > { %535 = vmatprep.mubr.bf16.mxu0 %v5953_v2 }
  0x57   : > { %v6355_v48 = vrot.slane %v6319_v16, %v2576_v31  ;;  %v6361_v55 = vrot.slane %v6298_v5, %v2576_v31 }
  0x5d   : > { %5808 = vmatmul.mubr.msk.bf16.gmra.mxu0 %vm364_vm0, %v321_v36  ;;  %v1476_v36 = vmul.f32 %v6333_v27, %v1404_v25 }
  0x5e   : > { %545 = vmatprep.mubr.bf16.mxu0 %v5953_v2 }
  0x5f   : > { %v1669_v53 = vrot.slane %v1476_v36, 1 }
  0x65   : > { %5809 = vmatmul.mubr.msk.bf16.gmra.mxu0 %vm364_vm0, %v322_v41  ;;  %v6348_v41 = vrot.slane %v6319_v16, %v2023_v9 }
  0x66   : > { %555 = vmatprep.mubr.bf16.mxu0 %v5953_v2 }
  0x67   : > { %v2029_v49 = vmul.f32 %v6348_v41, %v1957_v37  ;;  %v2031_v57 = vmul.f32 0.0, %v6348_v41  ;;  %v2033_v58 = vmul.f32 %v6348_v41, %v1959_v45 }
  0x69   : > { %v2228_v20 = vrot.slane %v2033_v58, 2 }
  0x6d   : > { %5810 = vmatmul.mubr.msk.bf16.gmra.mxu0 %vm364_vm0, %v323_v46  ;;  %v1279_v46 = vmul.f32 %v6323_v17, %v1207_v7 }
  0x6e   : > { %565 = vmatprep.mubr.bf16.mxu0 %v5953_v2 }
  0x75   : > { %5811 = vmatmul.mubr.msk.bf16.gmra.mxu0 %vm364_vm0, %v324_v51  ;;  %v2227_v51 = vsel %vm2221_vm4, %v2225_v30, %v2226_v35 }
  0x76   : > { %575 = vmatprep.mubr.bf16.mxu0 %v5953_v2 }
  0x7d   : > { %5812 = vmatmul.mubr.msk.bf16.gmra.mxu0 %vm364_vm0, %v325_v56  ;;  %v6365_v56 = vrot.slane %v6319_v16, %v6314_v14 }
  0x7e   : > { %585 = vmatprep.mubr.bf16.mxu0 %v5953_v2 }
  0x85   : > { %5813 = vmatmul.mubr.msk.bf16.gmra.mxu0 %vm364_vm0, %v326_v61  ;;  %v1670_v61 = vrot.slane %v1478_v43, 1 }
  0x86   : > { %595 = vmatprep.mubr.bf16.mxu0 %v5953_v2  ;;  %v6305_v2 = vrot.slane %v6298_v5, %v6301_v6 }
  0x87   : > { %v1676_v24 = vsel %vm1668_vm3, %v1670_v61, %v1675_v62 }
  0x88   : > { %v1477_v10 = vmul.f32 %v6305_v2, %v1405_v8  ;;  %v1479_v11 = vmul.f32 %v6305_v2, %v1207_v7  ;;  %v1481_v22 = vmul.f32 %v6305_v2, %v1407_v15  ;;  %v2222_v7 = vrot.slane %v2029_v49, 2 }
  0x89   : > { %v3881_v15 = vsub.s32 6, %v6293_v4 }
  0x8a   : > { %v1672_v18 = vrot.slane %v1477_v10, 1  ;;  %v1673_v19 = vrot.slane %v1479_v11, 1  ;;  %v1677_v33 = vrot.slane %v1481_v22, 1  ;;  %v2231_v10 = vsel %vm2221_vm4, %v2226_v35, %v2230_v52 }
  0x8b   : > { %v1671_v11 = vsel %vm1668_vm3, %v1669_v53, %v1670_v61  ;;  %v6393_v36 = vrot.slane %v6319_v16, %v3881_v15  ;;  %v6404_v52 = vrot.slane %v6298_v5, %v3881_v15 }
  0x8c   : > { %v1674_v29 = vsel %vm1668_vm3, %v1672_v18, %v1673_v19  ;;  %v1678_v50 = vsel %vm1668_vm3, %v1673_v19, %v1677_v33  ;;  %v1276_v18 = vmul.f32 0.0, %v6365_v56  ;;  %v2223_v19 = vrot.slane %v2031_v57, 2 }
  0x8d   : > { %5814 = vmatmul.mubr.msk.bf16.gmra.mxu0 %vm364_vm0, %v327_v1  ;;  %v1894_v47 = vadd.f32 %v1674_v29, %v1277_v28  ;;  %v1896_v0 = vadd.f32 %v1678_v50, %v1279_v46  ;;  %v4081_v28 = vsub.s32 7, %v6293_v4  ;;  %v5119_v50 = vld [vmem:[%s8680_s4] sm:$0x3] }
  0x8e   : > { %v1893_v29 = vadd.f32 %v1671_v11, %v1276_v18  ;;  %v2224_v30 = vsel %vm2221_vm4, %v2222_v7, %v2223_v19  ;;  %v1895_v37 = vadd.f32 %v1676_v24, %v1276_v18  ;;  %v2229_v43 = vsel %vm2221_vm4, %v2223_v19, %v2228_v20 }
  0x8f   : > { %v6373_v1 = vadd.f32 %v2227_v51, %v1894_v47  ;;  %v6387_v26 = vadd.f32 %v2231_v10, %v1896_v0  ;;  %v6407_v53 = vrot.slane %v6298_v5, %v4081_v28  ;;  %v6420_v5 = vrot.slane %v5119_v50, %v6301_v6 }
  0x90   : > { %v2448_v0 = vadd.f32 %v2229_v43, %v1895_v37  ;;  %v6423_v4 = vrot.slane %v6319_v16, %v4081_v28 }
  0xd5   : > { %v447_v54 = vpop.f32.mrf.mxu0 }
  0xd6   : > { %v448_v59 = vadd.f32 %v447_v54, %v6341_v38  ;;  %v2446_v54 = vadd.f32 %v2224_v30, %v1893_v29 }
  0xd7   : > { %v449_v63 = vpop.f32.mrf.mxu0 }
  0xd8   : > { %v606_v8 = vmax.f32 %v448_v59, 0.0  ;;  %v450_v9 = vadd.f32 %v449_v63, %v6344_v39  ;;  %v6417_v63 = vrot.slane %v5119_v50, %v6314_v14 }
  0xd9   : > { %v451_v13 = vpop.f32.mrf.mxu0 }
  0xda   : > { %v670_v21 = vmin.f32 %v606_v8, 6.0  ;;  %v607_v22 = vmax.f32 %v450_v9, 0.0  ;;  %v452_v23 = vadd.f32 %v451_v13, %v6341_v38 }
  0xdb   : > { %v453_v25 = vpop.f32.mrf.mxu0 }
  0xdc   : > { %v909_v31 = vrot.slane %v670_v21, 7  ;;  %v671_v32 = vmin.f32 %v607_v22, 6.0  ;;  %v608_v33 = vmax.f32 %v452_v23, 0.0  ;;  %v454_v34 = vadd.f32 %v453_v25, %v6344_v39 }
  0xdd   : > { %v457_v35 = vpop.f32.mrf.mxu0 }
  0xde   : > { %1102 = vst [vmem:[#allocation2 + $0x30] sm:$0xfe] %v909_v31  ;;  %v910_v45 = vrot.slane %v671_v32, 7  ;;  %v672_v46 = vmin.f32 %v608_v33, 6.0  ;;  %v609_v47 = vmax.f32 %v454_v34, 0.0  ;;  %v458_v49 = vadd.f32 %v457_v35, %v6341_v38 }
  0xdf   : > { %v459_v51 = vpop.f32.mrf.mxu0 }
  0xe0   : > { %1104 = vst.msk [vmem:[#allocation2 + $0x38] sm:$0xfe] %vm1103_vm5, %v910_v45  ;;  %v911_v57 = vrot.slane %v672_v46, 7  ;;  %v673_v58 = vmin.f32 %v609_v47, 6.0  ;;  %v610_v59 = vmax.f32 %v458_v49, 0.0  ;;  %v460_v61 = vadd.f32 %v459_v51, %v6344_v39 }
  0xe1   : > { %v461_v62 = vpop.f32.mrf.mxu0 }
  0xe2   : > { %v912_v42 = vsel %vm908_vm6, %v909_v31, %v911_v57  ;;  %1107 = vst [vmem:[#allocation2 + $0x50] sm:$0x1] %v911_v57  ;;  %v913_v7 = vrot.slane %v673_v58, 7  ;;  %v674_v8 = vmin.f32 %v610_v59, 6.0  ;;  %v611_v9 = vmax.f32 %v460_v61, 0.0 }
  0xe3   : > { %1105 = vst [vmem:[#allocation2 + $0x40] sm:$0xff] %v912_v42  ;;  %v462_v10 = vadd.f32 %v461_v62, %v6341_v38  ;;  %v463_v11 = vpop.f32.mrf.mxu0  ;;  %v2584_v14 = vmul.f32 %v6355_v48, %v912_v42  ;;  %v6429_v13 = vmul.f32 %v6397_v44, %v912_v42  ;;  %v6432_v6 = vmul.f32 %v6412_v40, %v912_v42 }
  0xe4   : > { %v914_v16 = vsel %vm908_vm6, %v910_v45, %v913_v7  ;;  %1109 = vst.msk [vmem:[#allocation2 + $0x58] sm:$0x1] %vm1108_vm7, %v913_v7  ;;  %v915_v15 = vrot.slane %v674_v8, 7  ;;  %v675_v18 = vmin.f32 %v611_v9, 6.0  ;;  %v464_v19 = vadd.f32 %v463_v11, %v6344_v39 }
  0xe5   : > { %1106 = vst.msk [vmem:[#allocation2 + $0x48] sm:$0xff] %vm735_vm1, %v914_v16  ;;  %v612_v20 = vmax.f32 %v462_v10, 0.0  ;;  %v467_v21 = vpop.f32.mrf.mxu0  ;;  %v2510_v22 = vld [vmem:[#allocation2 + $0x30] sm:$0xff]  ;;  %v6438_v23 = vadd.f32 %v2584_v14, %v2448_v0  ;;  %v2975_v25 = vrot.slane %v6429_v13, 1  ;;  %v3527_v28 = vrot.slane %v6432_v6, 2 }
  0xe6   : > { %v2710_v24 = vld [vmem:[#allocation2 + $0x30] sm:$0xfe]  ;;  %1110 = vst [vmem:[#allocation2 + $0x60] sm:$0xfe] %v915_v15  ;;  %v916_v29 = vrot.slane %v675_v18, 7  ;;  %v613_v30 = vmax.f32 %v464_v19, 0.0  ;;  %v468_v31 = vadd.f32 %v467_v21, %v6341_v38  ;;  %v2582_v32 = vmul.f32 %v6355_v48, %v2510_v22 }
  0xe7   : > { %v3262_v33 = vld [vmem:[#allocation2 + $0x30] sm:$0xfc]  ;;  %v676_v34 = vmin.f32 %v612_v20, 6.0  ;;  %v469_v35 = vpop.f32.mrf.mxu0  ;;  %v6444_v37 = vld [vmem:[#allocation2 + $0x38] sm:$0xff]  ;;  %v6447_v46 = vmul.f32 %v6397_v44, %v2710_v24  ;;  %v6453_v49 = vmul.f32 %v2510_v22, %v6365_v56 }
  0xe8   : > { %v2711_v43 = vld [vmem:[#allocation2 + $0x38] sm:$0xfe]  ;;  %v6450_v47 = vmul.f32 %v6412_v40, %v3262_v33  ;;  %1111 = vst.msk [vmem:[#allocation2 + $0x68] sm:$0xfe] %vm1103_vm5, %v916_v29  ;;  %v677_v50 = vmin.f32 %v613_v30, 6.0  ;;  %v614_v51 = vmax.f32 %v468_v31, 0.0  ;;  %v470_v57 = vadd.f32 %v469_v35, %v6344_v39 }
  0xe9   : > { %v3263_v45 = vld [vmem:[#allocation2 + $0x38] sm:$0xfc]  ;;  %v2583_v58 = vmul.f32 %v6361_v55, %v6444_v37  ;;  %v917_v59 = vrot.slane %v676_v34, 7  ;;  %v471_v61 = vpop.f32.mrf.mxu0  ;;  %v2783_v62 = vmul.f32 %v6371_v60, %v2711_v43  ;;  %v6461_v42 = vadd.f32 %v2582_v32, %v2446_v54 }
  0xea   : > { %v3335_v0 = vmul.f32 %v6378_v3, %v3263_v45  ;;  %v919_v7 = vrot.slane %v677_v50, 7  ;;  %v678_v8 = vmin.f32 %v614_v51, 6.0  ;;  %v615_v9 = vmax.f32 %v470_v57, 0.0 }
  0xeb   : > { %v472_v10 = vadd.f32 %v471_v61, %v6341_v38  ;;  %v6465_v11 = vsel %vm908_vm6, %v915_v15, %v917_v59  ;;  %1114 = vst [vmem:[#allocation2 + $0x80] sm:$0x1] %v917_v59  ;;  %v473_v14 = vpop.f32.mrf.mxu0  ;;  %v2647_v16 = vadd.f32 %v2583_v58, %v6373_v1  ;;  %v2713_v18 = vld [vmem:[#allocation2 + $0x58] sm:$0x1]  ;;  %v2977_v19 = vrot.slane %v2783_v62, 1 }
  0xec   : > { %v3529_v20 = vrot.slane %v3335_v0, 2  ;;  %1112 = vst [vmem:[#allocation2 + $0x70] sm:$0xff] %v6465_v11  ;;  %v920_v54 = vsel %vm908_vm6, %v916_v29, %v919_v7  ;;  %1115 = vst.msk [vmem:[#allocation2 + $0x88] sm:$0x1] %vm1108_vm7, %v919_v7  ;;  %v921_v21 = vrot.slane %v678_v8, 7  ;;  %v679_v22 = vmin.f32 %v615_v9, 6.0 }
  0xed   : > { %v616_v24 = vmax.f32 %v472_v10, 0.0  ;;  %v6471_v30 = vld [vmem:[#allocation2 + $0x48] sm:$0xff]  ;;  %1113 = vst.msk [vmem:[#allocation2 + $0x78] sm:$0xff] %vm735_vm1, %v920_v54  ;;  %v474_v15 = vadd.f32 %v473_v14, %v6344_v39  ;;  %v477_v31 = vpop.f32.mrf.mxu0  ;;  %v2787_v29 = vmul.f32 %v6371_v60, %v2713_v18  ;;  %v3265_v33 = vld [vmem:[#allocation2 + $0x58] sm:$0x3] }
  0xee   : > { %v2585_v1 = vmul.f32 %v6361_v55, %v6471_v30  ;;  %v2785_v32 = vmul.f32 %v6371_v60, %v6471_v30  ;;  %1116 = vst [vmem:[#allocation2 + $0x90] sm:$0xfe] %v921_v21  ;;  %v922_v34 = vrot.slane %v679_v22, 7  ;;  %v478_v43 = vadd.f32 %v477_v31, %v6341_v38 }
  0xef   : > { %v680_v35 = vmin.f32 %v616_v24, 6.0  ;;  %v3337_v45 = vmul.f32 %v6378_v3, %v6471_v30  ;;  %v617_v50 = vmax.f32 %v474_v15, 0.0  ;;  %v479_v51 = vpop.f32.mrf.mxu0  ;;  %v2982_v59 = vrot.slane %v2787_v29, 1  ;;  %v6491_v15 = vld [vmem:[#allocation2 + $0x68] sm:$0xff] }
  0xf0   : > { %v2649_v57 = vadd.f32 %v2585_v1, %v6387_v26  ;;  %v2978_v58 = vrot.slane %v2785_v32, 1  ;;  %1117 = vst.msk [vmem:[#allocation2 + $0x98] sm:$0xfe] %vm1103_vm5, %v922_v34  ;;  %v618_v62 = vmax.f32 %v478_v43, 0.0  ;;  %v480_v0 = vadd.f32 %v479_v51, %v6344_v39 }
  0xf1   : > { %v923_v61 = vrot.slane %v680_v35, 7  ;;  %v3339_v7 = vmul.f32 %v6378_v3, %v3265_v33  ;;  %v681_v8 = vmin.f32 %v617_v50, 6.0  ;;  %v481_v9 = vpop.f32.mrf.mxu0  ;;  %v3530_v18 = vrot.slane %v3337_v45, 2  ;;  %v4016_v50 = vld [vmem:[#allocation2 + $0x68] sm:$0xfe] }
  0xf2   : > { %v2979_v10 = vsel %vm1668_vm3, %v2977_v19, %v2978_v58  ;;  %v2983_v14 = vsel %vm1668_vm3, %v2978_v58, %v2982_v59  ;;  %v682_v26 = vmin.f32 %v618_v62, 6.0  ;;  %v619_v22 = vmax.f32 %v480_v0, 0.0 }
  0xf3   : > { %v924_v54 = vsel %vm908_vm6, %v921_v21, %v923_v61  ;;  %1120 = vst [vmem:[#allocation2 + $0xb0] sm:$0x1] %v923_v61  ;;  %v482_v24 = vadd.f32 %v481_v9, %v6341_v38  ;;  %v925_v31 = vrot.slane %v681_v8, 7  ;;  %v483_v1 = vpop.f32.mrf.mxu0  ;;  %v3199_v32 = vadd.f32 %v2979_v10, %v2647_v16  ;;  %v4018_v8 = vld [vmem:[#allocation2 + $0x88] sm:$0x1] }
  0xf4   : > { %1118 = vst [vmem:[#allocation2 + $0xa0] sm:$0xff] %v924_v54  ;;  %v3201_v29 = vadd.f32 %v2983_v14, %v2649_v57  ;;  %v3531_v33 = vsel %vm2221_vm4, %v3529_v20, %v3530_v18  ;;  %v927_v19 = vrot.slane %v682_v26, 7  ;;  %v683_v35 = vmin.f32 %v619_v22, 6.0  ;;  %v6495_v21 = vld [vmem:[#allocation2 + $0x78] sm:$0xff] }
  0xf5   : > { %v620_v43 = vmax.f32 %v482_v24, 0.0  ;;  %v484_v45 = vadd.f32 %v483_v1, %v6344_v39  ;;  %v926_v51 = vsel %vm908_vm6, %v922_v34, %v925_v31  ;;  %1121 = vst.msk [vmem:[#allocation2 + $0xb8] sm:$0x1] %vm1108_vm7, %v925_v31  ;;  %v487_v58 = vpop.f32.mrf.mxu0  ;;  %v3534_v59 = vrot.slane %v3339_v7, 2  ;;  %v6512_v1 = vld [vmem:[%s8679_s3 + $0x18] ss:$0 sm:$0xff] }
  0xf6   : > { %v3751_v61 = vadd.f32 %v3531_v33, %v3199_v32  ;;  %v3888_v16 = vmul.f32 %v6404_v52, %v6491_v15  ;;  %1119 = vst.msk [vmem:[#allocation2 + $0xa8] sm:$0xff] %vm735_vm1, %v926_v51  ;;  %1122 = vst [vmem:[#allocation2 + $0xc0] sm:$0xfe] %v927_v19  ;;  %v928_v20 = vrot.slane %v683_v35, 7  ;;  %v488_v0 = vadd.f32 %v487_v58, %v6341_v38  ;;  %v4568_v58 = vld [vmem:[#allocation2 + $0x68] sm:$0xfc] }
  0xf7   : > { %v684_v57 = vmin.f32 %v620_v43, 6.0  ;;  %v621_v62 = vmax.f32 %v484_v45, 0.0  ;;  %v489_v9 = vpop.f32.mrf.mxu0  ;;  %v3535_v34 = vsel %vm2221_vm4, %v3530_v18, %v3534_v59  ;;  %v3890_v10 = vmul.f32 %v6404_v52, %v6495_v21 }
  0xf8   : > { %v3952_v7 = vadd.f32 %v3888_v16, %v3751_v61  ;;  %v4088_v14 = vmul.f32 %v6407_v53, %v4016_v50  ;;  %1123 = vst.msk [vmem:[#allocation2 + $0xc8] sm:$0xfe] %vm1103_vm5, %v928_v20  ;;  %v622_v22 = vmax.f32 %v488_v0, 0.0  ;;  %v490_v24 = vadd.f32 %v489_v9, %v6344_v39  ;;  %v4570_v9 = vld [vmem:[#allocation2 + $0x88] sm:$0x3] }
  0xf9   : > { %v929_v54 = vrot.slane %v684_v57, 7  ;;  %v685_v26 = vmin.f32 %v621_v62, 6.0  ;;  %v491_v31 = vpop.f32.mrf.mxu0  ;;  %v3753_v18 = vadd.f32 %v3535_v34, %v3201_v29  ;;  %v4090_v32 = vmul.f32 %v6407_v53, %v6495_v21 }
  0xfa   : > { %v4092_v33 = vmul.f32 %v6407_v53, %v4018_v8  ;;  %v4282_v35 = vrot.slane %v4088_v14, 1  ;;  %v686_v50 = vmin.f32 %v622_v22, 6.0  ;;  %v623_v51 = vmax.f32 %v490_v24, 0.0 }
  0xfb   : > { %v930_v43 = vsel %vm908_vm6, %v927_v19, %v929_v54  ;;  %1126 = vst [vmem:[#allocation2 + $0xe0] sm:$0x1] %v929_v54  ;;  %v931_v45 = vrot.slane %v685_v26, 7  ;;  %v492_v59 = vadd.f32 %v491_v31, %v6341_v38  ;;  %v493_v61 = vpop.f32.mrf.mxu0  ;;  %v3954_v16 = vadd.f32 %v3890_v10, %v3753_v18  ;;  %v2712_v18 = vld [vmem:[#allocation2 + $0x50] sm:$0x1] }
  0xfc   : > { %1124 = vst [vmem:[#allocation2 + $0xd0] sm:$0xff] %v930_v43  ;;  %v4283_v57 = vrot.slane %v4090_v32, 1  ;;  %v4287_v29 = vrot.slane %v4092_v33, 1  ;;  %v933_v0 = vrot.slane %v686_v50, 7  ;;  %v687_v8 = vmin.f32 %v623_v51, 6.0 }
  0xfd   : > { %v932_v62 = vsel %vm908_vm6, %v928_v20, %v931_v45  ;;  %1127 = vst.msk [vmem:[#allocation2 + $0xe8] sm:$0x1] %vm1108_vm7, %v931_v45  ;;  %v494_v19 = vadd.f32 %v493_v61, %v6344_v39  ;;  %v624_v34 = vmax.f32 %v492_v59, 0.0  ;;  %v497_v14 = vpop.f32.mrf.mxu0  ;;  %v4640_v10 = vmul.f32 %v6512_v1, %v4568_v58 }
  0xfe   : > { %1125 = vst.msk [vmem:[#allocation2 + $0xd8] sm:$0xff] %vm735_vm1, %v932_v62  ;;  %v4284_v54 = vsel %vm1668_vm3, %v4282_v35, %v4283_v57  ;;  %v4288_v26 = vsel %vm1668_vm3, %v4283_v57, %v4287_v29  ;;  %1128 = vst [vmem:[#allocation2 + $0xf0] sm:$0xfe] %v933_v0  ;;  %v934_v22 = vrot.slane %v687_v8, 7  ;;  %v498_v24 = vadd.f32 %v497_v14, %v6341_v38 }
  0xff   : > { %v625_v20 = vmax.f32 %v494_v19, 0.0  ;;  %v4504_v31 = vadd.f32 %v4284_v54, %v3952_v7  ;;  %v688_v32 = vmin.f32 %v624_v34, 6.0  ;;  %v499_v33 = vpop.f32.mrf.mxu0  ;;  %v4506_v43 = vadd.f32 %v4288_v26, %v3954_v16 }
 0x100   : > { %v4642_v45 = vmul.f32 %v6512_v1, %v6495_v21  ;;  %v4644_v50 = vmul.f32 %v6512_v1, %v4570_v9  ;;  %1129 = vst.msk [vmem:[#allocation2 + $0xf8] sm:$0xfe] %vm1103_vm5, %v934_v22  ;;  %v626_v51 = vmax.f32 %v498_v24, 0.0  ;;  %v500_v58 = vadd.f32 %v499_v33, %v6344_v39 }
 0x101   : > { %v689_v35 = vmin.f32 %v625_v20, 6.0  ;;  %v4834_v59 = vrot.slane %v4640_v10, 2  ;;  %v935_v61 = vrot.slane %v688_v32, 7  ;;  %v501_v57 = vpop.f32.mrf.mxu0  ;;  %v2786_v62 = vmul.f32 %v6397_v44, %v2712_v18 }
 0x102   : > { %v4835_v29 = vrot.slane %v4642_v45, 2  ;;  %v4839_v7 = vrot.slane %v4644_v50, 2  ;;  %v690_v16 = vmin.f32 %v626_v51, 6.0  ;;  %v627_v19 = vmax.f32 %v500_v58, 0.0 }
 0x103   : > { %v937_v8 = vrot.slane %v689_v35, 7  ;;  %v502_v34 = vadd.f32 %v501_v57, %v6341_v38  ;;  %v936_v9 = vsel %vm908_vm6, %v933_v0, %v935_v61  ;;  %1132 = vst [vmem:[#allocation2 + $0x110] sm:$0x1] %v935_v61  ;;  %v503_v14 = vpop.f32.mrf.mxu0  ;;  %v2974_v10 = vrot.slane %v6447_v46, 1 }
 0x104   : > { %v4836_v54 = vsel %vm2221_vm4, %v4834_v59, %v4835_v29  ;;  %v4840_v26 = vsel %vm2221_vm4, %v4835_v29, %v4839_v7  ;;  %1130 = vst [vmem:[#allocation2 + $0x100] sm:$0xff] %v936_v9  ;;  %v939_v24 = vrot.slane %v690_v16, 7  ;;  %v691_v18 = vmin.f32 %v627_v19, 6.0 }
 0x105   : > { %v938_v20 = vsel %vm908_vm6, %v934_v22, %v937_v8  ;;  %1133 = vst.msk [vmem:[#allocation2 + $0x118] sm:$0x1] %vm1108_vm7, %v937_v8  ;;  %v628_v32 = vmax.f32 %v502_v34, 0.0  ;;  %v504_v0 = vadd.f32 %v503_v14, %v6344_v39  ;;  %v507_v33 = vpop.f32.mrf.mxu0  ;;  %v5056_v45 = vadd.f32 %v4836_v54, %v4504_v31  ;;  %v3264_v31 = vld [vmem:[#allocation2 + $0x50] sm:$0x3]  ;;  %v6555_v54 = vld [vmem:[#allocation2 + $0x60] sm:$0xff] }
 0x106   : > { %1131 = vst.msk [vmem:[#allocation2 + $0x108] sm:$0xff] %vm735_vm1, %v938_v20  ;;  %v5058_v50 = vadd.f32 %v4840_v26, %v4506_v43  ;;  %v2976_v35 = vsel %vm1668_vm3, %v2974_v10, %v2975_v25  ;;  %1134 = vst [vmem:[#allocation2 + $0x120] sm:$0xfe] %v939_v24  ;;  %v940_v46 = vrot.slane %v691_v18, 7  ;;  %v508_v22 = vadd.f32 %v507_v33, %v6341_v38 }
 0x107   : > { %v692_v51 = vmin.f32 %v628_v32, 6.0  ;;  %v2980_v58 = vrot.slane %v2786_v62, 1  ;;  %v629_v59 = vmax.f32 %v504_v0, 0.0  ;;  %v5132_v61 = vadd.f32 %v6420_v5, %v5056_v45  ;;  %v509_v29 = vpop.f32.mrf.mxu0  ;;  %v4015_v32 = vld [vmem:[#allocation2 + $0x60] sm:$0xfe] }
 0x108   : > { %v5134_v57 = vadd.f32 %v6420_v5, %v5058_v50  ;;  %v3198_v7 = vadd.f32 %v2976_v35, %v6461_v42  ;;  %1135 = vst.msk [vmem:[#allocation2 + $0x128] sm:$0xfe] %vm1103_vm5, %v940_v46  ;;  %v630_v8 = vmax.f32 %v508_v22, 0.0  ;;  %v510_v16 = vadd.f32 %v509_v29, %v6344_v39  ;;  %v4567_v45 = vld [vmem:[#allocation2 + $0x60] sm:$0xfc] }
 0x109   : > { %v941_v43 = vrot.slane %v692_v51, 7  ;;  %v2981_v19 = vsel %vm1668_vm3, %v2975_v25, %v2980_v58  ;;  %v693_v62 = vmin.f32 %v629_v59, 6.0  ;;  %v5196_v34 = vmax.f32 %v5132_v61, 0.0  ;;  %v511_v26 = vpop.f32.mrf.mxu0  ;;  %v4017_v51 = vld [vmem:[#allocation2 + $0x80] sm:$0x1] }
 0x10a   : > { %v5198_v9 = vmax.f32 %v5134_v57, 0.0  ;;  %v3200_v14 = vadd.f32 %v2981_v19, %v6438_v23  ;;  %v6558_v10 = vmin.f32 %v630_v8, 6.0  ;;  %v631_v20 = vmax.f32 %v510_v16, 0.0  ;;  %v4569_v29 = vld [vmem:[#allocation2 + $0x80] sm:$0x3] }
 0x10b   : > { %v942_v42 = vsel %vm908_vm6, %v939_v24, %v941_v43  ;;  %1138 = vst [vmem:[#allocation2 + $0x140] sm:$0x1] %v941_v43  ;;  %v3338_v18 = vmul.f32 %v6412_v40, %v3264_v31  ;;  %v943_v13 = vrot.slane %v693_v62, 7  ;;  %v5260_v25 = vmin.f32 %v5196_v34, 6.0  ;;  %v513_v22 = vpop.f32.mrf.mxu0 }
 0x10c   : > { %1136 = vst [vmem:[#allocation2 + $0x130] sm:$0xff] %v942_v42  ;;  %v5262_v0 = vmin.f32 %v5198_v9, 6.0  ;;  %v3526_v33 = vrot.slane %v6450_v47, 2  ;;  %v945_v23 = vrot.slane %v6558_v10, 7  ;;  %v6563_v50 = vmin.f32 %v631_v20, 6.0 }
 0x10d   : > { %v3532_v35 = vrot.slane %v3338_v18, 2  ;;  %v3887_v24 = vmul.f32 %v6393_v36, %v6555_v54  ;;  %v944_v58 = vsel %vm908_vm6, %v940_v46, %v943_v13  ;;  %1139 = vst.msk [vmem:[#allocation2 + $0x148] sm:$0x1] %vm1108_vm7, %v943_v13  ;;  %v6572_v47 = vld [vmem:[%s8679_s3 + $0x10] ss:$0 sm:$0xff]  ;;  %v3889_v57 = vmul.f32 %v6393_v36, %v6465_v11 }
 0x10e   : > { %v5324_v59 = vpack.c.bf16 %v5262_v0, %v5260_v25  ;;  %v3528_v61 = vsel %vm2221_vm4, %v3526_v33, %v3527_v28  ;;  %1137 = vst.msk [vmem:[#allocation2 + $0x138] sm:$0xff] %vm735_vm1, %v944_v58  ;;  %1140 = vst [vmem:[#allocation2 + $0x150] sm:$0xfe] %v945_v23  ;;  %v946_v46 = vrot.slane %v6563_v50, 7  ;;  %v4087_v8 = vmul.f32 %v6423_v4, %v4015_v32 }
 0x10f   : > { %v3533_v31 = vsel %vm2221_vm4, %v3527_v28, %v3532_v35  ;;  %v3750_v43 = vadd.f32 %v3528_v61, %v3198_v7  ;;  %v4089_v19 = vmul.f32 %v6423_v4, %v6465_v11  ;;  %v4091_v62 = vmul.f32 %v6423_v4, %v4017_v51  ;;  %v517_v7 = vpop.f32.mrf.mxu0 }
 0x110   : > { %5830 = vmatprep.mubr.msk.bf16.mxu0 %vm735_vm1, %v5324_v59  ;;  %v3752_v16 = vadd.f32 %v3533_v31, %v3200_v14  ;;  %v4639_v34 = vmul.f32 %v6572_v47, %v4567_v45  ;;  %1141 = vst.msk [vmem:[#allocation2 + $0x158] sm:$0xfe] %vm1103_vm5, %v946_v46  ;;  %v4279_v42 = vrot.slane %v4087_v8, 1  ;;  %v4641_v6 = vmul.f32 %v6572_v47, %v6465_v11 }
 0x111   : > { %v3951_v9 = vadd.f32 %v3887_v24, %v3750_v43  ;;  %v4643_v28 = vmul.f32 %v6572_v47, %v4569_v29  ;;  %v4280_v18 = vrot.slane %v4089_v19, 1  ;;  %v4285_v14 = vrot.slane %v4091_v62, 1  ;;  %v1409_v24 = vld [vmem:[#allocation2 + $0x38] sm:$0xfe] }
 0x112   : > { %v3953_v20 = vadd.f32 %v3889_v57, %v3752_v16  ;;  %v4831_v32 = vrot.slane %v4639_v34, 2  ;;  %v4832_v13 = vrot.slane %v4641_v6, 2  ;;  %v512_v0 = vadd.f32 %v511_v26, %v6341_v38  ;;  %v1411_v57 = vld [vmem:[#allocation2 + $0x58] sm:$0x1] }
 0x113   : > { %v4837_v25 = vrot.slane %v4643_v28, 2  ;;  %v514_v33 = vadd.f32 %v513_v22, %v6344_v39  ;;  %v4281_v45 = vsel %vm1668_vm3, %v4279_v42, %v4280_v18  ;;  %v4286_v50 = vsel %vm1668_vm3, %v4280_v18, %v4285_v14  ;;  %v1962_v42 = vld [vmem:[#allocation2 + $0x38] sm:$0xfc] }
 0x114   : > { %v518_v35 = vadd.f32 %v517_v7, %v6341_v38  ;;  %v1281_v11 = vmul.f32 %v6444_v37, %v6323_v17  ;;  %v4503_v51 = vadd.f32 %v4281_v45, %v3951_v9  ;;  %v4505_v58 = vadd.f32 %v4286_v50, %v3953_v20  ;;  %v1964_v45 = vld [vmem:[#allocation2 + $0x58] sm:$0x3] }
 0x115   : > { %v4833_v59 = vsel %vm2221_vm4, %v4831_v32, %v4832_v13  ;;  %v4838_v61 = vsel %vm2221_vm4, %v4832_v13, %v4837_v25  ;;  %v632_v26 = vmax.f32 %v512_v0, 0.0  ;;  %v633_v29 = vmax.f32 %v514_v33, 0.0 }
 0x116   : > { %v634_v22 = vmax.f32 %v518_v35, 0.0  ;;  %v1283_v31 = vmul.f32 %v6471_v30, %v6323_v17  ;;  %v5055_v43 = vadd.f32 %v4833_v59, %v4503_v51  ;;  %v5057_v8 = vadd.f32 %v4838_v61, %v4505_v58  ;;  %v2715_v59 = vld [vmem:[#allocation2 + $0x68] sm:$0xfe] }
 0x117   : > { %v1483_v16 = vmul.f32 %v6305_v2, %v1409_v24  ;;  %v1485_v37 = vmul.f32 %v6471_v30, %v6305_v2  ;;  %v696_v19 = vmin.f32 %v632_v26, 6.0  ;;  %v697_v62 = vmin.f32 %v633_v29, 6.0  ;;  %v2717_v26 = vld [vmem:[#allocation2 + $0x88] sm:$0x1] }
 0x118   : > { %v6610_v34 = vmin.f32 %v634_v22, 6.0  ;;  %v1487_v9 = vmul.f32 %v6305_v2, %v1411_v57  ;;  %v5131_v6 = vadd.f32 %v6417_v63, %v5055_v43  ;;  %v5133_v28 = vadd.f32 %v6417_v63, %v5057_v8  ;;  %v3269_v8 = vld [vmem:[#allocation2 + $0x88] sm:$0x3] }
 0x119   : > { %v1682_v7 = vrot.slane %v1483_v16, 1  ;;  %v1683_v20 = vrot.slane %v1485_v37, 1  ;;  %v947_v18 = vrot.slane %v696_v19, 7  ;;  %v949_v14 = vrot.slane %v697_v62, 7 }
 0x11a   : > { %v951_v32 = vrot.slane %v6610_v34, 7  ;;  %v1687_v13 = vrot.slane %v1487_v9, 1  ;;  %v5195_v25 = vmax.f32 %v5131_v6, 0.0  ;;  %v5197_v0 = vmax.f32 %v5133_v28, 0.0 }
 0x11b   : > { %v1684_v33 = vsel %vm1668_vm3, %v1682_v7, %v1683_v20  ;;  %v2036_v50 = vmul.f32 %v6311_v12, %v1962_v42  ;;  %v948_v35 = vsel %vm908_vm6, %v945_v23, %v947_v18  ;;  %1144 = vst [vmem:[#allocation2 + $0x170] sm:$0x1] %v947_v18  ;;  %v950_v24 = vsel %vm908_vm6, %v946_v46, %v949_v14  ;;  %v3267_v46 = vld [vmem:[#allocation2 + $0x68] sm:$0xfc]  ;;  %v6643_v18 = vld [vmem:[#allocation2 + $0x98] sm:$0xff] }
 0x11c   : > { %1145 = vst.msk [vmem:[#allocation2 + $0x178] sm:$0x1] %vm1108_vm7, %v949_v14  ;;  %1146 = vst [vmem:[#allocation2 + $0x180] sm:$0xfe] %v951_v32  ;;  %v1688_v51 = vsel %vm1668_vm3, %v1683_v20, %v1687_v13  ;;  %v1898_v58 = vadd.f32 %v1684_v33, %v1281_v11  ;;  %v5259_v61 = vmin.f32 %v5195_v25, 6.0  ;;  %v5261_v57 = vmin.f32 %v5197_v0, 6.0 }
 0x11d   : > { %1142 = vst [vmem:[#allocation2 + $0x160] sm:$0xff] %v948_v35  ;;  %1143 = vst.msk [vmem:[#allocation2 + $0x168] sm:$0xff] %vm735_vm1, %v950_v24  ;;  %v1900_v10 = vadd.f32 %v1688_v51, %v1283_v31  ;;  %v2038_v23 = vmul.f32 %v6471_v30, %v6311_v12  ;;  %v2040_v29 = vmul.f32 %v6311_v12, %v1964_v45  ;;  %v2235_v22 = vrot.slane %v2036_v50, 2  ;;  %v6645_v14 = vld [vmem:[#allocation2 + $0xa8] sm:$0xff]  ;;  %v4020_v45 = vld [vmem:[#allocation2 + $0x98] sm:$0xfe] }
 0x11e   : > { %v2587_v43 = vmul.f32 %v6491_v15, %v6361_v55  ;;  %v2589_v11 = vmul.f32 %v6495_v21, %v6361_v55  ;;  %v5323_v16 = vpack.c.bf16 %v5261_v57, %v5259_v61  ;;  %v2789_v19 = vmul.f32 %v6371_v60, %v2715_v59  ;;  %v4022_v59 = vld [vmem:[#allocation2 + $0xb8] sm:$0x1]  ;;  %v4572_v61 = vld [vmem:[#allocation2 + $0x98] sm:$0xfc] }
 0x11f   : > { %v2236_v37 = vrot.slane %v2038_v23, 2  ;;  %v2791_v31 = vmul.f32 %v6495_v21, %v6371_v60  ;;  %v2240_v30 = vrot.slane %v2040_v29, 2  ;;  %v2793_v62 = vmul.f32 %v6371_v60, %v2717_v26 }
 0x120   : > { %v3341_v9 = vmul.f32 %v6378_v3, %v3267_v46  ;;  %v3343_v42 = vmul.f32 %v6495_v21, %v6378_v3  ;;  %5539 = vmatmul.mubr.bf16.vlgmr.msra.gmra.mxu0 %v5323_v16  ;;  %v2987_v28 = vrot.slane %v2789_v19, 1  ;;  %v3345_v20 = vmul.f32 %v6378_v3, %v3269_v8 }
 0x121   : > { %v2237_v6 = vsel %vm2221_vm4, %v2235_v22, %v2236_v37  ;;  %v2988_v7 = vrot.slane %v2791_v31, 1  ;;  %v2241_v13 = vsel %vm2221_vm4, %v2236_v37, %v2240_v30  ;;  %v2992_v0 = vrot.slane %v2793_v62, 1  ;;  %v519_v31 = vpop.f32.mrf.mxu0 }
 0x122   : > { %v2451_v25 = vadd.f32 %v2237_v6, %v1898_v58  ;;  %v3539_v33 = vrot.slane %v3341_v9, 2  ;;  %v2453_v50 = vadd.f32 %v2241_v13, %v1900_v10  ;;  %v3540_v24 = vrot.slane %v3343_v42, 2  ;;  %v4574_v58 = vld [vmem:[#allocation2 + $0xb8] sm:$0x3]  ;;  %v1210_v42 = vld [vmem:[#allocation2 + $0x40] sm:$0xff] }
 0x123   : > { %v2989_v35 = vsel %vm1668_vm3, %v2987_v28, %v2988_v7  ;;  %v3544_v51 = vrot.slane %v3345_v20, 2  ;;  %v2993_v23 = vsel %vm1668_vm3, %v2988_v7, %v2992_v0  ;;  %v3892_v26 = vmul.f32 %v6404_v52, %v6643_v18 }
 0x124   : > { %v2651_v57 = vadd.f32 %v2587_v43, %v2451_v25  ;;  %v3894_v46 = vmul.f32 %v6404_v52, %v6645_v14  ;;  %v2653_v29 = vadd.f32 %v2589_v11, %v2453_v50  ;;  %v3541_v22 = vsel %vm2221_vm4, %v3539_v33, %v3540_v24  ;;  %v1410_v50 = vld [vmem:[#allocation2 + $0x50] sm:$0x1] }
 0x125   : > { %v3545_v10 = vsel %vm2221_vm4, %v3540_v24, %v3544_v51  ;;  %v4094_v8 = vmul.f32 %v6407_v53, %v4020_v45  ;;  %v4096_v43 = vmul.f32 %v6407_v53, %v6645_v14  ;;  %v4098_v37 = vmul.f32 %v6407_v53, %v4022_v59  ;;  %v1408_v45 = vld [vmem:[#allocation2 + $0x30] sm:$0xfe] }
 0x126   : > { %v3203_v16 = vadd.f32 %v2989_v35, %v2651_v57  ;;  %v4646_v19 = vmul.f32 %v6512_v1, %v4572_v61  ;;  %v3205_v30 = vadd.f32 %v2993_v23, %v2653_v29  ;;  %v4648_v11 = vmul.f32 %v6512_v1, %v6645_v14  ;;  %v1961_v61 = vld [vmem:[#allocation2 + $0x30] sm:$0xfc] }
 0x127   : > { %v4292_v62 = vrot.slane %v4094_v8, 1  ;;  %v4650_v9 = vmul.f32 %v6512_v1, %v4574_v58  ;;  %v4293_v28 = vrot.slane %v4096_v43, 1  ;;  %v4297_v7 = vrot.slane %v4098_v37, 1 }
 0x128   : > { %v3755_v6 = vadd.f32 %v3541_v22, %v3203_v16  ;;  %v4844_v20 = vrot.slane %v4646_v19, 2  ;;  %v3757_v13 = vadd.f32 %v3545_v10, %v3205_v30  ;;  %v4845_v25 = vrot.slane %v4648_v11, 2  ;;  %v1963_v16 = vld [vmem:[#allocation2 + $0x50] sm:$0x3] }
 0x129   : > { %v4849_v0 = vrot.slane %v4650_v9, 2  ;;  %v520_v33 = vadd.f32 %v519_v31, %v6344_v39  ;;  %v4294_v24 = vsel %vm1668_vm3, %v4292_v62, %v4293_v28  ;;  %v4298_v51 = vsel %vm1668_vm3, %v4293_v28, %v4297_v7 }
 0x12a   : > { %v3956_v35 = vadd.f32 %v3892_v26, %v3755_v6  ;;  %v1282_v59 = vmul.f32 %v6365_v56, %v1210_v42  ;;  %v3958_v57 = vadd.f32 %v3894_v46, %v3757_v13  ;;  %v4846_v23 = vsel %vm2221_vm4, %v4844_v20, %v4845_v25  ;;  %v6679_v20 = vld [vmem:[#allocation2 + $0x70] sm:$0xff] }
 0x12b   : > { %v4850_v58 = vsel %vm2221_vm4, %v4845_v25, %v4849_v0  ;;  %v635_v29 = vmax.f32 %v520_v33, 0.0  ;;  %v1482_v10 = vmul.f32 %v6333_v27, %v1408_v45  ;;  %v1484_v8 = vmul.f32 %v6333_v27, %v1210_v42 }
 0x12c   : > { %v4508_v22 = vadd.f32 %v4294_v24, %v3956_v35  ;;  %v1486_v26 = vmul.f32 %v6333_v27, %v1410_v50  ;;  %v4510_v43 = vadd.f32 %v4298_v51, %v3958_v57  ;;  %v2035_v19 = vmul.f32 %v6348_v41, %v1961_v61  ;;  %v2716_v51 = vld [vmem:[#allocation2 + $0x80] sm:$0x1] }
 0x12d   : > { %v6673_v37 = vmin.f32 %v635_v29, 6.0  ;;  %v2037_v46 = vmul.f32 %v6348_v41, %v1210_v42  ;;  %v1679_v30 = vrot.slane %v1482_v10, 1  ;;  %v1680_v62 = vrot.slane %v1484_v8, 1  ;;  %v2714_v42 = vld [vmem:[#allocation2 + $0x60] sm:$0xfe] }
 0x12e   : > { %v5060_v31 = vadd.f32 %v4846_v23, %v4508_v22  ;;  %v1685_v11 = vrot.slane %v1486_v26, 1  ;;  %v5062_v9 = vadd.f32 %v4850_v58, %v4510_v43  ;;  %v2039_v28 = vmul.f32 %v6348_v41, %v1963_v16  ;;  %v3266_v29 = vld [vmem:[#allocation2 + $0x60] sm:$0xfc] }
 0x12f   : > { %v952_v6 = vrot.slane %v6673_v37, 7  ;;  %v2232_v7 = vrot.slane %v2035_v19, 2  ;;  %v1681_v25 = vsel %vm1668_vm3, %v1679_v30, %v1680_v62  ;;  %v2233_v33 = vrot.slane %v2037_v46, 2  ;;  %v3268_v19 = vld [vmem:[#allocation2 + $0x80] sm:$0x3]  ;;  %v6699_v46 = vld [vmem:[#allocation2 + $0x90] sm:$0xff] }
 0x130   : > { %v5136_v13 = vadd.f32 %v6420_v5, %v5060_v31  ;;  %v1686_v0 = vsel %vm1668_vm3, %v1680_v62, %v1685_v11  ;;  %v5138_v45 = vadd.f32 %v6420_v5, %v5062_v9  ;;  %v1897_v50 = vadd.f32 %v1681_v25, %v6453_v49  ;;  %v6702_v9 = vld [vmem:[#allocation2 + $0xa0] sm:$0xff]  ;;  %v2721_v37 = vld [vmem:[#allocation2 + $0xb8] sm:$0x1] }
 0x131   : > { %1147 = vst.msk [vmem:[#allocation2 + $0x188] sm:$0xfe] %vm1103_vm5, %v952_v6  ;;  %v1899_v35 = vadd.f32 %v1686_v0, %v1282_v59  ;;  %v2238_v24 = vrot.slane %v2039_v28, 2  ;;  %v2234_v57 = vsel %vm2221_vm4, %v2232_v7, %v2233_v33  ;;  %v2586_v23 = vmul.f32 %v6555_v54, %v6355_v48  ;;  %v521_v28 = vpop.f32.mrf.mxu0 }
 0x132   : > { %v5200_v61 = vmax.f32 %v5136_v13, 0.0  ;;  %v2588_v58 = vmul.f32 %v6355_v48, %v6679_v20  ;;  %v5202_v22 = vmax.f32 %v5138_v45, 0.0  ;;  %v2450_v8 = vadd.f32 %v2234_v57, %v1897_v50 }
 0x133   : > { %v2239_v10 = vsel %vm2221_vm4, %v2233_v33, %v2238_v24  ;;  %v2788_v26 = vmul.f32 %v6397_v44, %v2714_v42  ;;  %v2790_v16 = vmul.f32 %v6397_v44, %v6679_v20  ;;  %v2792_v43 = vmul.f32 %v6397_v44, %v2716_v51  ;;  %v4019_v33 = vld [vmem:[#allocation2 + $0x90] sm:$0xfe]  ;;  %v4021_v24 = vld [vmem:[#allocation2 + $0xb0] sm:$0x1] }
 0x134   : > { %v5264_v49 = vmin.f32 %v5200_v61, 6.0  ;;  %v2452_v59 = vadd.f32 %v2239_v10, %v1899_v35  ;;  %v5266_v31 = vmin.f32 %v5202_v22, 6.0  ;;  %v2650_v30 = vadd.f32 %v2586_v23, %v2450_v8  ;;  %v4571_v51 = vld [vmem:[#allocation2 + $0x90] sm:$0xfc] }
 0x135   : > { %v2984_v62 = vrot.slane %v2788_v26, 1  ;;  %v3340_v11 = vmul.f32 %v6412_v40, %v3266_v29  ;;  %v2985_v13 = vrot.slane %v2790_v16, 1  ;;  %v2990_v25 = vrot.slane %v2792_v43, 1  ;;  %v4573_v26 = vld [vmem:[#allocation2 + $0xb0] sm:$0x3] }
 0x136   : > { %v2652_v7 = vadd.f32 %v2588_v58, %v2452_v59  ;;  %v3342_v0 = vmul.f32 %v6412_v40, %v6679_v20  ;;  %v5326_v42 = vpack.c.bf16 %v5266_v31, %v5264_v49  ;;  %v3344_v45 = vmul.f32 %v6412_v40, %v3268_v19  ;;  %v523_v49 = vpop.f32.mrf.mxu0 }
 0x137   : > { %v3536_v50 = vrot.slane %v3340_v11, 2  ;;  %v3891_v35 = vmul.f32 %v6393_v36, %v6699_v46  ;;  %v2986_v61 = vsel %vm1668_vm3, %v2984_v62, %v2985_v13  ;;  %v2991_v57 = vsel %vm1668_vm3, %v2985_v13, %v2990_v25 }
 0x138   : > { %v3537_v23 = vrot.slane %v3342_v0, 2  ;;  %v3893_v58 = vmul.f32 %v6393_v36, %v6702_v9  ;;  %5831 = vmatprep.mubr.msk.bf16.mxu0 %vm735_vm1, %v5326_v42  ;;  %v3202_v29 = vadd.f32 %v2986_v61, %v2650_v30  ;;  %v3204_v22 = vadd.f32 %v2991_v57, %v2652_v7 }
 0x139   : > { %v3542_v10 = vrot.slane %v3344_v45, 2  ;;  %v4093_v8 = vmul.f32 %v6423_v4, %v4019_v33  ;;  %v4095_v16 = vmul.f32 %v6423_v4, %v6702_v9  ;;  %v4097_v43 = vmul.f32 %v6423_v4, %v4021_v24  ;;  %v527_v24 = vpop.f32.mrf.mxu0 }
 0x13a   : > { %v3538_v59 = vsel %vm2221_vm4, %v3536_v50, %v3537_v23  ;;  %v4645_v19 = vmul.f32 %v6572_v47, %v4571_v51  ;;  %v4647_v30 = vmul.f32 %v6572_v47, %v6702_v9  ;;  %v4649_v0 = vmul.f32 %v6572_v47, %v4573_v26 }
 0x13b   : > { %v3543_v31 = vsel %vm2221_vm4, %v3537_v23, %v3542_v10  ;;  %v3754_v62 = vadd.f32 %v3538_v59, %v3202_v29  ;;  %v4289_v11 = vrot.slane %v4093_v8, 1  ;;  %v4290_v13 = vrot.slane %v4095_v16, 1  ;;  %v1413_v59 = vld [vmem:[#allocation2 + $0x68] sm:$0xfe] }
 0x13c   : > { %v3756_v7 = vadd.f32 %v3543_v31, %v3204_v22  ;;  %v4295_v25 = vrot.slane %v4097_v43, 1  ;;  %v4841_v42 = vrot.slane %v4645_v19, 2  ;;  %v4842_v45 = vrot.slane %v4647_v30, 2 }
 0x13d   : > { %v3955_v33 = vadd.f32 %v3891_v35, %v3754_v62  ;;  %v522_v50 = vadd.f32 %v521_v28, %v6341_v38  ;;  %v4291_v51 = vsel %vm1668_vm3, %v4289_v11, %v4290_v13  ;;  %v4847_v23 = vrot.slane %v4649_v0, 2 }
 0x13e   : > { %v3957_v61 = vadd.f32 %v3893_v58, %v3756_v7  ;;  %v4296_v57 = vsel %vm1668_vm3, %v4290_v13, %v4295_v25  ;;  %v4843_v10 = vsel %vm2221_vm4, %v4841_v42, %v4842_v45  ;;  %v524_v8 = vadd.f32 %v523_v49, %v6344_v39  ;;  %v1415_v58 = vld [vmem:[#allocation2 + $0x88] sm:$0x1] }
 0x13f   : > { %v4507_v29 = vadd.f32 %v4291_v51, %v3955_v33  ;;  %v636_v22 = vmax.f32 %v522_v50, 0.0  ;;  %v4848_v35 = vsel %vm2221_vm4, %v4842_v45, %v4847_v23  ;;  %v528_v16 = vadd.f32 %v527_v24, %v6341_v38  ;;  %v1966_v33 = vld [vmem:[#allocation2 + $0x68] sm:$0xfc] }
 0x140   : > { %v4509_v26 = vadd.f32 %v4296_v57, %v3957_v61  ;;  %v1285_v28 = vmul.f32 %v6491_v15, %v6323_v17  ;;  %v637_v31 = vmax.f32 %v524_v8, 0.0  ;;  %v1287_v62 = vmul.f32 %v6495_v21, %v6323_v17 }
 0x141   : > { %v5059_v43 = vadd.f32 %v4843_v10, %v4507_v29  ;;  %v700_v19 = vmin.f32 %v636_v22, 6.0  ;;  %v638_v30 = vmax.f32 %v528_v16, 0.0  ;;  %v1489_v49 = vmul.f32 %v6305_v2, %v1413_v59  ;;  %v1968_v29 = vld [vmem:[#allocation2 + $0x88] sm:$0x3] }
 0x142   : > { %v5061_v11 = vadd.f32 %v4848_v35, %v4509_v26  ;;  %v1491_v7 = vmul.f32 %v6495_v21, %v6305_v2  ;;  %v701_v0 = vmin.f32 %v637_v31, 6.0  ;;  %v1493_v15 = vmul.f32 %v6305_v2, %v1415_v58  ;;  %v2719_v26 = vld [vmem:[#allocation2 + $0x98] sm:$0xfe] }
 0x143   : > { %v5135_v13 = vadd.f32 %v6417_v63, %v5059_v43  ;;  %v953_v25 = vrot.slane %v700_v19, 7  ;;  %v6741_v45 = vmin.f32 %v638_v30, 6.0  ;;  %v1692_v50 = vrot.slane %v1489_v49, 1 }
 0x144   : > { %v5137_v42 = vadd.f32 %v6417_v63, %v5061_v11  ;;  %v1693_v24 = vrot.slane %v1491_v7, 1  ;;  %v955_v57 = vrot.slane %v701_v0, 7  ;;  %v1697_v23 = vrot.slane %v1493_v15, 1  ;;  %v3271_v11 = vld [vmem:[#allocation2 + $0x98] sm:$0xfc] }
 0x145   : > { %v5199_v61 = vmax.f32 %v5135_v13, 0.0  ;;  %v954_v51 = vsel %vm908_vm6, %v951_v32, %v953_v25  ;;  %1150 = vst [vmem:[#allocation2 + $0x1a0] sm:$0x1] %v953_v25  ;;  %v957_v22 = vrot.slane %v6741_v45, 7  ;;  %v2042_v59 = vmul.f32 %v6311_v12, %v1966_v33  ;;  %v3273_v7 = vld [vmem:[#allocation2 + $0xb8] sm:$0x3] }
 0x146   : > { %v5201_v10 = vmax.f32 %v5137_v42, 0.0  ;;  %1148 = vst [vmem:[#allocation2 + $0x190] sm:$0xff] %v954_v51  ;;  %v1694_v8 = vsel %vm1668_vm3, %v1692_v50, %v1693_v24  ;;  %v956_v34 = vsel %vm908_vm6, %v952_v6, %v955_v57  ;;  %1151 = vst.msk [vmem:[#allocation2 + $0x1a8] sm:$0x1] %vm1108_vm7, %v955_v57  ;;  %v1698_v32 = vsel %vm1668_vm3, %v1693_v24, %v1697_v23  ;;  %v6771_v50 = vld [vmem:[#allocation2 + $0xc8] sm:$0xff]  ;;  %v6776_v23 = vld [vmem:[#allocation2 + $0xd8] sm:$0xff] }
 0x147   : > { %v5263_v35 = vmin.f32 %v5199_v61, 6.0  ;;  %v1902_v16 = vadd.f32 %v1694_v8, %v1285_v28  ;;  %1149 = vst.msk [vmem:[#allocation2 + $0x198] sm:$0xff] %vm735_vm1, %v956_v34  ;;  %1152 = vst [vmem:[#allocation2 + $0x1b0] sm:$0xfe] %v957_v22  ;;  %v1904_v43 = vadd.f32 %v1698_v32, %v1287_v62  ;;  %v2044_v19 = vmul.f32 %v6495_v21, %v6311_v12 }
 0x148   : > { %v5265_v58 = vmin.f32 %v5201_v10, 6.0  ;;  %v2046_v31 = vmul.f32 %v6311_v12, %v1968_v29  ;;  %v2245_v6 = vrot.slane %v2042_v59, 2  ;;  %v2591_v30 = vmul.f32 %v6643_v18, %v6361_v55 }
 0x149   : > { %v2593_v28 = vmul.f32 %v6645_v14, %v6361_v55  ;;  %v2795_v49 = vmul.f32 %v6371_v60, %v2719_v26  ;;  %v2246_v25 = vrot.slane %v2044_v19, 2  ;;  %v2797_v21 = vmul.f32 %v6645_v14, %v6371_v60  ;;  %v4024_v26 = vld [vmem:[#allocation2 + $0xc8] sm:$0xfe]  ;;  %v4026_v19 = vld [vmem:[#allocation2 + $0xe8] sm:$0x1] }
 0x14a   : > { %v5325_v13 = vpack.c.bf16 %v5265_v58, %v5263_v35  ;;  %v2250_v62 = vrot.slane %v2046_v31, 2  ;;  %v2799_v0 = vmul.f32 %v6371_v60, %v2721_v37  ;;  %v3347_v33 = vmul.f32 %v6378_v3, %v3271_v11  ;;  %v4576_v31 = vld [vmem:[#allocation2 + $0xc8] sm:$0xfc] }
 0x14b   : > { %v2997_v15 = vrot.slane %v2795_v49, 1  ;;  %v3349_v42 = vmul.f32 %v6645_v14, %v6378_v3  ;;  %v2247_v24 = vsel %vm2221_vm4, %v2245_v6, %v2246_v25  ;;  %v2998_v51 = vrot.slane %v2797_v21, 1 }
 0x14c   : > { %5547 = vmatmul.mubr.bf16.gmra.mxu0 %v5325_v13  ;;  %v2251_v61 = vsel %vm2221_vm4, %v2246_v25, %v2250_v62  ;;  %v3351_v57 = vmul.f32 %v6378_v3, %v3273_v7  ;;  %v2455_v29 = vadd.f32 %v2247_v24, %v1902_v16  ;;  %v3002_v8 = vrot.slane %v2799_v0, 1  ;;  %v529_v0 = vpop.f32.mrf.mxu0 }
 0x14d   : > { %v2457_v10 = vadd.f32 %v2251_v61, %v1904_v43  ;;  %v3549_v59 = vrot.slane %v3347_v33, 2  ;;  %v2999_v35 = vsel %vm1668_vm3, %v2997_v15, %v2998_v51  ;;  %v3550_v34 = vrot.slane %v3349_v42, 2  ;;  %v4578_v43 = vld [vmem:[#allocation2 + $0xe8] sm:$0x3] }
 0x14e   : > { %v3554_v32 = vrot.slane %v3351_v57, 2  ;;  %v3896_v58 = vmul.f32 %v6404_v52, %v6771_v50  ;;  %v2655_v37 = vadd.f32 %v2591_v30, %v2455_v29  ;;  %v3003_v6 = vsel %vm1668_vm3, %v2998_v51, %v3002_v8 }
 0x14f   : > { %v2657_v11 = vadd.f32 %v2593_v28, %v2457_v10  ;;  %v3898_v16 = vmul.f32 %v6404_v52, %v6776_v23  ;;  %v3551_v49 = vsel %vm2221_vm4, %v3549_v59, %v3550_v34  ;;  %v4100_v13 = vmul.f32 %v6407_v53, %v4024_v26 }
 0x150   : > { %v3555_v7 = vsel %vm2221_vm4, %v3550_v34, %v3554_v32  ;;  %v4102_v25 = vmul.f32 %v6407_v53, %v6776_v23  ;;  %v3207_v62 = vadd.f32 %v2999_v35, %v2655_v37  ;;  %v4104_v30 = vmul.f32 %v6407_v53, %v4026_v19  ;;  %v1412_v35 = vld [vmem:[#allocation2 + $0x60] sm:$0xfe]  ;;  %v1414_v37 = vld [vmem:[#allocation2 + $0x80] sm:$0x1] }
 0x151   : > { %v3209_v21 = vadd.f32 %v3003_v6, %v2657_v11  ;;  %v4652_v28 = vmul.f32 %v6512_v1, %v4576_v31  ;;  %v4302_v15 = vrot.slane %v4100_v13, 1  ;;  %v4654_v42 = vmul.f32 %v6512_v1, %v6776_v23 }
 0x152   : > { %v4303_v33 = vrot.slane %v4102_v25, 1  ;;  %v4656_v24 = vmul.f32 %v6512_v1, %v4578_v43  ;;  %v3759_v61 = vadd.f32 %v3551_v49, %v3207_v62  ;;  %v4307_v57 = vrot.slane %v4104_v30, 1  ;;  %v1965_v1 = vld [vmem:[#allocation2 + $0x60] sm:$0xfc]  ;;  %v1967_v25 = vld [vmem:[#allocation2 + $0x80] sm:$0x3] }
 0x153   : > { %v3761_v51 = vadd.f32 %v3555_v7, %v3209_v21  ;;  %v4854_v29 = vrot.slane %v4652_v28, 2  ;;  %v4855_v8 = vrot.slane %v4654_v42, 2  ;;  %v530_v26 = vadd.f32 %v529_v0, %v6344_v39 }
 0x154   : > { %v4304_v10 = vsel %vm1668_vm3, %v4302_v15, %v4303_v33  ;;  %v4859_v59 = vrot.slane %v4656_v24, 2  ;;  %v3960_v34 = vadd.f32 %v3896_v58, %v3759_v61  ;;  %v4308_v19 = vsel %vm1668_vm3, %v4303_v33, %v4307_v57 }
 0x155   : > { %v3962_v32 = vadd.f32 %v3898_v16, %v3761_v51  ;;  %v1284_v31 = vmul.f32 %v6555_v54, %v6365_v56  ;;  %v4856_v11 = vsel %vm2221_vm4, %v4854_v29, %v4855_v8  ;;  %v639_v43 = vmax.f32 %v530_v26, 0.0 }
 0x156   : > { %v4860_v6 = vsel %vm2221_vm4, %v4855_v8, %v4859_v59  ;;  %v1286_v49 = vmul.f32 %v6679_v20, %v6365_v56  ;;  %v4512_v7 = vadd.f32 %v4304_v10, %v3960_v34  ;;  %v1488_v58 = vmul.f32 %v6333_v27, %v1412_v35  ;;  %v2718_v59 = vld [vmem:[#allocation2 + $0x90] sm:$0xfe] }
 0x157   : > { %v4514_v13 = vadd.f32 %v4308_v19, %v3962_v32  ;;  %v1490_v16 = vmul.f32 %v6679_v20, %v6333_v27  ;;  %v6806_v62 = vmin.f32 %v639_v43, 6.0  ;;  %v1492_v54 = vmul.f32 %v6333_v27, %v1414_v37 }
 0x158   : > { %v2041_v21 = vmul.f32 %v6348_v41, %v1965_v1  ;;  %v2043_v30 = vmul.f32 %v6679_v20, %v6348_v41  ;;  %v5064_v28 = vadd.f32 %v4856_v11, %v4512_v7  ;;  %v1689_v15 = vrot.slane %v1488_v58, 1  ;;  %v2720_v11 = vld [vmem:[#allocation2 + $0xb0] sm:$0x1] }
 0x159   : > { %v5066_v0 = vadd.f32 %v4860_v6, %v4514_v13  ;;  %v1690_v33 = vrot.slane %v1490_v16, 1  ;;  %v958_v42 = vrot.slane %v6806_v62, 7  ;;  %v1695_v24 = vrot.slane %v1492_v54, 1  ;;  %v3270_v6 = vld [vmem:[#allocation2 + $0x90] sm:$0xfc] }
 0x15a   : > { %v2045_v61 = vmul.f32 %v6348_v41, %v1967_v25  ;;  %v2242_v51 = vrot.slane %v2041_v21, 2  ;;  %v5140_v57 = vadd.f32 %v6420_v5, %v5064_v28  ;;  %v2243_v8 = vrot.slane %v2043_v30, 2  ;;  %v3272_v21 = vld [vmem:[#allocation2 + $0xb0] sm:$0x3]  ;;  %v531_v30 = vpop.f32.mrf.mxu0 }
 0x15b   : > { %v5142_v29 = vadd.f32 %v6420_v5, %v5066_v0  ;;  %v1691_v10 = vsel %vm1668_vm3, %v1689_v15, %v1690_v33  ;;  %1153 = vst.msk [vmem:[#allocation2 + $0x1b8] sm:$0xfe] %vm1103_vm5, %v958_v42  ;;  %v1696_v20 = vsel %vm1668_vm3, %v1690_v33, %v1695_v24  ;;  %v2590_v34 = vmul.f32 %v6699_v46, %v6355_v48  ;;  %v6834_v24 = vld [vmem:[#allocation2 + $0xd0] sm:$0xff] }
 0x15c   : > { %v1901_v26 = vadd.f32 %v1691_v10, %v1284_v31  ;;  %v2248_v35 = vrot.slane %v2045_v61, 2  ;;  %v5204_v32 = vmax.f32 %v5140_v57, 0.0  ;;  %v1903_v37 = vadd.f32 %v1696_v20, %v1286_v49  ;;  %v6830_v49 = vld [vmem:[#allocation2 + $0xc0] sm:$0xff] }
 0x15d   : > { %v5206_v19 = vmax.f32 %v5142_v29, 0.0  ;;  %v2244_v1 = vsel %vm2221_vm4, %v2242_v51, %v2243_v8  ;;  %v2592_v13 = vmul.f32 %v6702_v9, %v6355_v48  ;;  %v2794_v58 = vmul.f32 %v6397_v44, %v2718_v59  ;;  %v4023_v61 = vld [vmem:[#allocation2 + $0xc0] sm:$0xfe] }
 0x15e   : > { %v2249_v43 = vsel %vm2221_vm4, %v2243_v8, %v2248_v35  ;;  %v2454_v7 = vadd.f32 %v2244_v1, %v1901_v26  ;;  %v5268_v31 = vmin.f32 %v5204_v32, 6.0  ;;  %v2796_v54 = vmul.f32 %v6702_v9, %v6397_v44  ;;  %v4025_v35 = vld [vmem:[#allocation2 + $0xe0] sm:$0x1]  ;;  %v4575_v1 = vld [vmem:[#allocation2 + $0xc0] sm:$0xfc] }
 0x15f   : > { %v5270_v16 = vmin.f32 %v5206_v19, 6.0  ;;  %v2456_v25 = vadd.f32 %v2249_v43, %v1903_v37  ;;  %v2798_v0 = vmul.f32 %v6397_v44, %v2720_v11  ;;  %v2994_v15 = vrot.slane %v2794_v58, 1  ;;  %v533_v11 = vpop.f32.mrf.mxu0  ;;  %v4577_v58 = vld [vmem:[#allocation2 + $0xe0] sm:$0x3] }
 0x160   : > { %v2654_v28 = vadd.f32 %v2590_v34, %v2454_v7  ;;  %v3346_v33 = vmul.f32 %v6412_v40, %v3270_v6  ;;  %v2995_v29 = vrot.slane %v2796_v54, 1  ;;  %v3348_v10 = vmul.f32 %v6702_v9, %v6412_v40 }
 0x161   : > { %v5328_v51 = vpack.c.bf16 %v5270_v16, %v5268_v31  ;;  %v2656_v57 = vadd.f32 %v2592_v13, %v2456_v25  ;;  %v3000_v8 = vrot.slane %v2798_v0, 1  ;;  %v3350_v59 = vmul.f32 %v6412_v40, %v3272_v21 }
 0x162   : > { %v3546_v20 = vrot.slane %v3346_v33, 2  ;;  %v3895_v26 = vmul.f32 %v6393_v36, %v6830_v49  ;;  %v2996_v34 = vsel %vm1668_vm3, %v2994_v15, %v2995_v29  ;;  %v3547_v32 = vrot.slane %v3348_v10, 2  ;;  %v537_v10 = vpop.f32.mrf.mxu0 }
 0x163   : > { %5832 = vmatprep.mubr.msk.bf16.mxu1 %vm735_vm1, %v5328_v51  ;;  %v3897_v19 = vmul.f32 %v6393_v36, %v6834_v24  ;;  %v4099_v37 = vmul.f32 %v6423_v4, %v4023_v61  ;;  %v3001_v6 = vsel %vm1668_vm3, %v2995_v29, %v3000_v8  ;;  %v3206_v43 = vadd.f32 %v2996_v34, %v2654_v28 }
 0x164   : > { %v3552_v7 = vrot.slane %v3350_v59, 2  ;;  %v4101_v13 = vmul.f32 %v6423_v4, %v6834_v24  ;;  %v3208_v31 = vadd.f32 %v3001_v6, %v2656_v57  ;;  %v3548_v16 = vsel %vm2221_vm4, %v3546_v20, %v3547_v32 }
 0x165   : > { %v4103_v25 = vmul.f32 %v6423_v4, %v4025_v35  ;;  %v4299_v54 = vrot.slane %v4099_v37, 1  ;;  %v3758_v0 = vadd.f32 %v3548_v16, %v3206_v43  ;;  %v4651_v33 = vmul.f32 %v6572_v47, %v4575_v1 }
 0x166   : > { %v3553_v21 = vsel %vm2221_vm4, %v3547_v32, %v3552_v7  ;;  %v4300_v15 = vrot.slane %v4101_v13, 1  ;;  %v4653_v28 = vmul.f32 %v6572_v47, %v6834_v24  ;;  %v4655_v29 = vmul.f32 %v6572_v47, %v4577_v58  ;;  %v1417_v13 = vld [vmem:[#allocation2 + $0x98] sm:$0xfe] }
 0x167   : > { %v3760_v61 = vadd.f32 %v3553_v21, %v3208_v31  ;;  %v4305_v51 = vrot.slane %v4103_v25, 1  ;;  %v3959_v57 = vadd.f32 %v3895_v26, %v3758_v0  ;;  %v4851_v59 = vrot.slane %v4651_v33, 2 }
 0x168   : > { %v4301_v8 = vsel %vm1668_vm3, %v4299_v54, %v4300_v15  ;;  %v532_v20 = vadd.f32 %v531_v30, %v6341_v38  ;;  %v4852_v32 = vrot.slane %v4653_v28, 2  ;;  %v4857_v37 = vrot.slane %v4655_v29, 2  ;;  %v1419_v54 = vld [vmem:[#allocation2 + $0xb8] sm:$0x1] }
 0x169   : > { %v3961_v35 = vadd.f32 %v3897_v19, %v3760_v61  ;;  %v4306_v34 = vsel %vm1668_vm3, %v4300_v15, %v4305_v51  ;;  %v4511_v1 = vadd.f32 %v4301_v8, %v3959_v57  ;;  %v534_v43 = vadd.f32 %v533_v11, %v6344_v39 }
 0x16a   : > { %v640_v6 = vmax.f32 %v532_v20, 0.0  ;;  %v538_v7 = vadd.f32 %v537_v10, %v6341_v38  ;;  %v4853_v26 = vsel %vm2221_vm4, %v4851_v59, %v4852_v32  ;;  %v4858_v58 = vsel %vm2221_vm4, %v4852_v32, %v4857_v37  ;;  %v1972_v32 = vld [vmem:[#allocation2 + $0xb8] sm:$0x3] }
 0x16b   : > { %v4513_v47 = vadd.f32 %v4306_v34, %v3961_v35  ;;  %v1289_v30 = vmul.f32 %v6643_v18, %v6323_v17  ;;  %v5063_v19 = vadd.f32 %v4853_v26, %v4511_v1  ;;  %v641_v16 = vmax.f32 %v534_v43, 0.0  ;;  %v1970_v18 = vld [vmem:[#allocation2 + $0x98] sm:$0xfc] }
 0x16c   : > { %v704_v31 = vmin.f32 %v640_v6, 6.0  ;;  %v642_v25 = vmax.f32 %v538_v7, 0.0  ;;  %v1291_v11 = vmul.f32 %v6645_v14, %v6323_v17  ;;  %v1495_v0 = vmul.f32 %v6305_v2, %v1417_v13 }
 0x16d   : > { %v5065_v21 = vadd.f32 %v4858_v58, %v4513_v47  ;;  %v1497_v15 = vmul.f32 %v6645_v14, %v6305_v2  ;;  %v5139_v33 = vadd.f32 %v6417_v63, %v5063_v19  ;;  %v705_v51 = vmin.f32 %v641_v16, 6.0  ;;  %v2723_v47 = vld [vmem:[#allocation2 + $0xc8] sm:$0xfe] }
 0x16e   : > { %v959_v61 = vrot.slane %v704_v31, 7  ;;  %v6871_v28 = vmin.f32 %v642_v25, 6.0  ;;  %v1499_v10 = vmul.f32 %v6305_v2, %v1419_v54  ;;  %v1702_v57 = vrot.slane %v1495_v0, 1  ;;  %v2725_v31 = vld [vmem:[#allocation2 + $0xe8] sm:$0x1] }
 0x16f   : > { %v5141_v29 = vadd.f32 %v6417_v63, %v5065_v21  ;;  %v1703_v8 = vrot.slane %v1497_v15, 1  ;;  %v5203_v59 = vmax.f32 %v5139_v33, 0.0  ;;  %v961_v35 = vrot.slane %v705_v51, 7  ;;  %v3277_v33 = vld [vmem:[#allocation2 + $0xe8] sm:$0x3] }
 0x170   : > { %v960_v20 = vsel %vm908_vm6, %v957_v22, %v959_v61  ;;  %1156 = vst [vmem:[#allocation2 + $0x1d0] sm:$0x1] %v959_v61  ;;  %v963_v34 = vrot.slane %v6871_v28, 7  ;;  %v1707_v6 = vrot.slane %v1499_v10, 1  ;;  %v2048_v43 = vmul.f32 %v6311_v12, %v1970_v18 }
 0x171   : > { %v5205_v37 = vmax.f32 %v5141_v29, 0.0  ;;  %1154 = vst [vmem:[#allocation2 + $0x1c0] sm:$0xff] %v960_v20  ;;  %v1704_v1 = vsel %vm1668_vm3, %v1702_v57, %v1703_v8  ;;  %v5267_v7 = vmin.f32 %v5203_v59, 6.0  ;;  %v962_v13 = vsel %vm908_vm6, %v958_v42, %v961_v35  ;;  %1157 = vst.msk [vmem:[#allocation2 + $0x1d8] sm:$0x1] %vm1108_vm7, %v961_v35  ;;  %v6904_v29 = vld [vmem:[#allocation2 + $0xf8] sm:$0xff] }
 0x172   : > { %1158 = vst [vmem:[#allocation2 + $0x1e0] sm:$0xfe] %v963_v34  ;;  %v1906_v45 = vadd.f32 %v1704_v1, %v1289_v30  ;;  %v2050_v22 = vmul.f32 %v6645_v14, %v6311_v12  ;;  %1155 = vst.msk [vmem:[#allocation2 + $0x1c8] sm:$0xff] %vm735_vm1, %v962_v13  ;;  %v1708_v58 = vsel %vm1668_vm3, %v1703_v8, %v1707_v6  ;;  %v2255_v62 = vrot.slane %v2048_v43, 2  ;;  %v3275_v42 = vld [vmem:[#allocation2 + $0xc8] sm:$0xfc] }
 0x173   : > { %v5269_v26 = vmin.f32 %v5205_v37, 6.0  ;;  %v2052_v19 = vmul.f32 %v6311_v12, %v1972_v32  ;;  %v1908_v16 = vadd.f32 %v1708_v58, %v1291_v11  ;;  %v2595_v54 = vmul.f32 %v6771_v50, %v6361_v55  ;;  %v6907_v20 = vld [vmem:[#allocation2 + $0x108] sm:$0xff]  ;;  %v4028_v6 = vld [vmem:[#allocation2 + $0xf8] sm:$0xfe] }
 0x174   : > { %v2256_v25 = vrot.slane %v2050_v22, 2  ;;  %v2597_v30 = vmul.f32 %v6776_v23, %v6361_v55  ;;  %v2801_v0 = vmul.f32 %v6371_v60, %v2723_v47  ;;  %v2803_v15 = vmul.f32 %v6776_v23, %v6371_v60  ;;  %v4030_v47 = vld [vmem:[#allocation2 + $0x118] sm:$0x1] }
 0x175   : > { %v5327_v14 = vpack.c.bf16 %v5269_v26, %v5267_v7  ;;  %v2260_v21 = vrot.slane %v2052_v19, 2  ;;  %v2805_v51 = vmul.f32 %v6371_v60, %v2725_v31  ;;  %v3353_v11 = vmul.f32 %v6378_v3, %v3275_v42  ;;  %v4580_v26 = vld [vmem:[#allocation2 + $0xf8] sm:$0xfc] }
 0x176   : > { %v2257_v61 = vsel %vm2221_vm4, %v2255_v62, %v2256_v25  ;;  %v3355_v18 = vmul.f32 %v6776_v23, %v6378_v3  ;;  %v3007_v8 = vrot.slane %v2801_v0, 1  ;;  %v3008_v59 = vrot.slane %v2803_v15, 1  ;;  %v6925_v0 = vld [vmem:[%s8679_s3 + $0x18] ss:$0 sm:$0xff] }
 0x177   : > { %5555 = vmatmul.mubr.bf16.vlgmr.msra.gmra.mxu1 %v5327_v14  ;;  %v2261_v10 = vsel %vm2221_vm4, %v2256_v25, %v2260_v21  ;;  %v2459_v57 = vadd.f32 %v2257_v61, %v1906_v45  ;;  %v3012_v32 = vrot.slane %v2805_v51, 1  ;;  %v3357_v37 = vmul.f32 %v6378_v3, %v3277_v33  ;;  %v539_v33 = vpop.f32.mrf.mxu0 }
 0x178   : > { %v2461_v35 = vadd.f32 %v2261_v10, %v1908_v16  ;;  %v3559_v1 = vrot.slane %v3353_v11, 2  ;;  %v3009_v7 = vsel %vm1668_vm3, %v3007_v8, %v3008_v59  ;;  %v3560_v13 = vrot.slane %v3355_v18, 2 }
 0x179   : > { %v2659_v43 = vadd.f32 %v2595_v54, %v2459_v57  ;;  %v3900_v22 = vmul.f32 %v6404_v52, %v6904_v29  ;;  %v3013_v58 = vsel %vm1668_vm3, %v3008_v59, %v3012_v32  ;;  %v3564_v19 = vrot.slane %v3357_v37, 2  ;;  %v4582_v54 = vld [vmem:[#allocation2 + $0x118] sm:$0x3] }
 0x17a   : > { %v2661_v45 = vadd.f32 %v2597_v30, %v2461_v35  ;;  %v3902_v62 = vmul.f32 %v6404_v52, %v6907_v20  ;;  %v3561_v42 = vsel %vm2221_vm4, %v3559_v1, %v3560_v13  ;;  %v4106_v16 = vmul.f32 %v6407_v53, %v4028_v6  ;;  %v1416_v6 = vld [vmem:[#allocation2 + $0x90] sm:$0xfe] }
 0x17b   : > { %v3211_v31 = vadd.f32 %v3009_v7, %v2659_v43  ;;  %v4108_v25 = vmul.f32 %v6407_v53, %v6907_v20  ;;  %v3565_v21 = vsel %vm2221_vm4, %v3560_v13, %v3564_v19  ;;  %v4110_v30 = vmul.f32 %v6407_v53, %v4030_v47 }
 0x17c   : > { %v3213_v14 = vadd.f32 %v3013_v58, %v2661_v45  ;;  %v4658_v15 = vmul.f32 %v6925_v0, %v4580_v26  ;;  %v4312_v51 = vrot.slane %v4106_v16, 1  ;;  %v4660_v18 = vmul.f32 %v6925_v0, %v6907_v20  ;;  %v1418_v26 = vld [vmem:[#allocation2 + $0xb0] sm:$0x1]  ;;  %v1969_v45 = vld [vmem:[#allocation2 + $0x90] sm:$0xfc] }
 0x17d   : > { %v3763_v61 = vadd.f32 %v3561_v42, %v3211_v31  ;;  %v4313_v11 = vrot.slane %v4108_v25, 1  ;;  %v4317_v57 = vrot.slane %v4110_v30, 1  ;;  %v4662_v8 = vmul.f32 %v6925_v0, %v4582_v54  ;;  %v1971_v54 = vld [vmem:[#allocation2 + $0xb0] sm:$0x3] }
 0x17e   : > { %v3765_v10 = vadd.f32 %v3565_v21, %v3213_v14  ;;  %v4864_v59 = vrot.slane %v4658_v15, 2  ;;  %v4865_v37 = vrot.slane %v4660_v18, 2  ;;  %v540_v1 = vadd.f32 %v539_v33, %v6344_v39 }
 0x17f   : > { %v3964_v35 = vadd.f32 %v3900_v22, %v3763_v61  ;;  %v4314_v32 = vsel %vm1668_vm3, %v4312_v51, %v4313_v11  ;;  %v4318_v7 = vsel %vm1668_vm3, %v4313_v11, %v4317_v57  ;;  %v4869_v13 = vrot.slane %v4662_v8, 2 }
 0x180   : > { %v3966_v43 = vadd.f32 %v3902_v62, %v3765_v10  ;;  %v1288_v47 = vmul.f32 %v6699_v46, %v6365_v56  ;;  %v4866_v19 = vsel %vm2221_vm4, %v4864_v59, %v4865_v37  ;;  %v643_v31 = vmax.f32 %v540_v1, 0.0 }
 0x181   : > { %v4516_v58 = vadd.f32 %v4314_v32, %v3964_v35  ;;  %v1290_v22 = vmul.f32 %v6702_v9, %v6365_v56  ;;  %v4870_v16 = vsel %vm2221_vm4, %v4865_v37, %v4869_v13  ;;  %v1494_v62 = vmul.f32 %v6333_v27, %v1416_v6 }
 0x182   : > { %v4518_v42 = vadd.f32 %v4318_v7, %v3966_v43  ;;  %v1496_v25 = vmul.f32 %v6702_v9, %v6333_v27  ;;  %v6943_v46 = vmin.f32 %v643_v31, 6.0  ;;  %v1498_v21 = vmul.f32 %v6333_v27, %v1418_v26  ;;  %v2722_v43 = vld [vmem:[#allocation2 + $0xc0] sm:$0xfe] }
 0x183   : > { %v5068_v14 = vadd.f32 %v4866_v19, %v4516_v58  ;;  %v2047_v30 = vmul.f32 %v6348_v41, %v1969_v45  ;;  %v1699_v33 = vrot.slane %v1494_v62, 1  ;;  %v2049_v51 = vmul.f32 %v6702_v9, %v6348_v41  ;;  %v2724_v58 = vld [vmem:[#allocation2 + $0xe0] sm:$0x1]  ;;  %v3274_v19 = vld [vmem:[#allocation2 + $0xc0] sm:$0xfc] }
 0x184   : > { %v5070_v15 = vadd.f32 %v4870_v16, %v4518_v42  ;;  %v1700_v61 = vrot.slane %v1496_v25, 1  ;;  %v964_v18 = vrot.slane %v6943_v46, 7  ;;  %v1705_v10 = vrot.slane %v1498_v21, 1  ;;  %v2729_v46 = vld [vmem:[#allocation2 + $0x118] sm:$0x1] }
 0x185   : > { %v5144_v11 = vadd.f32 %v6420_v5, %v5068_v14  ;;  %v2051_v57 = vmul.f32 %v6348_v41, %v1971_v54  ;;  %v2252_v35 = vrot.slane %v2047_v30, 2  ;;  %v2253_v32 = vrot.slane %v2049_v51, 2  ;;  %v3276_v14 = vld [vmem:[#allocation2 + $0xe0] sm:$0x3] }
 0x186   : > { %v5146_v8 = vadd.f32 %v6420_v5, %v5070_v15  ;;  %v1701_v59 = vsel %vm1668_vm3, %v1699_v33, %v1700_v61  ;;  %1159 = vst.msk [vmem:[#allocation2 + $0x1e8] sm:$0xfe] %vm1103_vm5, %v964_v18  ;;  %v1706_v9 = vsel %vm1668_vm3, %v1700_v61, %v1705_v10  ;;  %v2594_v45 = vmul.f32 %v6830_v49, %v6355_v48  ;;  %v6971_v61 = vld [vmem:[#allocation2 + $0xf0] sm:$0xff]  ;;  %v6973_v51 = vld [vmem:[#allocation2 + $0x100] sm:$0xff]  ;;  %v541_v10 = vpop.f32.mrf.mxu0 }
 0x187   : > { %v5208_v37 = vmax.f32 %v5144_v11, 0.0  ;;  %v1905_v1 = vadd.f32 %v1701_v59, %v1288_v47  ;;  %v2258_v6 = vrot.slane %v2051_v57, 2  ;;  %v1907_v13 = vadd.f32 %v1706_v9, %v1290_v22  ;;  %v4027_v11 = vld [vmem:[#allocation2 + $0xf0] sm:$0xfe] }
 0x188   : > { %v5210_v7 = vmax.f32 %v5146_v8, 0.0  ;;  %v2254_v26 = vsel %vm2221_vm4, %v2252_v35, %v2253_v32  ;;  %v2596_v62 = vmul.f32 %v6834_v24, %v6355_v48  ;;  %v2800_v54 = vmul.f32 %v6397_v44, %v2722_v43 }
 0x189   : > { %v5272_v31 = vmin.f32 %v5208_v37, 6.0  ;;  %v2259_v42 = vsel %vm2221_vm4, %v2253_v32, %v2258_v6  ;;  %v2458_v16 = vadd.f32 %v2254_v26, %v1905_v1  ;;  %v2802_v22 = vmul.f32 %v6834_v24, %v6397_v44  ;;  %v4029_v6 = vld [vmem:[#allocation2 + $0x110] sm:$0x1] }
 0x18a   : > { %v5274_v25 = vmin.f32 %v5210_v7, 6.0  ;;  %v2460_v47 = vadd.f32 %v2259_v42, %v1907_v13  ;;  %v2804_v30 = vmul.f32 %v6397_v44, %v2724_v58  ;;  %v3352_v15 = vmul.f32 %v6412_v40, %v3274_v19 }
 0x18b   : > { %v2658_v21 = vadd.f32 %v2594_v45, %v2458_v16  ;;  %v3354_v33 = vmul.f32 %v6834_v24, %v6412_v40  ;;  %v3004_v59 = vrot.slane %v2800_v54, 1  ;;  %v3005_v35 = vrot.slane %v2802_v22, 1  ;;  %v4579_v45 = vld [vmem:[#allocation2 + $0xf0] sm:$0xfc]  ;;  %v4581_v16 = vld [vmem:[#allocation2 + $0x110] sm:$0x3] }
 0x18c   : > { %v5330_v57 = vpack.c.bf16 %v5274_v25, %v5272_v31  ;;  %v2660_v8 = vadd.f32 %v2596_v62, %v2460_v47  ;;  %v3010_v32 = vrot.slane %v2804_v30, 1  ;;  %v3356_v37 = vmul.f32 %v6412_v40, %v3276_v14  ;;  %v543_v62 = vpop.f32.mrf.mxu0 }
 0x18d   : > { %v3556_v9 = vrot.slane %v3352_v15, 2  ;;  %v3557_v1 = vrot.slane %v3354_v33, 2  ;;  %v3006_v43 = vsel %vm1668_vm3, %v3004_v59, %v3005_v35  ;;  %v3899_v7 = vmul.f32 %v6393_v36, %v6971_v61  ;;  %v6992_v15 = vld [vmem:[%s8679_s3 + $0x10] ss:$0 sm:$0xff] }
 0x18e   : > { %5833 = vmatprep.mubr.msk.bf16.mxu1 %vm735_vm1, %v5330_v57  ;;  %v3901_v13 = vmul.f32 %v6393_v36, %v6973_v51  ;;  %v4105_v26 = vmul.f32 %v6423_v4, %v4027_v11  ;;  %v3011_v58 = vsel %vm1668_vm3, %v3005_v35, %v3010_v32  ;;  %v3210_v19 = vadd.f32 %v3006_v43, %v2658_v21 }
 0x18f   : > { %v3558_v31 = vsel %vm2221_vm4, %v3556_v9, %v3557_v1  ;;  %v3562_v42 = vrot.slane %v3356_v37, 2  ;;  %v3212_v25 = vadd.f32 %v3011_v58, %v2660_v8  ;;  %v4107_v47 = vmul.f32 %v6423_v4, %v6973_v51 }
 0x190   : > { %v4109_v54 = vmul.f32 %v6423_v4, %v4029_v6  ;;  %v4309_v22 = vrot.slane %v4105_v26, 1  ;;  %v3762_v30 = vadd.f32 %v3558_v31, %v3210_v19  ;;  %v4657_v21 = vmul.f32 %v6992_v15, %v4579_v45 }
 0x191   : > { %v3563_v14 = vsel %vm2221_vm4, %v3557_v1, %v3562_v42  ;;  %v4659_v33 = vmul.f32 %v6992_v15, %v6973_v51  ;;  %v4310_v57 = vrot.slane %v4107_v47, 1  ;;  %v4661_v59 = vmul.f32 %v6992_v15, %v4581_v16  ;;  %v547_v1 = vpop.f32.mrf.mxu0 }
 0x192   : > { %v3764_v11 = vadd.f32 %v3563_v14, %v3212_v25  ;;  %v4315_v8 = vrot.slane %v4109_v54, 1  ;;  %v3963_v35 = vadd.f32 %v3899_v7, %v3762_v30  ;;  %v4861_v32 = vrot.slane %v4657_v21, 2  ;;  %v1421_v25 = vld [vmem:[#allocation2 + $0xc8] sm:$0xfe] }
 0x193   : > { %v4862_v37 = vrot.slane %v4659_v33, 2  ;;  %v542_v9 = vadd.f32 %v541_v10, %v6341_v38  ;;  %v4311_v43 = vsel %vm1668_vm3, %v4309_v22, %v4310_v57  ;;  %v4867_v45 = vrot.slane %v4661_v59, 2 }
 0x194   : > { %v3965_v6 = vadd.f32 %v3901_v13, %v3764_v11  ;;  %v4316_v26 = vsel %vm1668_vm3, %v4310_v57, %v4315_v8  ;;  %v4515_v58 = vadd.f32 %v4311_v43, %v3963_v35  ;;  %v544_v42 = vadd.f32 %v543_v62, %v6344_v39  ;;  %v1423_v13 = vld [vmem:[#allocation2 + $0xe8] sm:$0x1]  ;;  %v1974_v35 = vld [vmem:[#allocation2 + $0xc8] sm:$0xfc] }
 0x195   : > { %v4863_v19 = vsel %vm2221_vm4, %v4861_v32, %v4862_v37  ;;  %v644_v31 = vmax.f32 %v542_v9, 0.0  ;;  %v4868_v7 = vsel %vm2221_vm4, %v4862_v37, %v4867_v45  ;;  %v548_v47 = vadd.f32 %v547_v1, %v6341_v38 }
 0x196   : > { %v4517_v16 = vadd.f32 %v4316_v26, %v3965_v6  ;;  %v1293_v10 = vmul.f32 %v6771_v50, %v6323_v17  ;;  %v5067_v54 = vadd.f32 %v4863_v19, %v4515_v58  ;;  %v645_v14 = vmax.f32 %v544_v42, 0.0  ;;  %v1976_v58 = vld [vmem:[#allocation2 + $0xe8] sm:$0x3] }
 0x197   : > { %v708_v22 = vmin.f32 %v644_v31, 6.0  ;;  %v1295_v30 = vmul.f32 %v6776_v23, %v6323_v17  ;;  %v646_v33 = vmax.f32 %v548_v47, 0.0  ;;  %v1501_v62 = vmul.f32 %v6305_v2, %v1421_v25 }
 0x198   : > { %v5069_v21 = vadd.f32 %v4868_v7, %v4517_v16  ;;  %v1503_v11 = vmul.f32 %v6776_v23, %v6305_v2  ;;  %v5143_v57 = vadd.f32 %v6417_v63, %v5067_v54  ;;  %v709_v59 = vmin.f32 %v645_v14, 6.0  ;;  %v2727_v16 = vld [vmem:[#allocation2 + $0xf8] sm:$0xfe] }
 0x199   : > { %v965_v8 = vrot.slane %v708_v22, 7  ;;  %v1505_v50 = vmul.f32 %v6305_v2, %v1423_v13  ;;  %v7015_v37 = vmin.f32 %v646_v33, 6.0  ;;  %v1712_v9 = vrot.slane %v1501_v62, 1 }
 0x19a   : > { %v5145_v32 = vadd.f32 %v6417_v63, %v5069_v21  ;;  %v1713_v1 = vrot.slane %v1503_v11, 1  ;;  %v5207_v6 = vmax.f32 %v5143_v57, 0.0  ;;  %v967_v26 = vrot.slane %v709_v59, 7  ;;  %v3279_v21 = vld [vmem:[#allocation2 + $0xf8] sm:$0xfc] }
 0x19b   : > { %v966_v43 = vsel %vm908_vm6, %v963_v34, %v965_v8  ;;  %1162 = vst [vmem:[#allocation2 + $0x200] sm:$0x1] %v965_v8  ;;  %v1717_v45 = vrot.slane %v1505_v50, 1  ;;  %v969_v31 = vrot.slane %v7015_v37, 7  ;;  %v2054_v25 = vmul.f32 %v6311_v12, %v1974_v35  ;;  %v3281_v11 = vld [vmem:[#allocation2 + $0x118] sm:$0x3] }
 0x19c   : > { %v5209_v19 = vmax.f32 %v5145_v32, 0.0  ;;  %1160 = vst [vmem:[#allocation2 + $0x1f0] sm:$0xff] %v966_v43  ;;  %v1714_v42 = vsel %vm1668_vm3, %v1712_v9, %v1713_v1  ;;  %v5271_v7 = vmin.f32 %v5207_v6, 6.0  ;;  %v968_v28 = vsel %vm908_vm6, %v964_v18, %v967_v26  ;;  %1163 = vst.msk [vmem:[#allocation2 + $0x208] sm:$0x1] %vm1108_vm7, %v967_v26  ;;  %v7045_v9 = vld [vmem:[#allocation2 + $0x128] sm:$0xff] }
 0x19d   : > { %v1718_v34 = vsel %vm1668_vm3, %v1713_v1, %v1717_v45  ;;  %v1910_v47 = vadd.f32 %v1714_v42, %v1293_v10  ;;  %1161 = vst.msk [vmem:[#allocation2 + $0x1f8] sm:$0xff] %vm735_vm1, %v968_v28  ;;  %1164 = vst [vmem:[#allocation2 + $0x210] sm:$0xfe] %v969_v31  ;;  %v2056_v22 = vmul.f32 %v6776_v23, %v6311_v12  ;;  %v2265_v18 = vrot.slane %v2054_v25, 2  ;;  %v7050_v45 = vld [vmem:[#allocation2 + $0x138] sm:$0xff] }
 0x19e   : > { %v5273_v13 = vmin.f32 %v5209_v19, 6.0  ;;  %v1912_v54 = vadd.f32 %v1718_v34, %v1295_v30  ;;  %v2058_v14 = vmul.f32 %v6311_v12, %v1976_v58  ;;  %v2599_v33 = vmul.f32 %v6904_v29, %v6361_v55 }
 0x19f   : > { %v2601_v10 = vmul.f32 %v6907_v20, %v6361_v55  ;;  %v2807_v62 = vmul.f32 %v6371_v60, %v2727_v16  ;;  %v2266_v8 = vrot.slane %v2056_v22, 2  ;;  %v2809_v23 = vmul.f32 %v6907_v20, %v6371_v60  ;;  %v4032_v16 = vld [vmem:[#allocation2 + $0x128] sm:$0xfe]  ;;  %v4034_v22 = vld [vmem:[#allocation2 + $0x148] sm:$0x1] }
 0x1a0   : > { %v5329_v57 = vpack.c.bf16 %v5273_v13, %v5271_v7  ;;  %v2270_v30 = vrot.slane %v2058_v14, 2  ;;  %v2811_v59 = vmul.f32 %v6371_v60, %v2729_v46  ;;  %v3359_v35 = vmul.f32 %v6378_v3, %v3279_v21  ;;  %v4584_v14 = vld [vmem:[#allocation2 + $0x128] sm:$0xfc] }
 0x1a1   : > { %v3017_v50 = vrot.slane %v2807_v62, 1  ;;  %v3361_v32 = vmul.f32 %v6907_v20, %v6378_v3  ;;  %v2267_v1 = vsel %vm2221_vm4, %v2265_v18, %v2266_v8  ;;  %v3018_v43 = vrot.slane %v2809_v23, 1 }
 0x1a2   : > { %5563 = vmatmul.mubr.bf16.gmra.mxu1 %v5329_v57  ;;  %v2271_v6 = vsel %vm2221_vm4, %v2266_v8, %v2270_v30  ;;  %v3363_v26 = vmul.f32 %v6378_v3, %v3281_v11  ;;  %v2463_v58 = vadd.f32 %v2267_v1, %v1910_v47  ;;  %v3022_v42 = vrot.slane %v2811_v59, 1  ;;  %v549_v59 = vpop.f32.mrf.mxu0 }
 0x1a3   : > { %v2465_v19 = vadd.f32 %v2271_v6, %v1912_v54  ;;  %v3569_v25 = vrot.slane %v3359_v35, 2  ;;  %v3019_v7 = vsel %vm1668_vm3, %v3017_v50, %v3018_v43  ;;  %v3570_v28 = vrot.slane %v3361_v32, 2  ;;  %v4586_v54 = vld [vmem:[#allocation2 + $0x148] sm:$0x3] }
 0x1a4   : > { %v3574_v34 = vrot.slane %v3363_v26, 2  ;;  %v3904_v13 = vmul.f32 %v6404_v52, %v7045_v9  ;;  %v2663_v46 = vadd.f32 %v2599_v33, %v2463_v58  ;;  %v3023_v18 = vsel %vm1668_vm3, %v3018_v43, %v3022_v42 }
 0x1a5   : > { %v2665_v21 = vadd.f32 %v2601_v10, %v2465_v19  ;;  %v3906_v47 = vmul.f32 %v6404_v52, %v7050_v45  ;;  %v3571_v62 = vsel %vm2221_vm4, %v3569_v25, %v3570_v28  ;;  %v4112_v57 = vmul.f32 %v6407_v53, %v4032_v16 }
 0x1a6   : > { %v3575_v11 = vsel %vm2221_vm4, %v3570_v28, %v3574_v34  ;;  %v4114_v8 = vmul.f32 %v6407_v53, %v7050_v45  ;;  %v3215_v30 = vadd.f32 %v3019_v7, %v2663_v46  ;;  %v4116_v33 = vmul.f32 %v6407_v53, %v4034_v22  ;;  %v1420_v7 = vld [vmem:[#allocation2 + $0xc0] sm:$0xfe]  ;;  %v1422_v46 = vld [vmem:[#allocation2 + $0xe0] sm:$0x1] }
 0x1a7   : > { %v3217_v23 = vadd.f32 %v3023_v18, %v2665_v21  ;;  %v4664_v10 = vmul.f32 %v6925_v0, %v4584_v14  ;;  %v4322_v50 = vrot.slane %v4112_v57, 1  ;;  %v4666_v32 = vmul.f32 %v6925_v0, %v7050_v45  ;;  %v1973_v21 = vld [vmem:[#allocation2 + $0xc0] sm:$0xfc] }
 0x1a8   : > { %v4323_v35 = vrot.slane %v4114_v8, 1  ;;  %v4668_v1 = vmul.f32 %v6925_v0, %v4586_v54  ;;  %v3767_v6 = vadd.f32 %v3571_v62, %v3215_v30  ;;  %v4327_v26 = vrot.slane %v4116_v33, 1  ;;  %v1975_v30 = vld [vmem:[#allocation2 + $0xe0] sm:$0x3] }
 0x1a9   : > { %v3769_v43 = vadd.f32 %v3575_v11, %v3217_v23  ;;  %v4874_v58 = vrot.slane %v4664_v10, 2  ;;  %v4875_v42 = vrot.slane %v4666_v32, 2  ;;  %v550_v16 = vadd.f32 %v549_v59, %v6344_v39 }
 0x1aa   : > { %v4324_v19 = vsel %vm1668_vm3, %v4322_v50, %v4323_v35  ;;  %v4879_v25 = vrot.slane %v4668_v1, 2  ;;  %v3968_v28 = vadd.f32 %v3904_v13, %v3767_v6  ;;  %v4328_v22 = vsel %vm1668_vm3, %v4323_v35, %v4327_v26 }
 0x1ab   : > { %v3970_v34 = vadd.f32 %v3906_v47, %v3769_v43  ;;  %v1292_v14 = vmul.f32 %v6830_v49, %v6365_v56  ;;  %v4876_v18 = vsel %vm2221_vm4, %v4874_v58, %v4875_v42  ;;  %v647_v62 = vmax.f32 %v550_v16, 0.0  ;;  %v2726_v16 = vld [vmem:[#allocation2 + $0xf0] sm:$0xfe] }
 0x1ac   : > { %v4880_v54 = vsel %vm2221_vm4, %v4875_v42, %v4879_v25  ;;  %v1294_v11 = vmul.f32 %v6834_v24, %v6365_v56  ;;  %v4520_v57 = vadd.f32 %v4324_v19, %v3968_v28  ;;  %v1500_v13 = vmul.f32 %v6333_v27, %v1420_v7 }
 0x1ad   : > { %v4522_v8 = vadd.f32 %v4328_v22, %v3970_v34  ;;  %v1502_v47 = vmul.f32 %v6834_v24, %v6333_v27  ;;  %v7080_v23 = vmin.f32 %v647_v62, 6.0  ;;  %v1504_v49 = vmul.f32 %v6333_v27, %v1422_v46  ;;  %v3278_v62 = vld [vmem:[#allocation2 + $0xf0] sm:$0xfc] }
 0x1ae   : > { %v2053_v33 = vmul.f32 %v6348_v41, %v1973_v21  ;;  %v2055_v10 = vmul.f32 %v6834_v24, %v6348_v41  ;;  %v5072_v59 = vadd.f32 %v4876_v18, %v4520_v57  ;;  %v1709_v35 = vrot.slane %v1500_v13, 1 }
 0x1af   : > { %v5074_v50 = vadd.f32 %v4880_v54, %v4522_v8  ;;  %v1710_v32 = vrot.slane %v1502_v47, 1  ;;  %v970_v1 = vrot.slane %v7080_v23, 7  ;;  %v1715_v6 = vrot.slane %v1504_v49, 1  ;;  %v2728_v54 = vld [vmem:[#allocation2 + $0x110] sm:$0x1] }
 0x1b0   : > { %v2057_v43 = vmul.f32 %v6348_v41, %v1975_v30  ;;  %v2262_v26 = vrot.slane %v2053_v33, 2  ;;  %v5148_v58 = vadd.f32 %v6420_v5, %v5072_v59  ;;  %v2263_v25 = vrot.slane %v2055_v10, 2  ;;  %v3280_v10 = vld [vmem:[#allocation2 + $0x110] sm:$0x3]  ;;  %v551_v59 = vpop.f32.mrf.mxu0 }
 0x1b1   : > { %v5150_v19 = vadd.f32 %v6420_v5, %v5074_v50  ;;  %v1711_v42 = vsel %vm1668_vm3, %v1709_v35, %v1710_v32  ;;  %1165 = vst.msk [vmem:[#allocation2 + $0x218] sm:$0xfe] %vm1103_vm5, %v970_v1  ;;  %v1716_v24 = vsel %vm1668_vm3, %v1710_v32, %v1715_v6  ;;  %v2598_v34 = vmul.f32 %v6971_v61, %v6355_v48 }
 0x1b2   : > { %v1909_v7 = vadd.f32 %v1711_v42, %v1292_v14  ;;  %v2268_v28 = vrot.slane %v2057_v43, 2  ;;  %v5212_v22 = vmax.f32 %v5148_v58, 0.0  ;;  %v1911_v21 = vadd.f32 %v1716_v24, %v1294_v11  ;;  %v7104_v11 = vld [vmem:[#allocation2 + $0x120] sm:$0xff]  ;;  %v7108_v43 = vld [vmem:[#allocation2 + $0x130] sm:$0xff] }
 0x1b3   : > { %v5214_v46 = vmax.f32 %v5150_v19, 0.0  ;;  %v2264_v18 = vsel %vm2221_vm4, %v2262_v26, %v2263_v25  ;;  %v2600_v13 = vmul.f32 %v6973_v51, %v6355_v48  ;;  %v2806_v47 = vmul.f32 %v6397_v44, %v2726_v16  ;;  %v4031_v26 = vld [vmem:[#allocation2 + $0x120] sm:$0xfe] }
 0x1b4   : > { %v2269_v57 = vsel %vm2221_vm4, %v2263_v25, %v2268_v28  ;;  %v2462_v8 = vadd.f32 %v2264_v18, %v1909_v7  ;;  %v5276_v14 = vmin.f32 %v5212_v22, 6.0  ;;  %v2808_v33 = vmul.f32 %v6973_v51, %v6397_v44 }
 0x1b5   : > { %v5278_v30 = vmin.f32 %v5214_v46, 6.0  ;;  %v2464_v49 = vadd.f32 %v2269_v57, %v1911_v21  ;;  %v2810_v35 = vmul.f32 %v6397_v44, %v2728_v54  ;;  %v3014_v32 = vrot.slane %v2806_v47, 1  ;;  %v4583_v54 = vld [vmem:[#allocation2 + $0x120] sm:$0xfc] }
 0x1b6   : > { %v2662_v50 = vadd.f32 %v2598_v34, %v2462_v8  ;;  %v3358_v6 = vmul.f32 %v6412_v40, %v3278_v62  ;;  %v3015_v42 = vrot.slane %v2808_v33, 1  ;;  %v3360_v25 = vmul.f32 %v6973_v51, %v6412_v40  ;;  %v4033_v34 = vld [vmem:[#allocation2 + $0x140] sm:$0x1]  ;;  %v553_v62 = vpop.f32.mrf.mxu0 }
 0x1b7   : > { %v5332_v58 = vpack.c.bf16 %v5278_v30, %v5276_v14  ;;  %v2664_v19 = vadd.f32 %v2600_v13, %v2464_v49  ;;  %v3020_v16 = vrot.slane %v2810_v35, 1  ;;  %v3362_v24 = vmul.f32 %v6412_v40, %v3280_v10  ;;  %v4585_v14 = vld [vmem:[#allocation2 + $0x140] sm:$0x3] }
 0x1b8   : > { %v3566_v7 = vrot.slane %v3358_v6, 2  ;;  %v3903_v28 = vmul.f32 %v6393_v36, %v7104_v11  ;;  %v3016_v22 = vsel %vm1668_vm3, %v3014_v32, %v3015_v42  ;;  %v3567_v46 = vrot.slane %v3360_v25, 2 }
 0x1b9   : > { %5834 = vmatprep.mubr.msk.bf16.mxu1 %vm735_vm1, %v5332_v58  ;;  %v3905_v21 = vmul.f32 %v6393_v36, %v7108_v43  ;;  %v4111_v18 = vmul.f32 %v6423_v4, %v4031_v26  ;;  %v3021_v57 = vsel %vm1668_vm3, %v3015_v42, %v3020_v16  ;;  %v3214_v8 = vadd.f32 %v3016_v22, %v2662_v50  ;;  %v557_v16 = vpop.f32.mrf.mxu0 }
 0x1ba   : > { %v3572_v13 = vrot.slane %v3362_v24, 2  ;;  %v4113_v47 = vmul.f32 %v6423_v4, %v7108_v43  ;;  %v3216_v30 = vadd.f32 %v3021_v57, %v2664_v19  ;;  %v3568_v49 = vsel %vm2221_vm4, %v3566_v7, %v3567_v46 }
 0x1bb   : > { %v4115_v33 = vmul.f32 %v6423_v4, %v4033_v34  ;;  %v4319_v10 = vrot.slane %v4111_v18, 1  ;;  %v3766_v32 = vadd.f32 %v3568_v49, %v3214_v8  ;;  %v4663_v26 = vmul.f32 %v6992_v15, %v4583_v54 }
 0x1bc   : > { %v3573_v35 = vsel %vm2221_vm4, %v3567_v46, %v3572_v13  ;;  %v4320_v6 = vrot.slane %v4113_v47, 1  ;;  %v4665_v50 = vmul.f32 %v6992_v15, %v7108_v43  ;;  %v4667_v25 = vmul.f32 %v6992_v15, %v4585_v14 }
 0x1bd   : > { %v3768_v58 = vadd.f32 %v3573_v35, %v3216_v30  ;;  %v4325_v42 = vrot.slane %v4115_v33, 1  ;;  %v3967_v19 = vadd.f32 %v3903_v28, %v3766_v32  ;;  %v4871_v7 = vrot.slane %v4663_v26, 2  ;;  %v1425_v30 = vld [vmem:[#allocation2 + $0xf8] sm:$0xfe]  ;;  %v1427_v32 = vld [vmem:[#allocation2 + $0x118] sm:$0x1] }
 0x1be   : > { %v4321_v24 = vsel %vm1668_vm3, %v4319_v10, %v4320_v6  ;;  %v552_v34 = vadd.f32 %v551_v59, %v6341_v38  ;;  %v4872_v18 = vrot.slane %v4665_v50, 2  ;;  %v4877_v57 = vrot.slane %v4667_v25, 2 }
 0x1bf   : > { %v3969_v22 = vadd.f32 %v3905_v21, %v3768_v58  ;;  %v4326_v46 = vsel %vm1668_vm3, %v4320_v6, %v4325_v42  ;;  %v4519_v54 = vadd.f32 %v4321_v24, %v3967_v19  ;;  %v554_v13 = vadd.f32 %v553_v62, %v6344_v39 }
 0x1c0   : > { %v648_v8 = vmax.f32 %v552_v34, 0.0  ;;  %v558_v47 = vadd.f32 %v557_v16, %v6341_v38  ;;  %v4873_v28 = vsel %vm2221_vm4, %v4871_v7, %v4872_v18  ;;  %v4878_v49 = vsel %vm2221_vm4, %v4872_v18, %v4877_v57 }
 0x1c1   : > { %v4521_v14 = vadd.f32 %v4326_v46, %v3969_v22  ;;  %v1297_v59 = vmul.f32 %v6904_v29, %v6323_v17  ;;  %v5071_v21 = vadd.f32 %v4873_v28, %v4519_v54  ;;  %v649_v10 = vmax.f32 %v554_v13, 0.0  ;;  %v1978_v29 = vld [vmem:[#allocation2 + $0xf8] sm:$0xfc]  ;;  %v1980_v54 = vld [vmem:[#allocation2 + $0x118] sm:$0x3] }
 0x1c2   : > { %v712_v33 = vmin.f32 %v648_v8, 6.0  ;;  %v650_v35 = vmax.f32 %v558_v47, 0.0  ;;  %v1299_v62 = vmul.f32 %v6907_v20, %v6323_v17  ;;  %v1507_v26 = vmul.f32 %v6305_v2, %v1425_v30 }
 0x1c3   : > { %v5073_v6 = vadd.f32 %v4878_v49, %v4521_v14  ;;  %v1509_v58 = vmul.f32 %v6907_v20, %v6305_v2  ;;  %v5147_v42 = vadd.f32 %v6417_v63, %v5071_v21  ;;  %v713_v25 = vmin.f32 %v649_v10, 6.0  ;;  %v2731_v49 = vld [vmem:[#allocation2 + $0x128] sm:$0xfe] }
 0x1c4   : > { %v971_v50 = vrot.slane %v712_v33, 7  ;;  %v7145_v16 = vmin.f32 %v650_v35, 6.0  ;;  %v1511_v24 = vmul.f32 %v6305_v2, %v1427_v32  ;;  %v1722_v7 = vrot.slane %v1507_v26, 1  ;;  %v2733_v35 = vld [vmem:[#allocation2 + $0x148] sm:$0x1] }
 0x1c5   : > { %v5149_v19 = vadd.f32 %v6417_v63, %v5073_v6  ;;  %v1723_v34 = vrot.slane %v1509_v58, 1  ;;  %v5211_v22 = vmax.f32 %v5147_v42, 0.0  ;;  %v973_v18 = vrot.slane %v713_v25, 7  ;;  %v3285_v25 = vld [vmem:[#allocation2 + $0x148] sm:$0x3] }
 0x1c6   : > { %v972_v46 = vsel %vm908_vm6, %v969_v31, %v971_v50  ;;  %1168 = vst [vmem:[#allocation2 + $0x230] sm:$0x1] %v971_v50  ;;  %v975_v57 = vrot.slane %v7145_v16, 7  ;;  %v1727_v47 = vrot.slane %v1511_v24, 1  ;;  %v2060_v30 = vmul.f32 %v6311_v12, %v1978_v29 }
 0x1c7   : > { %v5213_v8 = vmax.f32 %v5149_v19, 0.0  ;;  %1166 = vst [vmem:[#allocation2 + $0x220] sm:$0xff] %v972_v46  ;;  %v1724_v13 = vsel %vm1668_vm3, %v1722_v7, %v1723_v34  ;;  %v5275_v14 = vmin.f32 %v5211_v22, 6.0  ;;  %v974_v28 = vsel %vm908_vm6, %v970_v1, %v973_v18  ;;  %1169 = vst.msk [vmem:[#allocation2 + $0x238] sm:$0x1] %vm1108_vm7, %v973_v18  ;;  %v7178_v7 = vld [vmem:[#allocation2 + $0x158] sm:$0xff] }
 0x1c8   : > { %1170 = vst [vmem:[#allocation2 + $0x240] sm:$0xfe] %v975_v57  ;;  %v1914_v37 = vadd.f32 %v1724_v13, %v1297_v59  ;;  %v2062_v31 = vmul.f32 %v6907_v20, %v6311_v12  ;;  %1167 = vst.msk [vmem:[#allocation2 + $0x228] sm:$0xff] %vm735_vm1, %v974_v28  ;;  %v1728_v33 = vsel %vm1668_vm3, %v1723_v34, %v1727_v47  ;;  %v2275_v23 = vrot.slane %v2060_v30, 2  ;;  %v3283_v1 = vld [vmem:[#allocation2 + $0x128] sm:$0xfc] }
 0x1c9   : > { %v5277_v21 = vmin.f32 %v5213_v8, 6.0  ;;  %v2064_v10 = vmul.f32 %v6311_v12, %v1980_v54  ;;  %v1916_v32 = vadd.f32 %v1728_v33, %v1299_v62  ;;  %v2603_v26 = vmul.f32 %v7045_v9, %v6361_v55  ;;  %v7181_v54 = vld [vmem:[#allocation2 + $0x168] sm:$0xff]  ;;  %v4038_v33 = vld [vmem:[#allocation2 + $0x178] sm:$0x1] }
 0x1ca   : > { %v2276_v6 = vrot.slane %v2062_v31, 2  ;;  %v2605_v59 = vmul.f32 %v7050_v45, %v6361_v55  ;;  %v2813_v42 = vmul.f32 %v6371_v60, %v2731_v49  ;;  %v2815_v50 = vmul.f32 %v7050_v45, %v6371_v60 }
 0x1cb   : > { %v5331_v20 = vpack.c.bf16 %v5277_v21, %v5275_v14  ;;  %v2280_v58 = vrot.slane %v2064_v10, 2  ;;  %v2817_v19 = vmul.f32 %v6371_v60, %v2733_v35  ;;  %v3365_v62 = vmul.f32 %v6378_v3, %v3283_v1  ;;  %v4036_v14 = vld [vmem:[#allocation2 + $0x158] sm:$0xfe] }
 0x1cc   : > { %v2277_v29 = vsel %vm2221_vm4, %v2275_v23, %v2276_v6  ;;  %v3367_v24 = vmul.f32 %v7050_v45, %v6378_v3  ;;  %v3027_v46 = vrot.slane %v2813_v42, 1  ;;  %v3028_v18 = vrot.slane %v2815_v50, 1  ;;  %v4588_v10 = vld [vmem:[#allocation2 + $0x158] sm:$0xfc] }
 0x1cd   : > { %5571 = vmatmul.mubr.bf16.gmra.mxu1 %v5331_v20  ;;  %v2281_v34 = vsel %vm2221_vm4, %v2276_v6, %v2280_v58  ;;  %v2467_v22 = vadd.f32 %v2277_v29, %v1914_v37  ;;  %v3032_v13 = vrot.slane %v2817_v19, 1  ;;  %v3369_v47 = vmul.f32 %v6378_v3, %v3285_v25  ;;  %v4590_v58 = vld [vmem:[#allocation2 + $0x178] sm:$0x3]  ;;  %v559_v29 = vpop.f32.mrf.mxu0 }
 0x1ce   : > { %v2469_v8 = vadd.f32 %v2281_v34, %v1916_v32  ;;  %v3579_v30 = vrot.slane %v3365_v62, 2  ;;  %v3029_v31 = vsel %vm1668_vm3, %v3027_v46, %v3028_v18  ;;  %v3580_v49 = vrot.slane %v3367_v24, 2 }
 0x1cf   : > { %v2667_v28 = vadd.f32 %v2603_v26, %v2467_v22  ;;  %v3908_v21 = vmul.f32 %v6404_v52, %v7178_v7  ;;  %v3033_v23 = vsel %vm1668_vm3, %v3028_v18, %v3032_v13  ;;  %v3584_v35 = vrot.slane %v3369_v47, 2 }
 0x1d0   : > { %v2669_v37 = vadd.f32 %v2605_v59, %v2469_v8  ;;  %v3910_v1 = vmul.f32 %v6404_v52, %v7181_v54  ;;  %v3581_v6 = vsel %vm2221_vm4, %v3579_v30, %v3580_v49  ;;  %v4118_v26 = vmul.f32 %v6407_v53, %v4036_v14 }
 0x1d1   : > { %v3219_v32 = vadd.f32 %v3029_v31, %v2667_v28  ;;  %v4120_v20 = vmul.f32 %v6407_v53, %v7181_v54  ;;  %v3585_v50 = vsel %vm2221_vm4, %v3580_v49, %v3584_v35  ;;  %v4122_v59 = vmul.f32 %v6407_v53, %v4038_v33  ;;  %v1424_v28 = vld [vmem:[#allocation2 + $0xf0] sm:$0xfe] }
 0x1d2   : > { %v3221_v42 = vadd.f32 %v3033_v23, %v2669_v37  ;;  %v4670_v25 = vmul.f32 %v6925_v0, %v4588_v10  ;;  %v4332_v62 = vrot.slane %v4118_v26, 1  ;;  %v4672_v34 = vmul.f32 %v6925_v0, %v7181_v54  ;;  %v1426_v37 = vld [vmem:[#allocation2 + $0x110] sm:$0x1]  ;;  %v1977_v23 = vld [vmem:[#allocation2 + $0xf0] sm:$0xfc] }
 0x1d3   : > { %v3771_v19 = vadd.f32 %v3581_v6, %v3219_v32  ;;  %v4333_v24 = vrot.slane %v4120_v20, 1  ;;  %v4337_v46 = vrot.slane %v4122_v59, 1  ;;  %v4674_v18 = vmul.f32 %v6925_v0, %v4590_v58  ;;  %v1979_v58 = vld [vmem:[#allocation2 + $0x110] sm:$0x3] }
 0x1d4   : > { %v3773_v22 = vadd.f32 %v3585_v50, %v3221_v42  ;;  %v4884_v8 = vrot.slane %v4670_v25, 2  ;;  %v4885_v30 = vrot.slane %v4672_v34, 2  ;;  %v560_v14 = vadd.f32 %v559_v29, %v6344_v39 }
 0x1d5   : > { %v3972_v13 = vadd.f32 %v3908_v21, %v3771_v19  ;;  %v4334_v47 = vsel %vm1668_vm3, %v4332_v62, %v4333_v24  ;;  %v4338_v49 = vsel %vm1668_vm3, %v4333_v24, %v4337_v46  ;;  %v4889_v33 = vrot.slane %v4674_v18, 2 }
 0x1d6   : > { %v3974_v31 = vadd.f32 %v3910_v1, %v3773_v22  ;;  %v1296_v10 = vmul.f32 %v6971_v61, %v6365_v56  ;;  %v4886_v0 = vsel %vm2221_vm4, %v4884_v8, %v4885_v30  ;;  %v651_v32 = vmax.f32 %v560_v14, 0.0 }
 0x1d7   : > { %v4524_v35 = vadd.f32 %v4334_v47, %v3972_v13  ;;  %v1298_v21 = vmul.f32 %v6973_v51, %v6365_v56  ;;  %v4890_v26 = vsel %vm2221_vm4, %v4885_v30, %v4889_v33  ;;  %v1506_v1 = vmul.f32 %v6333_v27, %v1424_v28 }
 0x1d8   : > { %v4526_v6 = vadd.f32 %v4338_v49, %v3974_v31  ;;  %v1508_v20 = vmul.f32 %v6973_v51, %v6333_v27  ;;  %v7212_v61 = vmin.f32 %v651_v32, 6.0  ;;  %v1510_v50 = vmul.f32 %v6333_v27, %v1426_v37  ;;  %v2730_v31 = vld [vmem:[#allocation2 + $0x120] sm:$0xfe] }
 0x1d9   : > { %v5076_v42 = vadd.f32 %v4886_v0, %v4524_v35  ;;  %v2059_v59 = vmul.f32 %v6348_v41, %v1977_v23  ;;  %v1719_v29 = vrot.slane %v1506_v1, 1  ;;  %v2061_v62 = vmul.f32 %v6973_v51, %v6348_v41  ;;  %v2732_v35 = vld [vmem:[#allocation2 + $0x140] sm:$0x1]  ;;  %v3282_v0 = vld [vmem:[#allocation2 + $0x120] sm:$0xfc] }
 0x1da   : > { %v5078_v25 = vadd.f32 %v4890_v26, %v4526_v6  ;;  %v1720_v19 = vrot.slane %v1508_v20, 1  ;;  %v976_v34 = vrot.slane %v7212_v61, 7  ;;  %v1725_v22 = vrot.slane %v1510_v50, 1  ;;  %v2737_v61 = vld [vmem:[#allocation2 + $0x178] sm:$0x1] }
 0x1db   : > { %v5152_v24 = vadd.f32 %v6420_v5, %v5076_v42  ;;  %v2063_v46 = vmul.f32 %v6348_v41, %v1979_v58  ;;  %v2272_v13 = vrot.slane %v2059_v59, 2  ;;  %v2273_v47 = vrot.slane %v2061_v62, 2  ;;  %v3284_v42 = vld [vmem:[#allocation2 + $0x140] sm:$0x3] }
 0x1dc   : > { %v5154_v18 = vadd.f32 %v6420_v5, %v5078_v25  ;;  %v1721_v8 = vsel %vm1668_vm3, %v1719_v29, %v1720_v19  ;;  %1171 = vst.msk [vmem:[#allocation2 + $0x248] sm:$0xfe] %vm1103_vm5, %v976_v34  ;;  %v1726_v51 = vsel %vm1668_vm3, %v1720_v19, %v1725_v22  ;;  %v2602_v23 = vmul.f32 %v7104_v11, %v6355_v48  ;;  %v7240_v19 = vld [vmem:[#allocation2 + $0x150] sm:$0xff]  ;;  %v7242_v62 = vld [vmem:[#allocation2 + $0x160] sm:$0xff]  ;;  %v561_v22 = vpop.f32.mrf.mxu0 }
 0x1dd   : > { %v5216_v30 = vmax.f32 %v5152_v24, 0.0  ;;  %v1913_v14 = vadd.f32 %v1721_v8, %v1296_v10  ;;  %v2278_v28 = vrot.slane %v2063_v46, 2  ;;  %v1915_v33 = vadd.f32 %v1726_v51, %v1298_v21  ;;  %v4035_v24 = vld [vmem:[#allocation2 + $0x150] sm:$0xfe] }
 0x1de   : > { %v5218_v49 = vmax.f32 %v5154_v18, 0.0  ;;  %v2274_v37 = vsel %vm2221_vm4, %v2272_v13, %v2273_v47  ;;  %v2604_v1 = vmul.f32 %v7108_v43, %v6355_v48  ;;  %v2812_v58 = vmul.f32 %v6397_v44, %v2730_v31 }
 0x1df   : > { %v5280_v32 = vmin.f32 %v5216_v30, 6.0  ;;  %v2279_v6 = vsel %vm2221_vm4, %v2273_v47, %v2278_v28  ;;  %v2466_v26 = vadd.f32 %v2274_v37, %v1913_v14  ;;  %v2814_v21 = vmul.f32 %v7108_v43, %v6397_v44  ;;  %v4037_v28 = vld [vmem:[#allocation2 + $0x170] sm:$0x1] }
 0x1e0   : > { %v5282_v20 = vmin.f32 %v5218_v49, 6.0  ;;  %v2468_v10 = vadd.f32 %v2279_v6, %v1915_v33  ;;  %v2816_v59 = vmul.f32 %v6397_v44, %v2732_v35  ;;  %v3364_v25 = vmul.f32 %v6412_v40, %v3282_v0 }
 0x1e1   : > { %v2666_v50 = vadd.f32 %v2602_v23, %v2466_v26  ;;  %v3366_v29 = vmul.f32 %v7108_v43, %v6412_v40  ;;  %v3024_v8 = vrot.slane %v2812_v58, 1  ;;  %v3025_v13 = vrot.slane %v2814_v21, 1  ;;  %v4587_v23 = vld [vmem:[#allocation2 + $0x150] sm:$0xfc]  ;;  %v4589_v26 = vld [vmem:[#allocation2 + $0x170] sm:$0x3] }
 0x1e2   : > { %v5334_v46 = vpack.c.bf16 %v5282_v20, %v5280_v32  ;;  %v2668_v18 = vadd.f32 %v2604_v1, %v2468_v10  ;;  %v3030_v47 = vrot.slane %v2816_v59, 1  ;;  %v3368_v30 = vmul.f32 %v6412_v40, %v3284_v42  ;;  %v563_v1 = vpop.f32.mrf.mxu0 }
 0x1e3   : > { %v3576_v51 = vrot.slane %v3364_v25, 2  ;;  %v3577_v14 = vrot.slane %v3366_v29, 2  ;;  %v3026_v31 = vsel %vm1668_vm3, %v3024_v8, %v3025_v13  ;;  %v3907_v49 = vmul.f32 %v6393_v36, %v7240_v19 }
 0x1e4   : > { %5835 = vmatprep.mubr.msk.bf16.mxu1 %vm735_vm1, %v5334_v46  ;;  %v3909_v33 = vmul.f32 %v6393_v36, %v7242_v62  ;;  %v4117_v37 = vmul.f32 %v6423_v4, %v4035_v24  ;;  %v3031_v35 = vsel %vm1668_vm3, %v3025_v13, %v3030_v47  ;;  %v3218_v0 = vadd.f32 %v3026_v31, %v2666_v50 }
 0x1e5   : > { %v3578_v32 = vsel %vm2221_vm4, %v3576_v51, %v3577_v14  ;;  %v3582_v6 = vrot.slane %v3368_v30, 2  ;;  %v3220_v20 = vadd.f32 %v3031_v35, %v2668_v18  ;;  %v4119_v10 = vmul.f32 %v6423_v4, %v7242_v62  ;;  %v567_v51 = vpop.f32.mrf.mxu0 }
 0x1e6   : > { %v4121_v58 = vmul.f32 %v6423_v4, %v4037_v28  ;;  %v4329_v21 = vrot.slane %v4117_v37, 1  ;;  %v3770_v59 = vadd.f32 %v3578_v32, %v3218_v0  ;;  %v4669_v25 = vmul.f32 %v6992_v15, %v4587_v23 }
 0x1e7   : > { %v3583_v42 = vsel %vm2221_vm4, %v3577_v14, %v3582_v6  ;;  %v4671_v50 = vmul.f32 %v6992_v15, %v7242_v62  ;;  %v4330_v24 = vrot.slane %v4119_v10, 1  ;;  %v4673_v8 = vmul.f32 %v6992_v15, %v4589_v26  ;;  %v1429_v6 = vld [vmem:[#allocation2 + $0x128] sm:$0xfe] }
 0x1e8   : > { %v3772_v29 = vadd.f32 %v3583_v42, %v3220_v20  ;;  %v4335_v46 = vrot.slane %v4121_v58, 1  ;;  %v3971_v18 = vadd.f32 %v3907_v49, %v3770_v59  ;;  %v4881_v13 = vrot.slane %v4669_v25, 2 }
 0x1e9   : > { %v4882_v47 = vrot.slane %v4671_v50, 2  ;;  %v562_v30 = vadd.f32 %v561_v22, %v6341_v38  ;;  %v4331_v14 = vsel %vm1668_vm3, %v4329_v21, %v4330_v24  ;;  %v4887_v37 = vrot.slane %v4673_v8, 2 }
 0x1ea   : > { %v3973_v28 = vadd.f32 %v3909_v33, %v3772_v29  ;;  %v4336_v31 = vsel %vm1668_vm3, %v4330_v24, %v4335_v46  ;;  %v4523_v23 = vadd.f32 %v4331_v14, %v3971_v18  ;;  %v564_v32 = vadd.f32 %v563_v1, %v6344_v39  ;;  %v1431_v33 = vld [vmem:[#allocation2 + $0x148] sm:$0x1]  ;;  %v1982_v46 = vld [vmem:[#allocation2 + $0x128] sm:$0xfc] }
 0x1eb   : > { %v4883_v35 = vsel %vm2221_vm4, %v4881_v13, %v4882_v47  ;;  %v652_v0 = vmax.f32 %v562_v30, 0.0  ;;  %v4888_v49 = vsel %vm2221_vm4, %v4882_v47, %v4887_v37  ;;  %v568_v26 = vadd.f32 %v567_v51, %v6341_v38 }
 0x1ec   : > { %v4525_v15 = vadd.f32 %v4336_v31, %v3973_v28  ;;  %v1301_v22 = vmul.f32 %v7045_v9, %v6323_v17  ;;  %v5075_v20 = vadd.f32 %v4883_v35, %v4523_v23  ;;  %v653_v58 = vmax.f32 %v564_v32, 0.0  ;;  %v1984_v31 = vld [vmem:[#allocation2 + $0x148] sm:$0x3]  ;;  %v2735_v32 = vld [vmem:[#allocation2 + $0x158] sm:$0xfe] }
 0x1ed   : > { %v716_v10 = vmin.f32 %v652_v0, 6.0  ;;  %v1303_v21 = vmul.f32 %v7050_v45, %v6323_v17  ;;  %v654_v59 = vmax.f32 %v568_v26, 0.0  ;;  %v1513_v1 = vmul.f32 %v6305_v2, %v1429_v6 }
 0x1ee   : > { %v5077_v42 = vadd.f32 %v4888_v49, %v4525_v15  ;;  %v1515_v25 = vmul.f32 %v7050_v45, %v6305_v2  ;;  %v5151_v50 = vadd.f32 %v6417_v63, %v5075_v20  ;;  %v717_v24 = vmin.f32 %v653_v58, 6.0 }
 0x1ef   : > { %v977_v29 = vrot.slane %v716_v10, 7  ;;  %v1517_v9 = vmul.f32 %v6305_v2, %v1431_v33  ;;  %v7279_v18 = vmin.f32 %v654_v59, 6.0  ;;  %v1732_v13 = vrot.slane %v1513_v1, 1  ;;  %v3287_v10 = vld [vmem:[#allocation2 + $0x158] sm:$0xfc] }
 0x1f0   : > { %v5153_v8 = vadd.f32 %v6417_v63, %v5077_v42  ;;  %v1733_v47 = vrot.slane %v1515_v25, 1  ;;  %v5215_v30 = vmax.f32 %v5151_v50, 0.0  ;;  %v979_v28 = vrot.slane %v717_v24, 7  ;;  %v3289_v59 = vld [vmem:[#allocation2 + $0x178] sm:$0x3] }
 0x1f1   : > { %v978_v51 = vsel %vm908_vm6, %v975_v57, %v977_v29  ;;  %1174 = vst [vmem:[#allocation2 + $0x260] sm:$0x1] %v977_v29  ;;  %v1737_v14 = vrot.slane %v1517_v9, 1  ;;  %v981_v23 = vrot.slane %v7279_v18, 7  ;;  %v2066_v0 = vmul.f32 %v6311_v12, %v1982_v46  ;;  %v7309_v46 = vld [vmem:[#allocation2 + $0x188] sm:$0xff] }
 0x1f2   : > { %v5217_v37 = vmax.f32 %v5153_v8, 0.0  ;;  %1172 = vst [vmem:[#allocation2 + $0x250] sm:$0xff] %v978_v51  ;;  %v1734_v35 = vsel %vm1668_vm3, %v1732_v13, %v1733_v47  ;;  %v5279_v6 = vmin.f32 %v5215_v30, 6.0  ;;  %v980_v16 = vsel %vm908_vm6, %v976_v34, %v979_v28  ;;  %1175 = vst.msk [vmem:[#allocation2 + $0x268] sm:$0x1] %vm1108_vm7, %v979_v28  ;;  %v7314_v51 = vld [vmem:[#allocation2 + $0x198] sm:$0xff] }
 0x1f3   : > { %v1738_v57 = vsel %vm1668_vm3, %v1733_v47, %v1737_v14  ;;  %v1918_v15 = vadd.f32 %v1734_v35, %v1301_v22  ;;  %1173 = vst.msk [vmem:[#allocation2 + $0x258] sm:$0xff] %vm735_vm1, %v980_v16  ;;  %1176 = vst [vmem:[#allocation2 + $0x270] sm:$0xfe] %v981_v23  ;;  %v2068_v33 = vmul.f32 %v7050_v45, %v6311_v12  ;;  %v2285_v34 = vrot.slane %v2066_v0, 2  ;;  %v4040_v35 = vld [vmem:[#allocation2 + $0x188] sm:$0xfe] }
 0x1f4   : > { %v5281_v49 = vmin.f32 %v5217_v37, 6.0  ;;  %v1920_v26 = vadd.f32 %v1738_v57, %v1303_v21  ;;  %v2070_v20 = vmul.f32 %v6311_v12, %v1984_v31  ;;  %v2607_v58 = vmul.f32 %v7178_v7, %v6361_v55  ;;  %v4042_v57 = vld [vmem:[#allocation2 + $0x1a8] sm:$0x1] }
 0x1f5   : > { %v2609_v22 = vmul.f32 %v7181_v54, %v6361_v55  ;;  %v2819_v42 = vmul.f32 %v6371_v60, %v2735_v32  ;;  %v2286_v25 = vrot.slane %v2068_v33, 2  ;;  %v2821_v45 = vmul.f32 %v7181_v54, %v6371_v60 }
 0x1f6   : > { %v5333_v1 = vpack.c.bf16 %v5281_v49, %v5279_v6  ;;  %v2290_v21 = vrot.slane %v2070_v20, 2  ;;  %v2823_v50 = vmul.f32 %v6371_v60, %v2737_v61  ;;  %v3371_v24 = vmul.f32 %v6378_v3, %v3287_v10  ;;  %v4592_v49 = vld [vmem:[#allocation2 + $0x188] sm:$0xfc] }
 0x1f7   : > { %v3037_v29 = vrot.slane %v2819_v42, 1  ;;  %v3373_v9 = vmul.f32 %v7181_v54, %v6378_v3  ;;  %v2287_v8 = vsel %vm2221_vm4, %v2285_v34, %v2286_v25  ;;  %v3038_v47 = vrot.slane %v2821_v45, 1  ;;  %v569_v45 = vpop.f32.mrf.mxu0 }
 0x1f8   : > { %5579 = vmatmul.mubr.bf16.gmra.mxu1 %v5333_v1  ;;  %v2291_v13 = vsel %vm2221_vm4, %v2286_v25, %v2290_v21  ;;  %v3375_v30 = vmul.f32 %v6378_v3, %v3289_v59  ;;  %v2471_v28 = vadd.f32 %v2287_v8, %v1918_v15  ;;  %v3042_v31 = vrot.slane %v2823_v50, 1 }
 0x1f9   : > { %v2473_v14 = vadd.f32 %v2291_v13, %v1920_v26  ;;  %v3589_v37 = vrot.slane %v3371_v24, 2  ;;  %v3039_v0 = vsel %vm1668_vm3, %v3037_v29, %v3038_v47  ;;  %v3590_v32 = vrot.slane %v3373_v9, 2  ;;  %v4594_v26 = vld [vmem:[#allocation2 + $0x1a8] sm:$0x3] }
 0x1fa   : > { %v3594_v6 = vrot.slane %v3375_v30, 2  ;;  %v3912_v16 = vmul.f32 %v6404_v52, %v7309_v46  ;;  %v2671_v33 = vadd.f32 %v2607_v58, %v2471_v28  ;;  %v3043_v61 = vsel %vm1668_vm3, %v3038_v47, %v3042_v31 }
 0x1fb   : > { %v2673_v20 = vadd.f32 %v2609_v22, %v2473_v14  ;;  %v3914_v15 = vmul.f32 %v6404_v52, %v7314_v51  ;;  %v3591_v10 = vsel %vm2221_vm4, %v3589_v37, %v3590_v32  ;;  %v4124_v42 = vmul.f32 %v6407_v53, %v4040_v35  ;;  %v7331_v22 = vld [vmem:[%s8679_s3 + $0x18] ss:$0 sm:$0xff]  ;;  %v1428_v35 = vld [vmem:[#allocation2 + $0x120] sm:$0xfe] }
 0x1fc   : > { %v3595_v34 = vsel %vm2221_vm4, %v3590_v32, %v3594_v6  ;;  %v4126_v59 = vmul.f32 %v6407_v53, %v7314_v51  ;;  %v3223_v1 = vadd.f32 %v3039_v0, %v2671_v33  ;;  %v4128_v58 = vmul.f32 %v6407_v53, %v4042_v57  ;;  %v1981_v33 = vld [vmem:[#allocation2 + $0x120] sm:$0xfc] }
 0x1fd   : > { %v3225_v25 = vadd.f32 %v3043_v61, %v2673_v20  ;;  %v4676_v21 = vmul.f32 %v7331_v22, %v4592_v49  ;;  %v4342_v50 = vrot.slane %v4124_v42, 1  ;;  %v4678_v24 = vmul.f32 %v7331_v22, %v7314_v51  ;;  %v1430_v49 = vld [vmem:[#allocation2 + $0x140] sm:$0x1] }
 0x1fe   : > { %v4343_v29 = vrot.slane %v4126_v59, 1  ;;  %v4680_v9 = vmul.f32 %v7331_v22, %v4594_v26  ;;  %v3775_v8 = vadd.f32 %v3591_v10, %v3223_v1  ;;  %v4347_v47 = vrot.slane %v4128_v58, 1  ;;  %v1983_v59 = vld [vmem:[#allocation2 + $0x140] sm:$0x3] }
 0x1ff   : > { %v3777_v13 = vadd.f32 %v3595_v34, %v3225_v25  ;;  %v4894_v30 = vrot.slane %v4676_v21, 2  ;;  %v4895_v14 = vrot.slane %v4678_v24, 2  ;;  %v570_v37 = vadd.f32 %v569_v45, %v6344_v39 }
 0x200   : > { %v4344_v28 = vsel %vm1668_vm3, %v4342_v50, %v4343_v29  ;;  %v4899_v31 = vrot.slane %v4680_v9, 2  ;;  %v3976_v0 = vadd.f32 %v3912_v16, %v3775_v8  ;;  %v4348_v6 = vsel %vm1668_vm3, %v4343_v29, %v4347_v47 }
 0x201   : > { %v3978_v32 = vadd.f32 %v3914_v15, %v3777_v13  ;;  %v1300_v57 = vmul.f32 %v7104_v11, %v6365_v56  ;;  %v4896_v20 = vsel %vm2221_vm4, %v4894_v30, %v4895_v14  ;;  %v655_v26 = vmax.f32 %v570_v37, 0.0 }
 0x202   : > { %v4900_v61 = vsel %vm2221_vm4, %v4895_v14, %v4899_v31  ;;  %v1302_v10 = vmul.f32 %v7108_v43, %v6365_v56  ;;  %v4528_v34 = vadd.f32 %v4344_v28, %v3976_v0  ;;  %v1512_v16 = vmul.f32 %v6333_v27, %v1428_v35  ;;  %v2734_v31 = vld [vmem:[#allocation2 + $0x150] sm:$0xfe] }
 0x203   : > { %v4530_v42 = vadd.f32 %v4348_v6, %v3978_v32  ;;  %v1514_v15 = vmul.f32 %v7108_v43, %v6333_v27  ;;  %v7349_v1 = vmin.f32 %v655_v26, 6.0  ;;  %v1516_v11 = vmul.f32 %v6333_v27, %v1430_v49 }
 0x204   : > { %v2065_v25 = vmul.f32 %v6348_v41, %v1981_v33  ;;  %v2067_v58 = vmul.f32 %v7108_v43, %v6348_v41  ;;  %v5080_v21 = vadd.f32 %v4896_v20, %v4528_v34  ;;  %v1729_v50 = vrot.slane %v1512_v16, 1  ;;  %v2736_v20 = vld [vmem:[#allocation2 + $0x170] sm:$0x1] }
 0x205   : > { %v5082_v45 = vadd.f32 %v4900_v61, %v4530_v42  ;;  %v1730_v29 = vrot.slane %v1514_v15, 1  ;;  %v982_v24 = vrot.slane %v7349_v1, 7  ;;  %v1735_v9 = vrot.slane %v1516_v11, 1  ;;  %v3286_v61 = vld [vmem:[#allocation2 + $0x150] sm:$0xfc] }
 0x206   : > { %v2069_v8 = vmul.f32 %v6348_v41, %v1983_v59  ;;  %v2282_v13 = vrot.slane %v2065_v25, 2  ;;  %v5156_v47 = vadd.f32 %v6420_v5, %v5080_v21  ;;  %v2283_v14 = vrot.slane %v2067_v58, 2  ;;  %v3288_v25 = vld [vmem:[#allocation2 + $0x170] sm:$0x3]  ;;  %v571_v58 = vpop.f32.mrf.mxu0 }
 0x207   : > { %v5158_v30 = vadd.f32 %v6420_v5, %v5082_v45  ;;  %v1731_v28 = vsel %vm1668_vm3, %v1729_v50, %v1730_v29  ;;  %1177 = vst.msk [vmem:[#allocation2 + $0x278] sm:$0xfe] %vm1103_vm5, %v982_v24  ;;  %v1736_v43 = vsel %vm1668_vm3, %v1730_v29, %v1735_v9  ;;  %v2606_v0 = vmul.f32 %v7240_v19, %v6355_v48  ;;  %v7377_v9 = vld [vmem:[#allocation2 + $0x190] sm:$0xff] }
 0x208   : > { %v1917_v37 = vadd.f32 %v1731_v28, %v1300_v57  ;;  %v2288_v35 = vrot.slane %v2069_v8, 2  ;;  %v5220_v32 = vmax.f32 %v5156_v47, 0.0  ;;  %v1919_v49 = vadd.f32 %v1736_v43, %v1302_v10  ;;  %v7373_v10 = vld [vmem:[#allocation2 + $0x180] sm:$0xff] }
 0x209   : > { %v5222_v6 = vmax.f32 %v5158_v30, 0.0  ;;  %v2284_v33 = vsel %vm2221_vm4, %v2282_v13, %v2283_v14  ;;  %v2608_v42 = vmul.f32 %v7242_v62, %v6355_v48  ;;  %v2818_v16 = vmul.f32 %v6397_v44, %v2734_v31  ;;  %v4039_v8 = vld [vmem:[#allocation2 + $0x180] sm:$0xfe] }
 0x20a   : > { %v2289_v26 = vsel %vm2221_vm4, %v2283_v14, %v2288_v35  ;;  %v2470_v34 = vadd.f32 %v2284_v33, %v1917_v37  ;;  %v5284_v57 = vmin.f32 %v5220_v32, 6.0  ;;  %v2820_v11 = vmul.f32 %v7242_v62, %v6397_v44  ;;  %v4041_v35 = vld [vmem:[#allocation2 + $0x1a0] sm:$0x1]  ;;  %v4591_v33 = vld [vmem:[#allocation2 + $0x180] sm:$0xfc] }
 0x20b   : > { %v5286_v15 = vmin.f32 %v5222_v6, 6.0  ;;  %v2472_v59 = vadd.f32 %v2289_v26, %v1919_v49  ;;  %v2822_v45 = vmul.f32 %v6397_v44, %v2736_v20  ;;  %v3034_v50 = vrot.slane %v2818_v16, 1  ;;  %v573_v20 = vpop.f32.mrf.mxu0  ;;  %v4593_v16 = vld [vmem:[#allocation2 + $0x1a0] sm:$0x3] }
 0x20c   : > { %v2670_v21 = vadd.f32 %v2606_v0, %v2470_v34  ;;  %v3370_v29 = vmul.f32 %v6412_v40, %v3286_v61  ;;  %v3035_v30 = vrot.slane %v2820_v11, 1  ;;  %v3372_v28 = vmul.f32 %v7242_v62, %v6412_v40 }
 0x20d   : > { %v5336_v13 = vpack.c.bf16 %v5286_v15, %v5284_v57  ;;  %v2672_v47 = vadd.f32 %v2608_v42, %v2472_v59  ;;  %v3040_v14 = vrot.slane %v2822_v45, 1  ;;  %v3374_v31 = vmul.f32 %v6412_v40, %v3288_v25 }
 0x20e   : > { %v3586_v43 = vrot.slane %v3370_v29, 2  ;;  %v3911_v37 = vmul.f32 %v6393_v36, %v7373_v10  ;;  %v3036_v0 = vsel %vm1668_vm3, %v3034_v50, %v3035_v30  ;;  %v3587_v32 = vrot.slane %v3372_v28, 2  ;;  %v7398_v29 = vld [vmem:[%s8679_s3 + $0x10] ss:$0 sm:$0xff]  ;;  %v577_v28 = vpop.f32.mrf.mxu0 }
 0x20f   : > { %5836 = vmatprep.mubr.msk.bf16.mxu1 %vm735_vm1, %v5336_v13  ;;  %v3913_v6 = vmul.f32 %v6393_v36, %v7377_v9  ;;  %v4123_v49 = vmul.f32 %v6423_v4, %v4039_v8  ;;  %v3041_v61 = vsel %vm1668_vm3, %v3035_v30, %v3040_v14  ;;  %v3222_v26 = vadd.f32 %v3036_v0, %v2670_v21 }
 0x210   : > { %v3592_v34 = vrot.slane %v3374_v31, 2  ;;  %v4125_v42 = vmul.f32 %v6423_v4, %v7377_v9  ;;  %v3224_v57 = vadd.f32 %v3041_v61, %v2672_v47  ;;  %v3588_v15 = vsel %vm2221_vm4, %v3586_v43, %v3587_v32 }
 0x211   : > { %v4127_v59 = vmul.f32 %v6423_v4, %v4041_v35  ;;  %v4339_v11 = vrot.slane %v4123_v49, 1  ;;  %v3774_v45 = vadd.f32 %v3588_v15, %v3222_v26  ;;  %v4675_v21 = vmul.f32 %v7398_v29, %v4591_v33 }
 0x212   : > { %v3593_v25 = vsel %vm2221_vm4, %v3587_v32, %v3592_v34  ;;  %v4340_v50 = vrot.slane %v4125_v42, 1  ;;  %v4677_v47 = vmul.f32 %v7398_v29, %v7377_v9  ;;  %v4679_v30 = vmul.f32 %v7398_v29, %v4593_v16 }
 0x213   : > { %v3776_v8 = vadd.f32 %v3593_v25, %v3224_v57  ;;  %v4345_v13 = vrot.slane %v4127_v59, 1  ;;  %v3975_v14 = vadd.f32 %v3911_v37, %v3774_v45  ;;  %v4891_v43 = vrot.slane %v4675_v21, 2  ;;  %v1433_v57 = vld [vmem:[#allocation2 + $0x158] sm:$0xfe]  ;;  %v1435_v45 = vld [vmem:[#allocation2 + $0x178] sm:$0x1] }
 0x214   : > { %v4341_v31 = vsel %vm1668_vm3, %v4339_v11, %v4340_v50  ;;  %v572_v35 = vadd.f32 %v571_v58, %v6341_v38  ;;  %v4892_v49 = vrot.slane %v4677_v47, 2  ;;  %v4897_v61 = vrot.slane %v4679_v30, 2 }
 0x215   : > { %v3977_v0 = vadd.f32 %v3913_v6, %v3776_v8  ;;  %v4346_v32 = vsel %vm1668_vm3, %v4340_v50, %v4345_v13  ;;  %v4527_v33 = vadd.f32 %v4341_v31, %v3975_v14  ;;  %v574_v34 = vadd.f32 %v573_v20, %v6344_v39 }
 0x216   : > { %v656_v26 = vmax.f32 %v572_v35, 0.0  ;;  %v578_v42 = vadd.f32 %v577_v28, %v6341_v38  ;;  %v4893_v37 = vsel %vm2221_vm4, %v4891_v43, %v4892_v49  ;;  %v4898_v15 = vsel %vm2221_vm4, %v4892_v49, %v4897_v61 }
 0x217   : > { %v4529_v16 = vadd.f32 %v4346_v32, %v3977_v0  ;;  %v1305_v58 = vmul.f32 %v7178_v7, %v6323_v17  ;;  %v5079_v6 = vadd.f32 %v4893_v37, %v4527_v33  ;;  %v657_v11 = vmax.f32 %v574_v34, 0.0  ;;  %v1986_v7 = vld [vmem:[#allocation2 + $0x158] sm:$0xfc]  ;;  %v1988_v33 = vld [vmem:[#allocation2 + $0x178] sm:$0x3] }
 0x218   : > { %v720_v59 = vmin.f32 %v656_v26, 6.0  ;;  %v658_v25 = vmax.f32 %v578_v42, 0.0  ;;  %v1307_v20 = vmul.f32 %v7181_v54, %v6323_v17  ;;  %v1519_v21 = vmul.f32 %v6305_v2, %v1433_v57 }
 0x219   : > { %v5081_v50 = vadd.f32 %v4898_v15, %v4529_v16  ;;  %v1521_v8 = vmul.f32 %v7181_v54, %v6305_v2  ;;  %v5155_v13 = vadd.f32 %v6417_v63, %v5079_v6  ;;  %v721_v30 = vmin.f32 %v657_v11, 6.0  ;;  %v2739_v15 = vld [vmem:[#allocation2 + $0x188] sm:$0xfe] }
 0x21a   : > { %v983_v47 = vrot.slane %v720_v59, 7  ;;  %v7419_v28 = vmin.f32 %v658_v25, 6.0  ;;  %v1523_v31 = vmul.f32 %v6305_v2, %v1435_v45  ;;  %v1742_v43 = vrot.slane %v1519_v21, 1  ;;  %v2741_v25 = vld [vmem:[#allocation2 + $0x1a8] sm:$0x1] }
 0x21b   : > { %v5157_v14 = vadd.f32 %v6417_v63, %v5081_v50  ;;  %v1743_v35 = vrot.slane %v1521_v8, 1  ;;  %v5219_v0 = vmax.f32 %v5155_v13, 0.0  ;;  %v985_v49 = vrot.slane %v721_v30, 7  ;;  %v3293_v30 = vld [vmem:[#allocation2 + $0x1a8] sm:$0x3] }
 0x21c   : > { %v984_v32 = vsel %vm908_vm6, %v981_v23, %v983_v47  ;;  %1180 = vst [vmem:[#allocation2 + $0x290] sm:$0x1] %v983_v47  ;;  %v987_v61 = vrot.slane %v7419_v28, 7  ;;  %v1747_v42 = vrot.slane %v1523_v31, 1  ;;  %v2072_v57 = vmul.f32 %v6311_v12, %v1986_v7 }
 0x21d   : > { %v5221_v26 = vmax.f32 %v5157_v14, 0.0  ;;  %1178 = vst [vmem:[#allocation2 + $0x280] sm:$0xff] %v984_v32  ;;  %v1744_v34 = vsel %vm1668_vm3, %v1742_v43, %v1743_v35  ;;  %v5283_v16 = vmin.f32 %v5219_v0, 6.0  ;;  %v986_v37 = vsel %vm908_vm6, %v982_v24, %v985_v49  ;;  %1181 = vst.msk [vmem:[#allocation2 + $0x298] sm:$0x1] %vm1108_vm7, %v985_v49  ;;  %v7452_v43 = vld [vmem:[#allocation2 + $0x1b8] sm:$0xff] }
 0x21e   : > { %1182 = vst [vmem:[#allocation2 + $0x2a0] sm:$0xfe] %v987_v61  ;;  %v1922_v18 = vadd.f32 %v1744_v34, %v1305_v58  ;;  %v2074_v23 = vmul.f32 %v7181_v54, %v6311_v12  ;;  %1179 = vst.msk [vmem:[#allocation2 + $0x288] sm:$0xff] %vm735_vm1, %v986_v37  ;;  %v1748_v59 = vsel %vm1668_vm3, %v1743_v35, %v1747_v42  ;;  %v2295_v1 = vrot.slane %v2072_v57, 2  ;;  %v3291_v24 = vld [vmem:[#allocation2 + $0x188] sm:$0xfc] }
 0x21f   : > { %v5285_v6 = vmin.f32 %v5221_v26, 6.0  ;;  %v2076_v11 = vmul.f32 %v6311_v12, %v1988_v33  ;;  %v1924_v45 = vadd.f32 %v1748_v59, %v1307_v20  ;;  %v2611_v21 = vmul.f32 %v7309_v46, %v6361_v55  ;;  %v7455_v33 = vld [vmem:[#allocation2 + $0x1c8] sm:$0xff]  ;;  %v4046_v59 = vld [vmem:[#allocation2 + $0x1d8] sm:$0x1] }
 0x220   : > { %v2296_v50 = vrot.slane %v2074_v23, 2  ;;  %v2613_v58 = vmul.f32 %v7314_v51, %v6361_v55  ;;  %v2825_v13 = vmul.f32 %v6371_v60, %v2739_v15  ;;  %v2827_v47 = vmul.f32 %v7314_v51, %v6371_v60 }
 0x221   : > { %v5335_v54 = vpack.c.bf16 %v5285_v6, %v5283_v16  ;;  %v2300_v8 = vrot.slane %v2076_v11, 2  ;;  %v2829_v14 = vmul.f32 %v6371_v60, %v2741_v25  ;;  %v3377_v20 = vmul.f32 %v6378_v3, %v3291_v24  ;;  %v4044_v16 = vld [vmem:[#allocation2 + $0x1b8] sm:$0xfe] }
 0x222   : > { %v2297_v7 = vsel %vm2221_vm4, %v2295_v1, %v2296_v50  ;;  %v3379_v31 = vmul.f32 %v7314_v51, %v6378_v3  ;;  %v3047_v32 = vrot.slane %v2825_v13, 1  ;;  %v3048_v49 = vrot.slane %v2827_v47, 1  ;;  %v4596_v11 = vld [vmem:[#allocation2 + $0x1b8] sm:$0xfc] }
 0x223   : > { %5587 = vmatmul.mubr.bf16.gmra.mxu1 %v5335_v54  ;;  %v2301_v35 = vsel %vm2221_vm4, %v2296_v50, %v2300_v8  ;;  %v2475_v0 = vadd.f32 %v2297_v7, %v1922_v18  ;;  %v3052_v34 = vrot.slane %v2829_v14, 1  ;;  %v3381_v42 = vmul.f32 %v6378_v3, %v3293_v30  ;;  %v4598_v8 = vld [vmem:[#allocation2 + $0x1d8] sm:$0x3]  ;;  %v579_v7 = vpop.f32.mrf.mxu0 }
 0x224   : > { %v2477_v26 = vadd.f32 %v2301_v35, %v1924_v45  ;;  %v3599_v57 = vrot.slane %v3377_v20, 2  ;;  %v3049_v23 = vsel %vm1668_vm3, %v3047_v32, %v3048_v49  ;;  %v3600_v15 = vrot.slane %v3379_v31, 2 }
 0x225   : > { %v2675_v37 = vadd.f32 %v2611_v21, %v2475_v0  ;;  %v3916_v6 = vmul.f32 %v6404_v52, %v7452_v43  ;;  %v3053_v1 = vsel %vm1668_vm3, %v3048_v49, %v3052_v34  ;;  %v3604_v25 = vrot.slane %v3381_v42, 2 }
 0x226   : > { %v2677_v18 = vadd.f32 %v2613_v58, %v2477_v26  ;;  %v3918_v24 = vmul.f32 %v6404_v52, %v7455_v33  ;;  %v3601_v50 = vsel %vm2221_vm4, %v3599_v57, %v3600_v15  ;;  %v4130_v21 = vmul.f32 %v6407_v53, %v4044_v16 }
 0x227   : > { %v3227_v45 = vadd.f32 %v3049_v23, %v2675_v37  ;;  %v4132_v54 = vmul.f32 %v6407_v53, %v7455_v33  ;;  %v3605_v47 = vsel %vm2221_vm4, %v3600_v15, %v3604_v25  ;;  %v4134_v58 = vmul.f32 %v6407_v53, %v4046_v59  ;;  %v1432_v37 = vld [vmem:[#allocation2 + $0x150] sm:$0xfe] }
 0x228   : > { %v3229_v13 = vadd.f32 %v3053_v1, %v2677_v18  ;;  %v4682_v30 = vmul.f32 %v7331_v22, %v4596_v11  ;;  %v4352_v20 = vrot.slane %v4130_v21, 1  ;;  %v4684_v35 = vmul.f32 %v7331_v22, %v7455_v33  ;;  %v1434_v18 = vld [vmem:[#allocation2 + $0x170] sm:$0x1]  ;;  %v1985_v1 = vld [vmem:[#allocation2 + $0x150] sm:$0xfc] }
 0x229   : > { %v3779_v14 = vadd.f32 %v3601_v50, %v3227_v45  ;;  %v4353_v31 = vrot.slane %v4132_v54, 1  ;;  %v4357_v32 = vrot.slane %v4134_v58, 1  ;;  %v4686_v49 = vmul.f32 %v7331_v22, %v4598_v8 }
 0x22a   : > { %v3781_v0 = vadd.f32 %v3605_v47, %v3229_v13  ;;  %v4904_v26 = vrot.slane %v4682_v30, 2  ;;  %v4905_v57 = vrot.slane %v4684_v35, 2  ;;  %v580_v16 = vadd.f32 %v579_v7, %v6344_v39  ;;  %v1987_v13 = vld [vmem:[#allocation2 + $0x170] sm:$0x3] }
 0x22b   : > { %v3980_v34 = vadd.f32 %v3916_v6, %v3779_v14  ;;  %v4354_v42 = vsel %vm1668_vm3, %v4352_v20, %v4353_v31  ;;  %v4358_v15 = vsel %vm1668_vm3, %v4353_v31, %v4357_v32  ;;  %v4909_v59 = vrot.slane %v4686_v49, 2 }
 0x22c   : > { %v3982_v23 = vadd.f32 %v3918_v24, %v3781_v0  ;;  %v1304_v11 = vmul.f32 %v7240_v19, %v6365_v56  ;;  %v4906_v45 = vsel %vm2221_vm4, %v4904_v26, %v4905_v57  ;;  %v659_v50 = vmax.f32 %v580_v16, 0.0 }
 0x22d   : > { %v4532_v25 = vadd.f32 %v4354_v42, %v3980_v34  ;;  %v1306_v6 = vmul.f32 %v7242_v62, %v6365_v56  ;;  %v4910_v54 = vsel %vm2221_vm4, %v4905_v57, %v4909_v59  ;;  %v1518_v24 = vmul.f32 %v6333_v27, %v1432_v37 }
 0x22e   : > { %v4534_v21 = vadd.f32 %v4358_v15, %v3982_v23  ;;  %v1520_v8 = vmul.f32 %v7242_v62, %v6333_v27  ;;  %v7486_v19 = vmin.f32 %v659_v50, 6.0  ;;  %v1522_v58 = vmul.f32 %v6333_v27, %v1434_v18  ;;  %v2738_v15 = vld [vmem:[#allocation2 + $0x180] sm:$0xfe] }
 0x22f   : > { %v5084_v47 = vadd.f32 %v4906_v45, %v4532_v25  ;;  %v2071_v30 = vmul.f32 %v6348_v41, %v1985_v1  ;;  %v1739_v14 = vrot.slane %v1518_v24, 1  ;;  %v2073_v31 = vmul.f32 %v7242_v62, %v6348_v41  ;;  %v2740_v45 = vld [vmem:[#allocation2 + $0x1a0] sm:$0x1]  ;;  %v3290_v50 = vld [vmem:[#allocation2 + $0x180] sm:$0xfc] }
 0x230   : > { %v5086_v7 = vadd.f32 %v4910_v54, %v4534_v21  ;;  %v1740_v20 = vrot.slane %v1520_v8, 1  ;;  %v988_v0 = vrot.slane %v7486_v19, 7  ;;  %v1745_v32 = vrot.slane %v1522_v58, 1  ;;  %v3292_v58 = vld [vmem:[#allocation2 + $0x1a0] sm:$0x3] }
 0x231   : > { %v5160_v35 = vadd.f32 %v6420_v5, %v5084_v47  ;;  %v2075_v49 = vmul.f32 %v6348_v41, %v1987_v13  ;;  %v2292_v42 = vrot.slane %v2071_v30, 2  ;;  %v2293_v57 = vrot.slane %v2073_v31, 2  ;;  %v7514_v31 = vld [vmem:[#allocation2 + $0x1b0] sm:$0xff]  ;;  %v2745_v19 = vld [vmem:[#allocation2 + $0x1d8] sm:$0x1] }
 0x232   : > { %v5162_v26 = vadd.f32 %v6420_v5, %v5086_v7  ;;  %v1741_v34 = vsel %vm1668_vm3, %v1739_v14, %v1740_v20  ;;  %1183 = vst.msk [vmem:[#allocation2 + $0x2a8] sm:$0xfe] %vm1103_vm5, %v988_v0  ;;  %v1746_v62 = vsel %vm1668_vm3, %v1740_v20, %v1745_v32  ;;  %v2610_v25 = vmul.f32 %v7373_v10, %v6355_v48  ;;  %v4043_v32 = vld [vmem:[#allocation2 + $0x1b0] sm:$0xfe] }
 0x233   : > { %v5224_v16 = vmax.f32 %v5160_v35, 0.0  ;;  %v1921_v37 = vadd.f32 %v1741_v34, %v1304_v11  ;;  %v2298_v23 = vrot.slane %v2075_v49, 2  ;;  %v1923_v18 = vadd.f32 %v1746_v62, %v1306_v6  ;;  %v7516_v35 = vld [vmem:[#allocation2 + $0x1c0] sm:$0xff]  ;;  %v581_v49 = vpop.f32.mrf.mxu0 }
 0x234   : > { %v5226_v59 = vmax.f32 %v5162_v26, 0.0  ;;  %v2294_v1 = vsel %vm2221_vm4, %v2292_v42, %v2293_v57  ;;  %v2612_v8 = vmul.f32 %v7377_v9, %v6355_v48  ;;  %v2824_v47 = vmul.f32 %v6397_v44, %v2738_v15  ;;  %v4045_v15 = vld [vmem:[#allocation2 + $0x1d0] sm:$0x1] }
 0x235   : > { %v5288_v21 = vmin.f32 %v5224_v16, 6.0  ;;  %v2299_v54 = vsel %vm2221_vm4, %v2293_v57, %v2298_v23  ;;  %v2474_v24 = vadd.f32 %v2294_v1, %v1921_v37  ;;  %v2826_v6 = vmul.f32 %v7377_v9, %v6397_v44 }
 0x236   : > { %v5290_v13 = vmin.f32 %v5226_v59, 6.0  ;;  %v2476_v11 = vadd.f32 %v2299_v54, %v1923_v18  ;;  %v2828_v7 = vmul.f32 %v6397_v44, %v2740_v45  ;;  %v3376_v14 = vmul.f32 %v6412_v40, %v3290_v50  ;;  %v4595_v45 = vld [vmem:[#allocation2 + $0x1b0] sm:$0xfc] }
 0x237   : > { %v2674_v30 = vadd.f32 %v2610_v25, %v2474_v24  ;;  %v3378_v20 = vmul.f32 %v7377_v9, %v6412_v40  ;;  %v3044_v42 = vrot.slane %v2824_v47, 1  ;;  %v3045_v57 = vrot.slane %v2826_v6, 1 }
 0x238   : > { %v5338_v26 = vpack.c.bf16 %v5290_v13, %v5288_v21  ;;  %v2676_v34 = vadd.f32 %v2612_v8, %v2476_v11  ;;  %v3050_v16 = vrot.slane %v2828_v7, 1  ;;  %v3380_v62 = vmul.f32 %v6412_v40, %v3292_v58  ;;  %v4597_v8 = vld [vmem:[#allocation2 + $0x1d0] sm:$0x3]  ;;  %v583_v13 = vpop.f32.mrf.mxu0 }
 0x239   : > { %v3596_v37 = vrot.slane %v3376_v14, 2  ;;  %v3597_v23 = vrot.slane %v3378_v20, 2  ;;  %v3046_v59 = vsel %vm1668_vm3, %v3044_v42, %v3045_v57  ;;  %v3915_v18 = vmul.f32 %v6393_v36, %v7514_v31 }
 0x23a   : > { %5837 = vmatprep.mubr.msk.bf16.mxu1 %vm735_vm1, %v5338_v26  ;;  %v3917_v1 = vmul.f32 %v6393_v36, %v7516_v35  ;;  %v4129_v25 = vmul.f32 %v6423_v4, %v4043_v32  ;;  %v3051_v50 = vsel %vm1668_vm3, %v3045_v57, %v3050_v16  ;;  %v3226_v21 = vadd.f32 %v3046_v59, %v2674_v30 }
 0x23b   : > { %v3598_v54 = vsel %vm2221_vm4, %v3596_v37, %v3597_v23  ;;  %v3602_v24 = vrot.slane %v3380_v62, 2  ;;  %v3228_v11 = vadd.f32 %v3051_v50, %v2676_v34  ;;  %v4131_v47 = vmul.f32 %v6423_v4, %v7516_v35 }
 0x23c   : > { %v4133_v6 = vmul.f32 %v6423_v4, %v4045_v15  ;;  %v4349_v58 = vrot.slane %v4129_v25, 1  ;;  %v3778_v14 = vadd.f32 %v3598_v54, %v3226_v21  ;;  %v4681_v20 = vmul.f32 %v7398_v29, %v4595_v45  ;;  %v587_v15 = vpop.f32.mrf.mxu0 }
 0x23d   : > { %v3603_v7 = vsel %vm2221_vm4, %v3597_v23, %v3602_v24  ;;  %v4683_v30 = vmul.f32 %v7398_v29, %v7516_v35  ;;  %v4350_v26 = vrot.slane %v4131_v47, 1  ;;  %v4685_v57 = vmul.f32 %v7398_v29, %v4597_v8 }
 0x23e   : > { %v3780_v32 = vadd.f32 %v3603_v7, %v3228_v11  ;;  %v4355_v42 = vrot.slane %v4133_v6, 1  ;;  %v3979_v34 = vadd.f32 %v3915_v18, %v3778_v14  ;;  %v4901_v16 = vrot.slane %v4681_v20, 2  ;;  %v1437_v11 = vld [vmem:[#allocation2 + $0x188] sm:$0xfe] }
 0x23f   : > { %v4902_v62 = vrot.slane %v4683_v30, 2  ;;  %v582_v37 = vadd.f32 %v581_v49, %v6341_v38  ;;  %v4351_v23 = vsel %vm1668_vm3, %v4349_v58, %v4350_v26  ;;  %v4907_v45 = vrot.slane %v4685_v57, 2 }
 0x240   : > { %v3981_v59 = vadd.f32 %v3917_v1, %v3780_v32  ;;  %v4356_v25 = vsel %vm1668_vm3, %v4350_v26, %v4355_v42  ;;  %v4531_v50 = vadd.f32 %v4351_v23, %v3979_v34  ;;  %v584_v24 = vadd.f32 %v583_v13, %v6344_v39  ;;  %v1439_v1 = vld [vmem:[#allocation2 + $0x1a8] sm:$0x1]  ;;  %v1990_v34 = vld [vmem:[#allocation2 + $0x188] sm:$0xfc] }
 0x241   : > { %v4903_v21 = vsel %vm2221_vm4, %v4901_v16, %v4902_v62  ;;  %v660_v54 = vmax.f32 %v582_v37, 0.0  ;;  %v4908_v18 = vsel %vm2221_vm4, %v4902_v62, %v4907_v45  ;;  %v588_v47 = vadd.f32 %v587_v15, %v6341_v38 }
 0x242   : > { %v4533_v8 = vadd.f32 %v4356_v25, %v3981_v59  ;;  %v1309_v49 = vmul.f32 %v7309_v46, %v6323_v17  ;;  %v5083_v6 = vadd.f32 %v4903_v21, %v4531_v50  ;;  %v661_v7 = vmax.f32 %v584_v24, 0.0  ;;  %v1992_v50 = vld [vmem:[#allocation2 + $0x1a8] sm:$0x3] }
 0x243   : > { %v724_v58 = vmin.f32 %v660_v54, 6.0  ;;  %v1311_v14 = vmul.f32 %v7314_v51, %v6323_v17  ;;  %v662_v30 = vmax.f32 %v588_v47, 0.0  ;;  %v1525_v13 = vmul.f32 %v6305_v2, %v1437_v11 }
 0x244   : > { %v5085_v20 = vadd.f32 %v4908_v18, %v4533_v8  ;;  %v1527_v32 = vmul.f32 %v7314_v51, %v6305_v2  ;;  %v5159_v26 = vadd.f32 %v6417_v63, %v5083_v6  ;;  %v725_v57 = vmin.f32 %v661_v7, 6.0  ;;  %v2743_v8 = vld [vmem:[#allocation2 + $0x1b8] sm:$0xfe] }
 0x245   : > { %v989_v42 = vrot.slane %v724_v58, 7  ;;  %v1529_v46 = vmul.f32 %v6305_v2, %v1439_v1  ;;  %v7553_v62 = vmin.f32 %v662_v30, 6.0  ;;  %v1752_v37 = vrot.slane %v1525_v13, 1 }
 0x246   : > { %v5161_v16 = vadd.f32 %v6417_v63, %v5085_v20  ;;  %v1753_v15 = vrot.slane %v1527_v32, 1  ;;  %v5223_v59 = vmax.f32 %v5159_v26, 0.0  ;;  %v991_v25 = vrot.slane %v725_v57, 7  ;;  %v3295_v20 = vld [vmem:[#allocation2 + $0x1b8] sm:$0xfc] }
 0x247   : > { %v990_v23 = vsel %vm908_vm6, %v987_v61, %v989_v42  ;;  %1186 = vst [vmem:[#allocation2 + $0x2c0] sm:$0x1] %v989_v42  ;;  %v1757_v45 = vrot.slane %v1529_v46, 1  ;;  %v993_v54 = vrot.slane %v7553_v62, 7  ;;  %v2078_v11 = vmul.f32 %v6311_v12, %v1990_v34  ;;  %v3297_v32 = vld [vmem:[#allocation2 + $0x1d8] sm:$0x3] }
 0x248   : > { %v5225_v21 = vmax.f32 %v5161_v16, 0.0  ;;  %1184 = vst [vmem:[#allocation2 + $0x2b0] sm:$0xff] %v990_v23  ;;  %v1754_v24 = vsel %vm1668_vm3, %v1752_v37, %v1753_v15  ;;  %v5287_v18 = vmin.f32 %v5223_v59, 6.0  ;;  %v992_v28 = vsel %vm908_vm6, %v988_v0, %v991_v25  ;;  %1187 = vst.msk [vmem:[#allocation2 + $0x2c8] sm:$0x1] %vm1108_vm7, %v991_v25  ;;  %v7583_v37 = vld [vmem:[#allocation2 + $0x1e8] sm:$0xff] }
 0x249   : > { %v1758_v61 = vsel %vm1668_vm3, %v1753_v15, %v1757_v45  ;;  %v1926_v47 = vadd.f32 %v1754_v24, %v1309_v49  ;;  %1185 = vst.msk [vmem:[#allocation2 + $0x2b8] sm:$0xff] %vm735_vm1, %v992_v28  ;;  %1188 = vst [vmem:[#allocation2 + $0x2d0] sm:$0xfe] %v993_v54  ;;  %v2080_v58 = vmul.f32 %v7314_v51, %v6311_v12  ;;  %v2305_v0 = vrot.slane %v2078_v11, 2  ;;  %v7588_v45 = vld [vmem:[#allocation2 + $0x1f8] sm:$0xff] }
 0x24a   : > { %v5289_v1 = vmin.f32 %v5225_v21, 6.0  ;;  %v1928_v6 = vadd.f32 %v1758_v61, %v1311_v14  ;;  %v2082_v7 = vmul.f32 %v6311_v12, %v1992_v50  ;;  %v2615_v30 = vmul.f32 %v7452_v43, %v6361_v55 }
 0x24b   : > { %v2617_v49 = vmul.f32 %v7455_v33, %v6361_v55  ;;  %v2831_v13 = vmul.f32 %v6371_v60, %v2743_v8  ;;  %v2306_v42 = vrot.slane %v2080_v58, 2  ;;  %v2833_v51 = vmul.f32 %v7455_v33, %v6371_v60  ;;  %v4048_v8 = vld [vmem:[#allocation2 + $0x1e8] sm:$0xfe]  ;;  %v4050_v58 = vld [vmem:[#allocation2 + $0x208] sm:$0x1] }
 0x24c   : > { %v5337_v26 = vpack.c.bf16 %v5289_v1, %v5287_v18  ;;  %v2310_v14 = vrot.slane %v2082_v7, 2  ;;  %v2835_v57 = vmul.f32 %v6371_v60, %v2745_v19  ;;  %v3383_v34 = vmul.f32 %v6378_v3, %v3295_v20  ;;  %v4600_v7 = vld [vmem:[#allocation2 + $0x1e8] sm:$0xfc] }
 0x24d   : > { %v3057_v46 = vrot.slane %v2831_v13, 1  ;;  %v3385_v16 = vmul.f32 %v7455_v33, %v6378_v3  ;;  %v2307_v15 = vsel %vm2221_vm4, %v2305_v0, %v2306_v42  ;;  %v3058_v23 = vrot.slane %v2833_v51, 1 }
 0x24e   : > { %5595 = vmatmul.mubr.bf16.gmra.mxu1 %v5337_v26  ;;  %v2311_v59 = vsel %vm2221_vm4, %v2306_v42, %v2310_v14  ;;  %v3387_v25 = vmul.f32 %v6378_v3, %v3297_v32  ;;  %v2479_v50 = vadd.f32 %v2307_v15, %v1926_v47  ;;  %v3062_v24 = vrot.slane %v2835_v57, 1  ;;  %v589_v57 = vpop.f32.mrf.mxu0 }
 0x24f   : > { %v2481_v21 = vadd.f32 %v2311_v59, %v1928_v6  ;;  %v3609_v11 = vrot.slane %v3383_v34, 2  ;;  %v3059_v18 = vsel %vm1668_vm3, %v3057_v46, %v3058_v23  ;;  %v3610_v28 = vrot.slane %v3385_v16, 2  ;;  %v4602_v6 = vld [vmem:[#allocation2 + $0x208] sm:$0x3] }
 0x250   : > { %v3614_v61 = vrot.slane %v3387_v25, 2  ;;  %v3920_v1 = vmul.f32 %v6404_v52, %v7583_v37  ;;  %v2679_v19 = vadd.f32 %v2615_v30, %v2479_v50  ;;  %v3063_v0 = vsel %vm1668_vm3, %v3058_v23, %v3062_v24 }
 0x251   : > { %v2681_v20 = vadd.f32 %v2617_v49, %v2481_v21  ;;  %v3922_v47 = vmul.f32 %v6404_v52, %v7588_v45  ;;  %v3611_v13 = vsel %vm2221_vm4, %v3609_v11, %v3610_v28  ;;  %v4136_v26 = vmul.f32 %v6407_v53, %v4048_v8 }
 0x252   : > { %v3615_v32 = vsel %vm2221_vm4, %v3610_v28, %v3614_v61  ;;  %v4138_v42 = vmul.f32 %v6407_v53, %v7588_v45  ;;  %v3231_v14 = vadd.f32 %v3059_v18, %v2679_v19  ;;  %v4140_v30 = vmul.f32 %v6407_v53, %v4050_v58  ;;  %v1436_v18 = vld [vmem:[#allocation2 + $0x180] sm:$0xfe]  ;;  %v1438_v19 = vld [vmem:[#allocation2 + $0x1a0] sm:$0x1] }
 0x253   : > { %v3233_v51 = vadd.f32 %v3063_v0, %v2681_v20  ;;  %v4688_v49 = vmul.f32 %v7331_v22, %v4600_v7  ;;  %v4362_v46 = vrot.slane %v4136_v26, 1  ;;  %v4690_v16 = vmul.f32 %v7331_v22, %v7588_v45 }
 0x254   : > { %v4363_v34 = vrot.slane %v4138_v42, 1  ;;  %v4692_v15 = vmul.f32 %v7331_v22, %v4602_v6  ;;  %v3783_v59 = vadd.f32 %v3611_v13, %v3231_v14  ;;  %v4367_v25 = vrot.slane %v4140_v30, 1  ;;  %v1989_v22 = vld [vmem:[#allocation2 + $0x180] sm:$0xfc]  ;;  %v1991_v42 = vld [vmem:[#allocation2 + $0x1a0] sm:$0x3] }
 0x255   : > { %v3785_v23 = vadd.f32 %v3615_v32, %v3233_v51  ;;  %v4914_v50 = vrot.slane %v4688_v49, 2  ;;  %v4915_v24 = vrot.slane %v4690_v16, 2  ;;  %v590_v8 = vadd.f32 %v589_v57, %v6344_v39 }
 0x256   : > { %v4364_v21 = vsel %vm1668_vm3, %v4362_v46, %v4363_v34  ;;  %v4919_v11 = vrot.slane %v4692_v15, 2  ;;  %v3984_v28 = vadd.f32 %v3920_v1, %v3783_v59  ;;  %v4368_v58 = vsel %vm1668_vm3, %v4363_v34, %v4367_v25 }
 0x257   : > { %v3986_v61 = vadd.f32 %v3922_v47, %v3785_v23  ;;  %v1308_v7 = vmul.f32 %v7373_v10, %v6365_v56  ;;  %v4916_v20 = vsel %vm2221_vm4, %v4914_v50, %v4915_v24  ;;  %v663_v6 = vmax.f32 %v590_v8, 0.0 }
 0x258   : > { %v4920_v0 = vsel %vm2221_vm4, %v4915_v24, %v4919_v11  ;;  %v1310_v13 = vmul.f32 %v7377_v9, %v6365_v56  ;;  %v4536_v32 = vadd.f32 %v4364_v21, %v3984_v28  ;;  %v1524_v1 = vmul.f32 %v6333_v27, %v1436_v18  ;;  %v2742_v11 = vld [vmem:[#allocation2 + $0x1b0] sm:$0xfe] }
 0x259   : > { %v4538_v26 = vadd.f32 %v4368_v58, %v3986_v61  ;;  %v1526_v47 = vmul.f32 %v7377_v9, %v6333_v27  ;;  %v7618_v14 = vmin.f32 %v663_v6, 6.0  ;;  %v1528_v10 = vmul.f32 %v6333_v27, %v1438_v19 }
 0x25a   : > { %v2077_v51 = vmul.f32 %v6348_v41, %v1989_v22  ;;  %v2079_v30 = vmul.f32 %v7377_v9, %v6348_v41  ;;  %v5088_v49 = vadd.f32 %v4916_v20, %v4536_v32  ;;  %v1749_v46 = vrot.slane %v1524_v1, 1  ;;  %v2744_v20 = vld [vmem:[#allocation2 + $0x1d0] sm:$0x1] }
 0x25b   : > { %v5090_v57 = vadd.f32 %v4920_v0, %v4538_v26  ;;  %v1750_v34 = vrot.slane %v1526_v47, 1  ;;  %v994_v16 = vrot.slane %v7618_v14, 7  ;;  %v1755_v15 = vrot.slane %v1528_v10, 1  ;;  %v3294_v0 = vld [vmem:[#allocation2 + $0x1b0] sm:$0xfc] }
 0x25c   : > { %v2081_v59 = vmul.f32 %v6348_v41, %v1991_v42  ;;  %v2302_v23 = vrot.slane %v2077_v51, 2  ;;  %v5164_v25 = vadd.f32 %v6420_v5, %v5088_v49  ;;  %v2303_v24 = vrot.slane %v2079_v30, 2  ;;  %v3296_v51 = vld [vmem:[#allocation2 + $0x1d0] sm:$0x3]  ;;  %v591_v30 = vpop.f32.mrf.mxu0 }
 0x25d   : > { %v5166_v50 = vadd.f32 %v6420_v5, %v5090_v57  ;;  %v1751_v21 = vsel %vm1668_vm3, %v1749_v46, %v1750_v34  ;;  %1189 = vst.msk [vmem:[#allocation2 + $0x2d8] sm:$0xfe] %vm1103_vm5, %v994_v16  ;;  %v1756_v9 = vsel %vm1668_vm3, %v1750_v34, %v1755_v15  ;;  %v2614_v28 = vmul.f32 %v7514_v31, %v6355_v48  ;;  %v7646_v15 = vld [vmem:[#allocation2 + $0x1f0] sm:$0xff] }
 0x25e   : > { %v1925_v8 = vadd.f32 %v1751_v21, %v1308_v7  ;;  %v2308_v18 = vrot.slane %v2081_v59, 2  ;;  %v5228_v61 = vmax.f32 %v5164_v25, 0.0  ;;  %v1927_v19 = vadd.f32 %v1756_v9, %v1310_v13  ;;  %v7642_v13 = vld [vmem:[#allocation2 + $0x1e0] sm:$0xff] }
 0x25f   : > { %v5230_v58 = vmax.f32 %v5166_v50, 0.0  ;;  %v2304_v22 = vsel %vm2221_vm4, %v2302_v23, %v2303_v24  ;;  %v2616_v26 = vmul.f32 %v7516_v35, %v6355_v48  ;;  %v2830_v1 = vmul.f32 %v6397_v44, %v2742_v11  ;;  %v4047_v59 = vld [vmem:[#allocation2 + $0x1e0] sm:$0xfe] }
 0x260   : > { %v2309_v6 = vsel %vm2221_vm4, %v2303_v24, %v2308_v18  ;;  %v2478_v32 = vadd.f32 %v2304_v22, %v1925_v8  ;;  %v5292_v7 = vmin.f32 %v5228_v61, 6.0  ;;  %v2832_v10 = vmul.f32 %v7516_v35, %v6397_v44  ;;  %v4049_v18 = vld [vmem:[#allocation2 + $0x200] sm:$0x1]  ;;  %v4599_v22 = vld [vmem:[#allocation2 + $0x1e0] sm:$0xfc] }
 0x261   : > { %v5294_v47 = vmin.f32 %v5230_v58, 6.0  ;;  %v2480_v42 = vadd.f32 %v2309_v6, %v1927_v19  ;;  %v2834_v57 = vmul.f32 %v6397_v44, %v2744_v20  ;;  %v3054_v46 = vrot.slane %v2830_v1, 1  ;;  %v593_v20 = vpop.f32.mrf.mxu0  ;;  %v4601_v1 = vld [vmem:[#allocation2 + $0x200] sm:$0x3] }
 0x262   : > { %v2678_v49 = vadd.f32 %v2614_v28, %v2478_v32  ;;  %v3382_v34 = vmul.f32 %v6412_v40, %v3294_v0  ;;  %v3055_v50 = vrot.slane %v2832_v10, 1  ;;  %v3384_v21 = vmul.f32 %v7516_v35, %v6412_v40 }
 0x263   : > { %v5340_v23 = vpack.c.bf16 %v5294_v47, %v5292_v7  ;;  %v2680_v25 = vadd.f32 %v2616_v26, %v2480_v42  ;;  %v3060_v24 = vrot.slane %v2834_v57, 1  ;;  %v3386_v11 = vmul.f32 %v6412_v40, %v3296_v51 }
 0x264   : > { %v3606_v9 = vrot.slane %v3382_v34, 2  ;;  %v3919_v8 = vmul.f32 %v6393_v36, %v7642_v13  ;;  %v3056_v28 = vsel %vm1668_vm3, %v3054_v46, %v3055_v50  ;;  %v3607_v61 = vrot.slane %v3384_v21, 2  ;;  %v597_v21 = vpop.f32.mrf.mxu0 }
 0x265   : > { %5838 = vmatprep.mubr.msk.bf16.mxu1 %vm735_vm1, %v5340_v23  ;;  %v3921_v58 = vmul.f32 %v6393_v36, %v7646_v15  ;;  %v4135_v19 = vmul.f32 %v6423_v4, %v4047_v59  ;;  %v3061_v0 = vsel %vm1668_vm3, %v3055_v50, %v3060_v24  ;;  %v3230_v6 = vadd.f32 %v3056_v28, %v2678_v49 }
 0x266   : > { %v3612_v32 = vrot.slane %v3386_v11, 2  ;;  %v4137_v26 = vmul.f32 %v6423_v4, %v7646_v15  ;;  %v3232_v7 = vadd.f32 %v3061_v0, %v2680_v25  ;;  %v3608_v47 = vsel %vm2221_vm4, %v3606_v9, %v3607_v61 }
 0x267   : > { %v4139_v42 = vmul.f32 %v6423_v4, %v4049_v18  ;;  %v4359_v10 = vrot.slane %v4135_v19, 1  ;;  %v3782_v57 = vadd.f32 %v3608_v47, %v3230_v6  ;;  %v4687_v34 = vmul.f32 %v7398_v29, %v4599_v22 }
 0x268   : > { %v3613_v51 = vsel %vm2221_vm4, %v3607_v61, %v3612_v32  ;;  %v4360_v46 = vrot.slane %v4137_v26, 1  ;;  %v4689_v49 = vmul.f32 %v7398_v29, %v7646_v15  ;;  %v4691_v50 = vmul.f32 %v7398_v29, %v4601_v1  ;;  %v1441_v26 = vld [vmem:[#allocation2 + $0x1b8] sm:$0xfe] }
 0x269   : > { %v3784_v59 = vadd.f32 %v3613_v51, %v3232_v7  ;;  %v4365_v23 = vrot.slane %v4139_v42, 1  ;;  %v3983_v25 = vadd.f32 %v3919_v8, %v3782_v57  ;;  %v4911_v11 = vrot.slane %v4687_v34, 2 }
 0x26a   : > { %v4361_v24 = vsel %vm1668_vm3, %v4359_v10, %v4360_v46  ;;  %v592_v9 = vadd.f32 %v591_v30, %v6341_v38  ;;  %v4912_v61 = vrot.slane %v4689_v49, 2  ;;  %v4917_v19 = vrot.slane %v4691_v50, 2  ;;  %v1443_v10 = vld [vmem:[#allocation2 + $0x1d8] sm:$0x1] }
 0x26b   : > { %v3985_v18 = vadd.f32 %v3921_v58, %v3784_v59  ;;  %v4366_v28 = vsel %vm1668_vm3, %v4360_v46, %v4365_v23  ;;  %v4535_v22 = vadd.f32 %v4361_v24, %v3983_v25  ;;  %v594_v6 = vadd.f32 %v593_v20, %v6344_v39 }
 0x26c   : > { %v664_v0 = vmax.f32 %v592_v9, 0.0  ;;  %v598_v32 = vadd.f32 %v597_v21, %v6341_v38  ;;  %v4913_v8 = vsel %vm2221_vm4, %v4911_v11, %v4912_v61  ;;  %v4918_v1 = vsel %vm2221_vm4, %v4912_v61, %v4917_v19  ;;  %v1996_v61 = vld [vmem:[#allocation2 + $0x1d8] sm:$0x3] }
 0x26d   : > { %v4537_v29 = vadd.f32 %v4366_v28, %v3985_v18  ;;  %v1313_v30 = vmul.f32 %v7452_v43, %v6323_v17  ;;  %v5087_v58 = vadd.f32 %v4913_v8, %v4535_v22  ;;  %v665_v47 = vmax.f32 %v594_v6, 0.0  ;;  %v1994_v43 = vld [vmem:[#allocation2 + $0x1b8] sm:$0xfc] }
 0x26e   : > { %v728_v7 = vmin.f32 %v664_v0, 6.0  ;;  %v666_v42 = vmax.f32 %v598_v32, 0.0  ;;  %v1315_v20 = vmul.f32 %v7455_v33, %v6323_v17  ;;  %v1531_v57 = vmul.f32 %v6305_v2, %v1441_v26 }
 0x26f   : > { %v5089_v51 = vadd.f32 %v4918_v1, %v4537_v29  ;;  %v1533_v46 = vmul.f32 %v7455_v33, %v6305_v2  ;;  %v5163_v34 = vadd.f32 %v6417_v63, %v5087_v58  ;;  %v729_v23 = vmin.f32 %v665_v47, 6.0  ;;  %v2747_v29 = vld [vmem:[#allocation2 + $0x1e8] sm:$0xfe] }
 0x270   : > { %v995_v59 = vrot.slane %v728_v7, 7  ;;  %v7683_v49 = vmin.f32 %v666_v42, 6.0  ;;  %v1535_v21 = vmul.f32 %v6305_v2, %v1443_v10  ;;  %v1762_v25 = vrot.slane %v1531_v57, 1  ;;  %v2749_v7 = vld [vmem:[#allocation2 + $0x208] sm:$0x1] }
 0x271   : > { %v5165_v50 = vadd.f32 %v6417_v63, %v5089_v51  ;;  %v1763_v24 = vrot.slane %v1533_v46, 1  ;;  %v5227_v11 = vmax.f32 %v5163_v34, 0.0  ;;  %v997_v18 = vrot.slane %v729_v23, 7  ;;  %v3301_v34 = vld [vmem:[#allocation2 + $0x208] sm:$0x3] }
 0x272   : > { %v996_v9 = vsel %vm908_vm6, %v993_v54, %v995_v59  ;;  %1192 = vst [vmem:[#allocation2 + $0x2f0] sm:$0x1] %v995_v59  ;;  %v999_v28 = vrot.slane %v7683_v49, 7  ;;  %v1767_v0 = vrot.slane %v1535_v21, 1  ;;  %v2084_v6 = vmul.f32 %v6311_v12, %v1994_v43 }
 0x273   : > { %v5229_v19 = vmax.f32 %v5165_v50, 0.0  ;;  %1190 = vst [vmem:[#allocation2 + $0x2e0] sm:$0xff] %v996_v9  ;;  %v1764_v22 = vsel %vm1668_vm3, %v1762_v25, %v1763_v24  ;;  %v5291_v32 = vmin.f32 %v5227_v11, 6.0  ;;  %v998_v26 = vsel %vm908_vm6, %v994_v16, %v997_v18  ;;  %1193 = vst.msk [vmem:[#allocation2 + $0x2f8] sm:$0x1] %vm1108_vm7, %v997_v18  ;;  %v7716_v50 = vld [vmem:[#allocation2 + $0x218] sm:$0xff] }
 0x274   : > { %1194 = vst [vmem:[#allocation2 + $0x300] sm:$0xfe] %v999_v28  ;;  %v1930_v62 = vadd.f32 %v1764_v22, %v1313_v30  ;;  %v2086_v54 = vmul.f32 %v7455_v33, %v6311_v12  ;;  %1191 = vst.msk [vmem:[#allocation2 + $0x2e8] sm:$0xff] %vm735_vm1, %v998_v26  ;;  %v1768_v1 = vsel %vm1668_vm3, %v1763_v24, %v1767_v0  ;;  %v2315_v14 = vrot.slane %v2084_v6, 2  ;;  %v3299_v16 = vld [vmem:[#allocation2 + $0x1e8] sm:$0xfc] }
 0x275   : > { %v5293_v8 = vmin.f32 %v5229_v19, 6.0  ;;  %v2088_v58 = vmul.f32 %v6311_v12, %v1996_v61  ;;  %v1932_v47 = vadd.f32 %v1768_v1, %v1315_v20  ;;  %v2619_v10 = vmul.f32 %v7583_v37, %v6361_v55  ;;  %v7719_v9 = vld [vmem:[#allocation2 + $0x228] sm:$0xff]  ;;  %v4052_v0 = vld [vmem:[#allocation2 + $0x218] sm:$0xfe] }
 0x276   : > { %v2316_v42 = vrot.slane %v2086_v54, 2  ;;  %v2621_v30 = vmul.f32 %v7588_v45, %v6361_v55  ;;  %v2837_v57 = vmul.f32 %v6371_v60, %v2747_v29  ;;  %v2839_v46 = vmul.f32 %v7588_v45, %v6371_v60  ;;  %v4054_v29 = vld [vmem:[#allocation2 + $0x238] sm:$0x1] }
 0x277   : > { %v5339_v33 = vpack.c.bf16 %v5293_v8, %v5291_v32  ;;  %v2320_v51 = vrot.slane %v2088_v58, 2  ;;  %v2841_v23 = vmul.f32 %v6371_v60, %v2749_v7  ;;  %v3389_v20 = vmul.f32 %v6378_v3, %v3299_v16  ;;  %v4604_v8 = vld [vmem:[#allocation2 + $0x218] sm:$0xfc] }
 0x278   : > { %v2317_v59 = vsel %vm2221_vm4, %v2315_v14, %v2316_v42  ;;  %v3391_v43 = vmul.f32 %v7588_v45, %v6378_v3  ;;  %v3067_v24 = vrot.slane %v2837_v57, 1  ;;  %v3068_v11 = vrot.slane %v2839_v46, 1  ;;  %v7737_v57 = vld [vmem:[%s8679_s3 + $0x18] ss:$0 sm:$0xff] }
 0x279   : > { %5603 = vmatmul.mubr.bf16.gmra.mxu1 %v5339_v33  ;;  %v2321_v21 = vsel %vm2221_vm4, %v2316_v42, %v2320_v51  ;;  %v2483_v25 = vadd.f32 %v2317_v59, %v1930_v62  ;;  %v3072_v61 = vrot.slane %v2841_v23, 1  ;;  %v3393_v19 = vmul.f32 %v6378_v3, %v3301_v34  ;;  %v599_v34 = vpop.f32.mrf.mxu0 }
 0x27a   : > { %v2485_v18 = vadd.f32 %v2321_v21, %v1932_v47  ;;  %v3619_v22 = vrot.slane %v3389_v20, 2  ;;  %v3069_v32 = vsel %vm1668_vm3, %v3067_v24, %v3068_v11  ;;  %v3620_v26 = vrot.slane %v3391_v43, 2 }
 0x27b   : > { %v2683_v6 = vadd.f32 %v2619_v10, %v2483_v25  ;;  %v3924_v54 = vmul.f32 %v6404_v52, %v7716_v50  ;;  %v3073_v1 = vsel %vm1668_vm3, %v3068_v11, %v3072_v61  ;;  %v3624_v58 = vrot.slane %v3393_v19, 2  ;;  %v4606_v10 = vld [vmem:[#allocation2 + $0x238] sm:$0x3] }
 0x27c   : > { %v2685_v62 = vadd.f32 %v2621_v30, %v2485_v18  ;;  %v3926_v14 = vmul.f32 %v6404_v52, %v7719_v9  ;;  %v3621_v16 = vsel %vm2221_vm4, %v3619_v22, %v3620_v26  ;;  %v4142_v47 = vmul.f32 %v6407_v53, %v4052_v0  ;;  %v1440_v0 = vld [vmem:[#allocation2 + $0x1b0] sm:$0xfe] }
 0x27d   : > { %v3235_v7 = vadd.f32 %v3069_v32, %v2683_v6  ;;  %v4144_v42 = vmul.f32 %v6407_v53, %v7719_v9  ;;  %v3625_v51 = vsel %vm2221_vm4, %v3620_v26, %v3624_v58  ;;  %v4146_v30 = vmul.f32 %v6407_v53, %v4054_v29 }
 0x27e   : > { %v3237_v33 = vadd.f32 %v3073_v1, %v2685_v62  ;;  %v4694_v46 = vmul.f32 %v7737_v57, %v4604_v8  ;;  %v4372_v23 = vrot.slane %v4142_v47, 1  ;;  %v4696_v43 = vmul.f32 %v7737_v57, %v7719_v9  ;;  %v1442_v8 = vld [vmem:[#allocation2 + $0x1d0] sm:$0x1]  ;;  %v1993_v62 = vld [vmem:[#allocation2 + $0x1b0] sm:$0xfc] }
 0x27f   : > { %v3787_v59 = vadd.f32 %v3621_v16, %v3235_v7  ;;  %v4373_v20 = vrot.slane %v4144_v42, 1  ;;  %v4377_v25 = vrot.slane %v4146_v30, 1  ;;  %v4698_v24 = vmul.f32 %v7737_v57, %v4606_v10  ;;  %v1995_v10 = vld [vmem:[#allocation2 + $0x1d0] sm:$0x3] }
 0x280   : > { %v3789_v21 = vadd.f32 %v3625_v51, %v3237_v33  ;;  %v4924_v11 = vrot.slane %v4694_v46, 2  ;;  %v4925_v19 = vrot.slane %v4696_v43, 2  ;;  %v600_v22 = vadd.f32 %v599_v34, %v6344_v39 }
 0x281   : > { %v3988_v18 = vadd.f32 %v3924_v54, %v3787_v59  ;;  %v4374_v61 = vsel %vm1668_vm3, %v4372_v23, %v4373_v20  ;;  %v4378_v32 = vsel %vm1668_vm3, %v4373_v20, %v4377_v25  ;;  %v4929_v26 = vrot.slane %v4698_v24, 2 }
 0x282   : > { %v3990_v6 = vadd.f32 %v3926_v14, %v3789_v21  ;;  %v1312_v29 = vmul.f32 %v7514_v31, %v6365_v56  ;;  %v4926_v58 = vsel %vm2221_vm4, %v4924_v11, %v4925_v19  ;;  %v667_v7 = vmax.f32 %v600_v22, 0.0 }
 0x283   : > { %v4540_v1 = vadd.f32 %v4374_v61, %v3988_v18  ;;  %v1314_v54 = vmul.f32 %v7516_v35, %v6365_v56  ;;  %v4930_v47 = vsel %vm2221_vm4, %v4925_v19, %v4929_v26  ;;  %v1530_v14 = vmul.f32 %v6333_v27, %v1440_v0 }
 0x284   : > { %v4542_v16 = vadd.f32 %v4378_v32, %v3990_v6  ;;  %v1532_v42 = vmul.f32 %v7516_v35, %v6333_v27  ;;  %v7755_v31 = vmin.f32 %v667_v7, 6.0  ;;  %v1534_v51 = vmul.f32 %v6333_v27, %v1442_v8  ;;  %v2746_v6 = vld [vmem:[#allocation2 + $0x1e0] sm:$0xfe] }
 0x285   : > { %v5092_v33 = vadd.f32 %v4926_v58, %v4540_v1  ;;  %v2083_v30 = vmul.f32 %v6348_v41, %v1993_v62  ;;  %v1759_v34 = vrot.slane %v1530_v14, 1  ;;  %v2085_v23 = vmul.f32 %v7516_v35, %v6348_v41  ;;  %v2748_v1 = vld [vmem:[#allocation2 + $0x200] sm:$0x1]  ;;  %v3298_v58 = vld [vmem:[#allocation2 + $0x1e0] sm:$0xfc] }
 0x286   : > { %v5094_v46 = vadd.f32 %v4930_v47, %v4542_v16  ;;  %v1760_v59 = vrot.slane %v1532_v42, 1  ;;  %v1000_v43 = vrot.slane %v7755_v31, 7  ;;  %v1765_v21 = vrot.slane %v1534_v51, 1 }
 0x287   : > { %v5168_v20 = vadd.f32 %v6420_v5, %v5092_v33  ;;  %v2087_v25 = vmul.f32 %v6348_v41, %v1995_v10  ;;  %v2312_v18 = vrot.slane %v2083_v30, 2  ;;  %v2313_v61 = vrot.slane %v2085_v23, 2  ;;  %v3300_v33 = vld [vmem:[#allocation2 + $0x200] sm:$0x3] }
 0x288   : > { %v5170_v24 = vadd.f32 %v6420_v5, %v5094_v46  ;;  %v1761_v11 = vsel %vm1668_vm3, %v1759_v34, %v1760_v59  ;;  %1195 = vst.msk [vmem:[#allocation2 + $0x308] sm:$0xfe] %vm1103_vm5, %v1000_v43  ;;  %v1766_v35 = vsel %vm1668_vm3, %v1760_v59, %v1765_v21  ;;  %v2618_v62 = vmul.f32 %v7642_v13, %v6355_v48  ;;  %v7783_v59 = vld [vmem:[#allocation2 + $0x210] sm:$0xff]  ;;  %v7785_v23 = vld [vmem:[#allocation2 + $0x220] sm:$0xff] }
 0x289   : > { %v5232_v19 = vmax.f32 %v5168_v20, 0.0  ;;  %v1929_v22 = vadd.f32 %v1761_v11, %v1312_v29  ;;  %v2318_v0 = vrot.slane %v2087_v25, 2  ;;  %v1931_v26 = vadd.f32 %v1766_v35, %v1314_v54  ;;  %v4051_v20 = vld [vmem:[#allocation2 + $0x210] sm:$0xfe] }
 0x28a   : > { %v5234_v32 = vmax.f32 %v5170_v24, 0.0  ;;  %v2314_v8 = vsel %vm2221_vm4, %v2312_v18, %v2313_v61  ;;  %v2620_v14 = vmul.f32 %v7646_v15, %v6355_v48  ;;  %v2836_v10 = vmul.f32 %v6397_v44, %v2746_v6 }
 0x28b   : > { %v5296_v7 = vmin.f32 %v5232_v19, 6.0  ;;  %v2319_v16 = vsel %vm2221_vm4, %v2313_v61, %v2318_v0  ;;  %v2482_v47 = vadd.f32 %v2314_v8, %v1929_v22  ;;  %v2838_v54 = vmul.f32 %v7646_v15, %v6397_v44  ;;  %v4053_v22 = vld [vmem:[#allocation2 + $0x230] sm:$0x1]  ;;  %v4603_v8 = vld [vmem:[#allocation2 + $0x210] sm:$0xfc] }
 0x28c   : > { %v5298_v42 = vmin.f32 %v5234_v32, 6.0  ;;  %v2484_v29 = vadd.f32 %v2319_v16, %v1931_v26  ;;  %v2840_v30 = vmul.f32 %v6397_v44, %v2748_v1  ;;  %v3388_v46 = vmul.f32 %v6412_v40, %v3298_v58 }
 0x28d   : > { %v2682_v51 = vadd.f32 %v2618_v62, %v2482_v47  ;;  %v3390_v34 = vmul.f32 %v7646_v15, %v6412_v40  ;;  %v3064_v24 = vrot.slane %v2836_v10, 1  ;;  %v3065_v11 = vrot.slane %v2838_v54, 1  ;;  %v601_v62 = vpop.f32.mrf.mxu0  ;;  %v4605_v47 = vld [vmem:[#allocation2 + $0x230] sm:$0x3] }
 0x28e   : > { %v5342_v21 = vpack.c.bf16 %v5298_v42, %v5296_v7  ;;  %v2684_v25 = vadd.f32 %v2620_v14, %v2484_v29  ;;  %v3070_v18 = vrot.slane %v2840_v30, 1  ;;  %v3392_v61 = vmul.f32 %v6412_v40, %v3300_v33  ;;  %v7804_v30 = vld [vmem:[%s8679_s3 + $0x10] ss:$0 sm:$0xff] }
 0x28f   : > { %v3616_v19 = vrot.slane %v3388_v46, 2  ;;  %v3617_v35 = vrot.slane %v3390_v34, 2  ;;  %v3066_v0 = vsel %vm1668_vm3, %v3064_v24, %v3065_v11  ;;  %v3923_v6 = vmul.f32 %v6393_v36, %v7783_v59  ;;  %v603_v24 = vpop.f32.mrf.mxu0 }
 0x290   : > { %5839 = vmatprep.mubr.msk.bf16.mxu1 %vm735_vm1, %v5342_v21  ;;  %v3925_v32 = vmul.f32 %v6393_v36, %v7785_v23  ;;  %v4141_v26 = vmul.f32 %v6423_v4, %v4051_v20  ;;  %v3071_v1 = vsel %vm1668_vm3, %v3065_v11, %v3070_v18  ;;  %v3234_v58 = vadd.f32 %v3066_v0, %v2682_v51 }
 0x291   : > { %v3618_v7 = vsel %vm2221_vm4, %v3616_v19, %v3617_v35  ;;  %v3622_v16 = vrot.slane %v3392_v61, 2  ;;  %v3236_v14 = vadd.f32 %v3071_v1, %v2684_v25  ;;  %v4143_v42 = vmul.f32 %v6423_v4, %v7785_v23 }
 0x292   : > { %v4145_v29 = vmul.f32 %v6423_v4, %v4053_v22  ;;  %v4369_v10 = vrot.slane %v4141_v26, 1  ;;  %v3786_v33 = vadd.f32 %v3618_v7, %v3234_v58  ;;  %v4693_v51 = vmul.f32 %v7804_v30, %v4603_v8  ;;  %v1445_v8 = vld [vmem:[#allocation2 + $0x1e8] sm:$0xfe] }
 0x293   : > { %v3623_v54 = vsel %vm2221_vm4, %v3617_v35, %v3622_v16  ;;  %v4695_v46 = vmul.f32 %v7804_v30, %v7785_v23  ;;  %v4370_v20 = vrot.slane %v4143_v42, 1  ;;  %v4697_v25 = vmul.f32 %v7804_v30, %v4605_v47  ;;  %v1447_v47 = vld [vmem:[#allocation2 + $0x208] sm:$0x1] }
 0x294   : > { %v3788_v34 = vadd.f32 %v3623_v54, %v3236_v14  ;;  %v4375_v21 = vrot.slane %v4145_v29, 1  ;;  %v3987_v11 = vadd.f32 %v3923_v6, %v3786_v33  ;;  %v4921_v18 = vrot.slane %v4693_v51, 2  ;;  %v1998_v14 = vld [vmem:[#allocation2 + $0x1e8] sm:$0xfc] }
 0x295   : > { %v4922_v61 = vrot.slane %v4695_v46, 2  ;;  %v602_v19 = vadd.f32 %v601_v62, %v6341_v38  ;;  %v4371_v22 = vsel %vm1668_vm3, %v4369_v10, %v4370_v20  ;;  %v4927_v26 = vrot.slane %v4697_v25, 2  ;;  %v2000_v46 = vld [vmem:[#allocation2 + $0x208] sm:$0x3] }
 0x296   : > { %v3989_v35 = vadd.f32 %v3925_v32, %v3788_v34  ;;  %v4376_v0 = vsel %vm1668_vm3, %v4370_v20, %v4375_v21  ;;  %v4539_v1 = vadd.f32 %v4371_v22, %v3987_v11  ;;  %v604_v16 = vadd.f32 %v603_v24, %v6344_v39 }
 0x297   : > { %v4923_v58 = vsel %vm2221_vm4, %v4921_v18, %v4922_v61  ;;  %v668_v7 = vmax.f32 %v602_v19, 0.0  ;;  %v4928_v42 = vsel %vm2221_vm4, %v4922_v61, %v4927_v26  ;;  %v1317_v38 = vmul.f32 %v7583_v37, %v6323_v17 }
 0x298   : > { %v4541_v6 = vadd.f32 %v4376_v0, %v3989_v35  ;;  %v1319_v32 = vmul.f32 %v7588_v45, %v6323_v17  ;;  %v5091_v62 = vadd.f32 %v4923_v58, %v4539_v1  ;;  %v669_v10 = vmax.f32 %v604_v16, 0.0  ;;  %v2753_v16 = vld [vmem:[#allocation2 + $0x238] sm:$0x1] }
 0x299   : > { %v732_v29 = vmin.f32 %v668_v7, 6.0  ;;  %v1537_v54 = vmul.f32 %v6305_v2, %v1445_v8  ;;  %v1539_v39 = vmul.f32 %v7588_v45, %v6305_v2  ;;  %v1541_v51 = vmul.f32 %v6305_v2, %v1447_v47  ;;  %v2751_v7 = vld [vmem:[#allocation2 + $0x218] sm:$0xfe] }
 0x29a   : > { %v5093_v33 = vadd.f32 %v4928_v42, %v4541_v6  ;;  %v2090_v34 = vmul.f32 %v6311_v12, %v1998_v14  ;;  %v5167_v20 = vadd.f32 %v6417_v63, %v5091_v62  ;;  %v733_v21 = vmin.f32 %v669_v10, 6.0  ;;  %v3303_v14 = vld [vmem:[#allocation2 + $0x218] sm:$0xfc] }
 0x29b   : > { %v1001_v37 = vrot.slane %v732_v29, 7  ;;  %v1772_v25 = vrot.slane %v1537_v54, 1  ;;  %v1773_v11 = vrot.slane %v1539_v39, 1  ;;  %v1777_v18 = vrot.slane %v1541_v51, 1 }
 0x29c   : > { %v5169_v24 = vadd.f32 %v6417_v63, %v5093_v33  ;;  %v2092_v61 = vmul.f32 %v7588_v45, %v6311_v12  ;;  %v5231_v19 = vmax.f32 %v5167_v20, 0.0  ;;  %v1003_v22 = vrot.slane %v733_v21, 7 }
 0x29d   : > { %v1002_v35 = vsel %vm908_vm6, %v999_v28, %v1001_v37  ;;  %1198 = vst [vmem:[#allocation2 + $0x320] sm:$0x1] %v1001_v37  ;;  %v2094_v0 = vmul.f32 %v6311_v12, %v2000_v46  ;;  %v1774_v8 = vsel %vm1668_vm3, %v1772_v25, %v1773_v11  ;;  %v1778_v1 = vsel %vm1668_vm3, %v1773_v11, %v1777_v18  ;;  %v7851_v46 = vld [vmem:[#allocation2 + $0x248] sm:$0xff]  ;;  %v7853_v25 = vld [vmem:[#allocation2 + $0x258] sm:$0xff] }
 0x29e   : > { %v5233_v26 = vmax.f32 %v5169_v24, 0.0  ;;  %1196 = vst [vmem:[#allocation2 + $0x310] sm:$0xff] %v1002_v35  ;;  %v2325_v58 = vrot.slane %v2090_v34, 2  ;;  %v5295_v47 = vmin.f32 %v5231_v19, 6.0  ;;  %v1004_v45 = vsel %vm908_vm6, %v1000_v43, %v1003_v22  ;;  %1199 = vst.msk [vmem:[#allocation2 + $0x328] sm:$0x1] %vm1108_vm7, %v1003_v22 }
 0x29f   : > { %v1934_v49 = vadd.f32 %v1774_v8, %v1317_v38  ;;  %v1936_v28 = vadd.f32 %v1778_v1, %v1319_v32  ;;  %1197 = vst.msk [vmem:[#allocation2 + $0x318] sm:$0xff] %vm735_vm1, %v1004_v45  ;;  %v2326_v42 = vrot.slane %v2092_v61, 2  ;;  %v2330_v62 = vrot.slane %v2094_v0, 2  ;;  %v3305_v32 = vld [vmem:[#allocation2 + $0x238] sm:$0x3] }
 0x2a0   : > { %v5297_v6 = vmin.f32 %v5233_v26, 6.0  ;;  %v2623_v29 = vmul.f32 %v7716_v50, %v6361_v55  ;;  %v2625_v10 = vmul.f32 %v7719_v9, %v6361_v55  ;;  %v2843_v31 = vmul.f32 %v6371_v60, %v2751_v7  ;;  %v4056_v19 = vld [vmem:[#allocation2 + $0x248] sm:$0xfe]  ;;  %v4058_v8 = vld [vmem:[#allocation2 + $0x268] sm:$0x1] }
 0x2a1   : > { %v2845_v43 = vmul.f32 %v7719_v9, %v6371_v60  ;;  %v2847_v38 = vmul.f32 %v6371_v60, %v2753_v16  ;;  %v2327_v33 = vsel %vm2221_vm4, %v2325_v58, %v2326_v42  ;;  %v2331_v39 = vsel %vm2221_vm4, %v2326_v42, %v2330_v62  ;;  %v4608_v1 = vld [vmem:[#allocation2 + $0x248] sm:$0xfc] }
 0x2a2   : > { %v5341_v54 = vpack.c.bf16 %v5297_v6, %v5295_v47  ;;  %v3395_v51 = vmul.f32 %v6378_v3, %v3303_v14  ;;  %v2487_v34 = vadd.f32 %v2327_v33, %v1934_v49  ;;  %v2489_v20 = vadd.f32 %v2331_v39, %v1936_v28  ;;  %v4610_v6 = vld [vmem:[#allocation2 + $0x268] sm:$0x3] }
 0x2a3   : > { %v3077_v37 = vrot.slane %v2843_v31, 1  ;;  %v3078_v21 = vrot.slane %v2845_v43, 1  ;;  %v3082_v24 = vrot.slane %v2847_v38, 1  ;;  %v3397_v11 = vmul.f32 %v7719_v9, %v6378_v3 }
 0x2a4   : > { %5611 = vmatmul.mubr.bf16.gmra.mxu1 %v5341_v54  ;;  %v3399_v18 = vmul.f32 %v6378_v3, %v3305_v32  ;;  %v3629_v61 = vrot.slane %v3395_v51, 2  ;;  %v2687_v35 = vadd.f32 %v2623_v29, %v2487_v34  ;;  %v2689_v22 = vadd.f32 %v2625_v10, %v2489_v20  ;;  %v1444_v34 = vld [vmem:[#allocation2 + $0x1e0] sm:$0xfe] }
 0x2a5   : > { %v3079_v0 = vsel %vm1668_vm3, %v3077_v37, %v3078_v21  ;;  %v3928_v26 = vmul.f32 %v6404_v52, %v7851_v46  ;;  %v3083_v58 = vsel %vm1668_vm3, %v3078_v21, %v3082_v24  ;;  %v3630_v7 = vrot.slane %v3397_v11, 2  ;;  %v1446_v11 = vld [vmem:[#allocation2 + $0x200] sm:$0x1] }
 0x2a6   : > { %v3634_v16 = vrot.slane %v3399_v18, 2  ;;  %v3930_v47 = vmul.f32 %v6404_v52, %v7853_v25  ;;  %v3239_v45 = vadd.f32 %v3079_v0, %v2687_v35  ;;  %v3241_v49 = vadd.f32 %v3083_v58, %v2689_v22  ;;  %v1997_v18 = vld [vmem:[#allocation2 + $0x1e0] sm:$0xfc]  ;;  %v1999_v58 = vld [vmem:[#allocation2 + $0x200] sm:$0x3] }
 0x2a7   : > { %v4148_v28 = vmul.f32 %v6407_v53, %v4056_v19  ;;  %v4150_v14 = vmul.f32 %v6407_v53, %v7853_v25  ;;  %v3631_v42 = vsel %vm2221_vm4, %v3629_v61, %v3630_v7  ;;  %v4152_v29 = vmul.f32 %v6407_v53, %v4058_v8 }
 0x2a8   : > { %v3635_v62 = vsel %vm2221_vm4, %v3630_v7, %v3634_v16  ;;  %v4700_v10 = vmul.f32 %v7737_v57, %v4608_v1  ;;  %v3791_v31 = vadd.f32 %v3631_v42, %v3239_v45  ;;  %v4702_v33 = vmul.f32 %v7737_v57, %v7853_v25 }
 0x2a9   : > { %v3793_v43 = vadd.f32 %v3635_v62, %v3241_v49  ;;  %v4382_v38 = vrot.slane %v4148_v28, 1  ;;  %v4383_v32 = vrot.slane %v4150_v14, 1  ;;  %v4387_v54 = vrot.slane %v4152_v29, 1 }
 0x2aa   : > { %v4704_v39 = vmul.f32 %v7737_v57, %v4610_v6  ;;  %v4934_v51 = vrot.slane %v4700_v10, 2  ;;  %v3992_v20 = vadd.f32 %v3928_v26, %v3791_v31  ;;  %v1316_v24 = vmul.f32 %v7642_v13, %v6365_v56 }
 0x2ab   : > { %v3994_v37 = vadd.f32 %v3930_v47, %v3793_v43  ;;  %v4384_v21 = vsel %vm1668_vm3, %v4382_v38, %v4383_v32  ;;  %v4388_v61 = vsel %vm1668_vm3, %v4383_v32, %v4387_v54  ;;  %v4935_v19 = vrot.slane %v4702_v33, 2  ;;  %v2750_v32 = vld [vmem:[#allocation2 + $0x210] sm:$0xfe] }
 0x2ac   : > { %v4939_v35 = vrot.slane %v4704_v39, 2  ;;  %v1318_v22 = vmul.f32 %v7646_v15, %v6365_v56  ;;  %v4544_v0 = vadd.f32 %v4384_v21, %v3992_v20  ;;  %v1536_v1 = vmul.f32 %v6333_v27, %v1444_v34  ;;  %v2752_v21 = vld [vmem:[#allocation2 + $0x230] sm:$0x1] }
 0x2ad   : > { %v4546_v8 = vadd.f32 %v4388_v61, %v3994_v37  ;;  %v1538_v26 = vmul.f32 %v7646_v15, %v6333_v27  ;;  %v4936_v7 = vsel %vm2221_vm4, %v4934_v51, %v4935_v19  ;;  %v1540_v16 = vmul.f32 %v6333_v27, %v1446_v11  ;;  %v3302_v11 = vld [vmem:[#allocation2 + $0x210] sm:$0xfc] }
 0x2ae   : > { %v4940_v13 = vsel %vm2221_vm4, %v4935_v19, %v4939_v35  ;;  %v2089_v47 = vmul.f32 %v6348_v41, %v1997_v18  ;;  %v5096_v45 = vadd.f32 %v4936_v7, %v4544_v0  ;;  %v1769_v28 = vrot.slane %v1536_v1, 1 }
 0x2af   : > { %v5098_v49 = vadd.f32 %v4940_v13, %v4546_v8  ;;  %v1770_v14 = vrot.slane %v1538_v26, 1  ;;  %v1775_v6 = vrot.slane %v1540_v16, 1  ;;  %v2091_v42 = vmul.f32 %v7646_v15, %v6348_v41  ;;  %v3304_v26 = vld [vmem:[#allocation2 + $0x230] sm:$0x3]  ;;  %v7905_v16 = vld [vmem:[#allocation2 + $0x240] sm:$0xff] }
 0x2b0   : > { %v2093_v62 = vmul.f32 %v6348_v41, %v1999_v58  ;;  %v2322_v29 = vrot.slane %v2089_v47, 2  ;;  %v5172_v10 = vadd.f32 %v6420_v5, %v5096_v45  ;;  %v2622_v38 = vmul.f32 %v7783_v59, %v6355_v48  ;;  %v7907_v47 = vld [vmem:[#allocation2 + $0x250] sm:$0xff] }
 0x2b1   : > { %v5174_v31 = vadd.f32 %v6420_v5, %v5098_v49  ;;  %v1771_v43 = vsel %vm1668_vm3, %v1769_v28, %v1770_v14  ;;  %v1776_v54 = vsel %vm1668_vm3, %v1770_v14, %v1775_v6  ;;  %v2323_v39 = vrot.slane %v2091_v42, 2  ;;  %v4055_v6 = vld [vmem:[#allocation2 + $0x240] sm:$0xfe] }
 0x2b2   : > { %v1933_v33 = vadd.f32 %v1771_v43, %v1316_v24  ;;  %v2328_v51 = vrot.slane %v2093_v62, 2  ;;  %v5236_v34 = vmax.f32 %v5172_v10, 0.0  ;;  %v1935_v20 = vadd.f32 %v1776_v54, %v1318_v22  ;;  %v4607_v43 = vld [vmem:[#allocation2 + $0x240] sm:$0xfc] }
 0x2b3   : > { %v5238_v15 = vmax.f32 %v5174_v31, 0.0  ;;  %v2624_v37 = vmul.f32 %v7785_v23, %v6355_v48  ;;  %v2324_v18 = vsel %vm2221_vm4, %v2322_v29, %v2323_v39  ;;  %v2842_v19 = vmul.f32 %v6397_v44, %v2750_v32  ;;  %v4057_v31 = vld [vmem:[#allocation2 + $0x260] sm:$0x1] }
 0x2b4   : > { %v2329_v61 = vsel %vm2221_vm4, %v2323_v39, %v2328_v51  ;;  %v2844_v35 = vmul.f32 %v7785_v23, %v6397_v44  ;;  %v5300_v24 = vmin.f32 %v5236_v34, 6.0  ;;  %v2486_v8 = vadd.f32 %v2324_v18, %v1933_v33 }
 0x2b5   : > { %v5302_v0 = vmin.f32 %v5238_v15, 6.0  ;;  %v2488_v1 = vadd.f32 %v2329_v61, %v1935_v20  ;;  %v2846_v22 = vmul.f32 %v6397_v44, %v2752_v21  ;;  %v3074_v58 = vrot.slane %v2842_v19, 1  ;;  %v4609_v20 = vld [vmem:[#allocation2 + $0x260] sm:$0x3] }
 0x2b6   : > { %v3075_v7 = vrot.slane %v2844_v35, 1  ;;  %v3394_v13 = vmul.f32 %v6412_v40, %v3302_v11  ;;  %v2686_v49 = vadd.f32 %v2622_v38, %v2486_v8  ;;  %v3396_v14 = vmul.f32 %v7785_v23, %v6412_v40 }
 0x2b7   : > { %v5344_v45 = vpack.c.bf16 %v5302_v0, %v5300_v24  ;;  %v2688_v28 = vadd.f32 %v2624_v37, %v2488_v1  ;;  %v3080_v62 = vrot.slane %v2846_v22, 1  ;;  %v3398_v29 = vmul.f32 %v6412_v40, %v3304_v26  ;;  %v1449_v22 = vld [vmem:[#allocation2 + $0x218] sm:$0xfe] }
 0x2b8   : > { %v3076_v42 = vsel %vm1668_vm3, %v3074_v58, %v3075_v7  ;;  %v3626_v10 = vrot.slane %v3394_v13, 2  ;;  %v3627_v54 = vrot.slane %v3396_v14, 2  ;;  %v3927_v38 = vmul.f32 %v6393_v36, %v7905_v16 }
 0x2b9   : > { %5840 = vmatprep.mubr.msk.bf16.mxu1 %vm735_vm1, %v5344_v45  ;;  %v3238_v32 = vadd.f32 %v3076_v42, %v2686_v49  ;;  %v3929_v33 = vmul.f32 %v6393_v36, %v7907_v47  ;;  %v3081_v39 = vsel %vm1668_vm3, %v3075_v7, %v3080_v62  ;;  %v3632_v51 = vrot.slane %v3398_v29, 2  ;;  %v1451_v49 = vld [vmem:[#allocation2 + $0x238] sm:$0x1]  ;;  %v2002_v62 = vld [vmem:[#allocation2 + $0x218] sm:$0xfc] }
 0x2ba   : > { %v4147_v34 = vmul.f32 %v6423_v4, %v4055_v6  ;;  %v4149_v15 = vmul.f32 %v6423_v4, %v7907_v47  ;;  %v3240_v37 = vadd.f32 %v3081_v39, %v2688_v28  ;;  %v3628_v21 = vsel %vm2221_vm4, %v3626_v10, %v3627_v54 }
 0x2bb   : > { %v4151_v11 = vmul.f32 %v6423_v4, %v4057_v31  ;;  %v4699_v18 = vmul.f32 %v7804_v30, %v4607_v43  ;;  %v3633_v61 = vsel %vm2221_vm4, %v3627_v54, %v3632_v51  ;;  %v3790_v19 = vadd.f32 %v3628_v21, %v3238_v32  ;;  %v2004_v32 = vld [vmem:[#allocation2 + $0x238] sm:$0x3] }
 0x2bc   : > { %v4379_v35 = vrot.slane %v4147_v34, 1  ;;  %v4380_v24 = vrot.slane %v4149_v15, 1  ;;  %v3792_v0 = vadd.f32 %v3633_v61, %v3240_v37  ;;  %v4701_v1 = vmul.f32 %v7804_v30, %v7907_v47 }
 0x2bd   : > { %v4385_v8 = vrot.slane %v4151_v11, 1  ;;  %v4703_v26 = vmul.f32 %v7804_v30, %v4609_v20  ;;  %v3991_v58 = vadd.f32 %v3927_v38, %v3790_v19  ;;  %v4931_v13 = vrot.slane %v4699_v18, 2 }
 0x2be   : > { %v4381_v7 = vsel %vm1668_vm3, %v4379_v35, %v4380_v24  ;;  %v1321_v45 = vmul.f32 %v7716_v50, %v6323_v17  ;;  %v3993_v28 = vadd.f32 %v3929_v33, %v3792_v0  ;;  %v4932_v6 = vrot.slane %v4701_v1, 2 }
 0x2bf   : > { %v4386_v14 = vsel %vm1668_vm3, %v4380_v24, %v4385_v8  ;;  %v4937_v42 = vrot.slane %v4703_v26, 2  ;;  %v4543_v29 = vadd.f32 %v4381_v7, %v3991_v58  ;;  %v1323_v10 = vmul.f32 %v7719_v9, %v6323_v17  ;;  %v2755_v24 = vld [vmem:[#allocation2 + $0x248] sm:$0xfe] }
 0x2c0   : > { %v1543_v31 = vmul.f32 %v6305_v2, %v1449_v22  ;;  %v1545_v43 = vmul.f32 %v7719_v9, %v6305_v2  ;;  %v4545_v54 = vadd.f32 %v4386_v14, %v3993_v28  ;;  %v4933_v50 = vsel %vm2221_vm4, %v4931_v13, %v4932_v6  ;;  %v2757_v22 = vld [vmem:[#allocation2 + $0x268] sm:$0x1] }
 0x2c1   : > { %v4938_v38 = vsel %vm2221_vm4, %v4932_v6, %v4937_v42  ;;  %v1547_v33 = vmul.f32 %v6305_v2, %v1451_v49  ;;  %v5095_v39 = vadd.f32 %v4933_v50, %v4543_v29  ;;  %v2096_v15 = vmul.f32 %v6311_v12, %v2002_v62  ;;  %v3307_v42 = vld [vmem:[#allocation2 + $0x248] sm:$0xfc] }
 0x2c2   : > { %v1782_v51 = vrot.slane %v1543_v31, 1  ;;  %v1783_v34 = vrot.slane %v1545_v43, 1  ;;  %v5097_v20 = vadd.f32 %v4938_v38, %v4545_v54  ;;  %v2098_v21 = vmul.f32 %v7719_v9, %v6311_v12 }
 0x2c3   : > { %v1787_v37 = vrot.slane %v1547_v33, 1  ;;  %v2100_v11 = vmul.f32 %v6311_v12, %v2004_v32  ;;  %v5171_v18 = vadd.f32 %v6417_v63, %v5095_v39  ;;  %v2335_v19 = vrot.slane %v2096_v15, 2  ;;  %v7964_v15 = vld [vmem:[#allocation2 + $0x288] sm:$0xff] }
 0x2c4   : > { %v1784_v61 = vsel %vm1668_vm3, %v1782_v51, %v1783_v34  ;;  %v2627_v35 = vmul.f32 %v7851_v46, %v6361_v55  ;;  %v5173_v0 = vadd.f32 %v6417_v63, %v5097_v20  ;;  %v2336_v26 = vrot.slane %v2098_v21, 2 }
 0x2c5   : > { %v1788_v8 = vsel %vm1668_vm3, %v1783_v34, %v1787_v37  ;;  %v1938_v1 = vadd.f32 %v1784_v61, %v1321_v45  ;;  %v5235_v58 = vmax.f32 %v5171_v18, 0.0  ;;  %v2340_v7 = vrot.slane %v2100_v11, 2  ;;  %v7962_v34 = vld [vmem:[#allocation2 + $0x278] sm:$0xff] }
 0x2c6   : > { %v1940_v9 = vadd.f32 %v1788_v8, %v1323_v10  ;;  %v2629_v13 = vmul.f32 %v7853_v25, %v6361_v55  ;;  %v5237_v49 = vmax.f32 %v5173_v0, 0.0  ;;  %v2337_v28 = vsel %vm2221_vm4, %v2335_v19, %v2336_v26  ;;  %v3309_v10 = vld [vmem:[#allocation2 + $0x268] sm:$0x3]  ;;  %v4060_v18 = vld [vmem:[#allocation2 + $0x278] sm:$0xfe] }
 0x2c7   : > { %v2849_v14 = vmul.f32 %v6371_v60, %v2755_v24  ;;  %v2851_v6 = vmul.f32 %v7853_v25, %v6371_v60  ;;  %v5299_v62 = vmin.f32 %v5235_v58, 6.0  ;;  %v2341_v45 = vsel %vm2221_vm4, %v2336_v26, %v2340_v7  ;;  %v4062_v61 = vld [vmem:[#allocation2 + $0x298] sm:$0x1]  ;;  %v4612_v8 = vld [vmem:[#allocation2 + $0x278] sm:$0xfc] }
 0x2c8   : > { %v2491_v29 = vadd.f32 %v2337_v28, %v1938_v1  ;;  %v2853_v31 = vmul.f32 %v6371_v60, %v2757_v22  ;;  %v5301_v43 = vmin.f32 %v5237_v49, 6.0  ;;  %v2493_v32 = vadd.f32 %v2341_v45, %v1940_v9  ;;  %v4614_v28 = vld [vmem:[#allocation2 + $0x298] sm:$0x3] }
 0x2c9   : > { %v3087_v54 = vrot.slane %v2849_v14, 1  ;;  %v3088_v50 = vrot.slane %v2851_v6, 1  ;;  %v3401_v39 = vmul.f32 %v6378_v3, %v3307_v42  ;;  %v3403_v51 = vmul.f32 %v7853_v25, %v6378_v3 }
 0x2ca   : > { %v2691_v38 = vadd.f32 %v2627_v35, %v2491_v29  ;;  %v3092_v33 = vrot.slane %v2853_v31, 1  ;;  %v5343_v20 = vpack.c.bf16 %v5301_v43, %v5299_v62  ;;  %v2693_v37 = vadd.f32 %v2629_v13, %v2493_v32 }
 0x2cb   : > { %v3089_v21 = vsel %vm1668_vm3, %v3087_v54, %v3088_v50  ;;  %v3405_v11 = vmul.f32 %v6378_v3, %v3309_v10  ;;  %v3639_v24 = vrot.slane %v3401_v39, 2  ;;  %v3640_v0 = vrot.slane %v3403_v51, 2 }
 0x2cc   : > { %v3093_v19 = vsel %vm1668_vm3, %v3088_v50, %v3092_v33  ;;  %v3243_v35 = vadd.f32 %v3089_v21, %v2691_v38  ;;  %5619 = vmatmul.mubr.bf16.gmra.mxu1 %v5343_v20  ;;  %v3932_v22 = vmul.f32 %v6404_v52, %v7962_v34  ;;  %v3934_v58 = vmul.f32 %v6404_v52, %v7964_v15  ;;  %v1448_v38 = vld [vmem:[#allocation2 + $0x210] sm:$0xfe]  ;;  %v1450_v33 = vld [vmem:[#allocation2 + $0x230] sm:$0x1] }
 0x2cd   : > { %v3245_v1 = vadd.f32 %v3093_v19, %v2693_v37  ;;  %v3644_v26 = vrot.slane %v3405_v11, 2  ;;  %v3641_v9 = vsel %vm2221_vm4, %v3639_v24, %v3640_v0  ;;  %v4154_v7 = vmul.f32 %v6407_v53, %v4060_v18  ;;  %v2001_v21 = vld [vmem:[#allocation2 + $0x210] sm:$0xfc] }
 0x2ce   : > { %v4156_v13 = vmul.f32 %v6407_v53, %v7964_v15  ;;  %v4158_v49 = vmul.f32 %v6407_v53, %v4062_v61  ;;  %v3795_v6 = vadd.f32 %v3641_v9, %v3243_v35  ;;  %v4706_v42 = vmul.f32 %v7737_v57, %v4612_v8  ;;  %v2003_v8 = vld [vmem:[#allocation2 + $0x230] sm:$0x3] }
 0x2cf   : > { %v3645_v14 = vsel %vm2221_vm4, %v3640_v0, %v3644_v26  ;;  %v4708_v62 = vmul.f32 %v7737_v57, %v7964_v15  ;;  %v4392_v29 = vrot.slane %v4154_v7, 1  ;;  %v4710_v32 = vmul.f32 %v7737_v57, %v4614_v28 }
 0x2d0   : > { %v3797_v45 = vadd.f32 %v3645_v14, %v3245_v1  ;;  %v4393_v31 = vrot.slane %v4156_v13, 1  ;;  %v4397_v10 = vrot.slane %v4158_v49, 1  ;;  %v3996_v43 = vadd.f32 %v3932_v22, %v3795_v6 }
 0x2d1   : > { %v4944_v54 = vrot.slane %v4706_v42, 2  ;;  %v4945_v50 = vrot.slane %v4708_v62, 2  ;;  %v1320_v37 = vmul.f32 %v7783_v59, %v6365_v56  ;;  %v4949_v61 = vrot.slane %v4710_v32, 2  ;;  %v2754_v42 = vld [vmem:[#allocation2 + $0x240] sm:$0xfe] }
 0x2d2   : > { %v3998_v39 = vadd.f32 %v3934_v58, %v3797_v45  ;;  %v4394_v51 = vsel %vm1668_vm3, %v4392_v29, %v4393_v31  ;;  %v4398_v20 = vsel %vm1668_vm3, %v4393_v31, %v4397_v10  ;;  %v1322_v57 = vmul.f32 %v7785_v23, %v6365_v56  ;;  %v2756_v31 = vld [vmem:[#allocation2 + $0x260] sm:$0x1] }
 0x2d3   : > { %v4548_v11 = vadd.f32 %v4394_v51, %v3996_v43  ;;  %v4946_v18 = vsel %vm2221_vm4, %v4944_v54, %v4945_v50  ;;  %v1542_v35 = vmul.f32 %v6333_v27, %v1448_v38  ;;  %v1544_v24 = vmul.f32 %v7785_v23, %v6333_v27 }
 0x2d4   : > { %v4550_v19 = vadd.f32 %v4398_v20, %v3998_v39  ;;  %v1546_v0 = vmul.f32 %v6333_v27, %v1450_v33  ;;  %v4950_v1 = vsel %vm2221_vm4, %v4945_v50, %v4949_v61  ;;  %v2095_v26 = vmul.f32 %v6348_v41, %v2001_v21  ;;  %v3306_v50 = vld [vmem:[#allocation2 + $0x240] sm:$0xfc]  ;;  %v3308_v61 = vld [vmem:[#allocation2 + $0x260] sm:$0x3] }
 0x2d5   : > { %v5100_v59 = vadd.f32 %v4946_v18, %v4548_v11  ;;  %v2097_v22 = vmul.f32 %v7785_v23, %v6348_v41  ;;  %v1779_v9 = vrot.slane %v1542_v35, 1  ;;  %v1780_v7 = vrot.slane %v1544_v24, 1  ;;  %v8014_v24 = vld [vmem:[#allocation2 + $0x270] sm:$0xff] }
 0x2d6   : > { %v5102_v58 = vadd.f32 %v4950_v1, %v4550_v19  ;;  %v1785_v13 = vrot.slane %v1546_v0, 1  ;;  %v2099_v28 = vmul.f32 %v6348_v41, %v2003_v8  ;;  %v2332_v14 = vrot.slane %v2095_v26, 2  ;;  %v8016_v26 = vld [vmem:[#allocation2 + $0x280] sm:$0xff] }
 0x2d7   : > { %v5176_v49 = vadd.f32 %v6420_v5, %v5100_v59  ;;  %v2333_v6 = vrot.slane %v2097_v22, 2  ;;  %v1781_v45 = vsel %vm1668_vm3, %v1779_v9, %v1780_v7  ;;  %v2626_v23 = vmul.f32 %v7905_v16, %v6355_v48 }
 0x2d8   : > { %v5178_v62 = vadd.f32 %v6420_v5, %v5102_v58  ;;  %v1786_v29 = vsel %vm1668_vm3, %v1780_v7, %v1785_v13  ;;  %v1937_v43 = vadd.f32 %v1781_v45, %v1320_v37  ;;  %v2338_v33 = vrot.slane %v2099_v28, 2  ;;  %v4059_v13 = vld [vmem:[#allocation2 + $0x270] sm:$0xfe] }
 0x2d9   : > { %v5240_v10 = vmax.f32 %v5176_v49, 0.0  ;;  %v1939_v32 = vadd.f32 %v1786_v29, %v1322_v57  ;;  %v2334_v54 = vsel %vm2221_vm4, %v2332_v14, %v2333_v6  ;;  %v2628_v39 = vmul.f32 %v7907_v47, %v6355_v48  ;;  %v4061_v49 = vld [vmem:[#allocation2 + $0x290] sm:$0x1] }
 0x2da   : > { %v5242_v38 = vmax.f32 %v5178_v62, 0.0  ;;  %v2848_v51 = vmul.f32 %v6397_v44, %v2754_v42  ;;  %v2490_v21 = vadd.f32 %v2334_v54, %v1937_v43  ;;  %v2850_v11 = vmul.f32 %v7907_v47, %v6397_v44  ;;  %v4611_v62 = vld [vmem:[#allocation2 + $0x270] sm:$0xfc] }
 0x2db   : > { %v5304_v20 = vmin.f32 %v5240_v10, 6.0  ;;  %v2852_v18 = vmul.f32 %v6397_v44, %v2756_v31  ;;  %v2339_v57 = vsel %vm2221_vm4, %v2333_v6, %v2338_v33  ;;  %v3400_v35 = vmul.f32 %v6412_v40, %v3306_v50  ;;  %v4613_v50 = vld [vmem:[#allocation2 + $0x290] sm:$0x3] }
 0x2dc   : > { %v5306_v37 = vmin.f32 %v5242_v38, 6.0  ;;  %v3084_v19 = vrot.slane %v2848_v51, 1  ;;  %v2492_v0 = vadd.f32 %v2339_v57, %v1939_v32  ;;  %v2690_v8 = vadd.f32 %v2626_v23, %v2490_v21 }
 0x2dd   : > { %v3085_v1 = vrot.slane %v2850_v11, 1  ;;  %v3090_v59 = vrot.slane %v2852_v18, 1  ;;  %v3402_v58 = vmul.f32 %v7907_v47, %v6412_v40  ;;  %v3404_v9 = vmul.f32 %v6412_v40, %v3308_v61 }
 0x2de   : > { %v5346_v22 = vpack.c.bf16 %v5306_v37, %v5304_v20  ;;  %v3636_v7 = vrot.slane %v3400_v35, 2  ;;  %v2692_v28 = vadd.f32 %v2628_v39, %v2492_v0  ;;  %v3931_v42 = vmul.f32 %v6393_v36, %v8014_v24  ;;  %v1453_v35 = vld [vmem:[#allocation2 + $0x248] sm:$0xfe] }
 0x2df   : > { %v3086_v14 = vsel %vm1668_vm3, %v3084_v19, %v3085_v1  ;;  %v3091_v6 = vsel %vm1668_vm3, %v3085_v1, %v3090_v59  ;;  %v3637_v29 = vrot.slane %v3402_v58, 2  ;;  %v3642_v23 = vrot.slane %v3404_v9, 2  ;;  %v2006_v58 = vld [vmem:[#allocation2 + $0x248] sm:$0xfc] }
 0x2e0   : > { %5841 = vmatprep.mubr.msk.bf16.mxu1 %vm735_vm1, %v5346_v22  ;;  %v3242_v45 = vadd.f32 %v3086_v14, %v2690_v8  ;;  %v3933_v31 = vmul.f32 %v6393_v36, %v8016_v26  ;;  %v3244_v10 = vadd.f32 %v3091_v6, %v2692_v28  ;;  %v4153_v43 = vmul.f32 %v6423_v4, %v4059_v13  ;;  %v1455_v22 = vld [vmem:[#allocation2 + $0x268] sm:$0x1] }
 0x2e1   : > { %v4155_v32 = vmul.f32 %v6423_v4, %v8016_v26  ;;  %v4157_v54 = vmul.f32 %v6423_v4, %v4061_v49  ;;  %v3638_v38 = vsel %vm2221_vm4, %v3636_v7, %v3637_v29  ;;  %v3643_v33 = vsel %vm2221_vm4, %v3637_v29, %v3642_v23 }
 0x2e2   : > { %v4705_v39 = vmul.f32 %v7804_v30, %v4611_v62  ;;  %v4707_v51 = vmul.f32 %v7804_v30, %v8016_v26  ;;  %v3794_v20 = vadd.f32 %v3638_v38, %v3242_v45  ;;  %v3796_v21 = vadd.f32 %v3643_v33, %v3244_v10 }
 0x2e3   : > { %v4389_v11 = vrot.slane %v4153_v43, 1  ;;  %v4390_v18 = vrot.slane %v4155_v32, 1  ;;  %v4395_v61 = vrot.slane %v4157_v54, 1  ;;  %v4709_v37 = vmul.f32 %v7804_v30, %v4613_v50 }
 0x2e4   : > { %v4941_v57 = vrot.slane %v4705_v39, 2  ;;  %v4942_v19 = vrot.slane %v4707_v51, 2  ;;  %v3995_v0 = vadd.f32 %v3931_v42, %v3794_v20  ;;  %v3997_v8 = vadd.f32 %v3933_v31, %v3796_v21  ;;  %v2008_v42 = vld [vmem:[#allocation2 + $0x268] sm:$0x3]  ;;  %v2759_v21 = vld [vmem:[#allocation2 + $0x278] sm:$0xfe] }
 0x2e5   : > { %v4391_v1 = vsel %vm1668_vm3, %v4389_v11, %v4390_v18  ;;  %v1325_v59 = vmul.f32 %v7851_v46, %v6323_v17  ;;  %v4396_v9 = vsel %vm1668_vm3, %v4390_v18, %v4395_v61  ;;  %v4947_v13 = vrot.slane %v4709_v37, 2  ;;  %v2761_v37 = vld [vmem:[#allocation2 + $0x298] sm:$0x1] }
 0x2e6   : > { %v4943_v7 = vsel %vm2221_vm4, %v4941_v57, %v4942_v19  ;;  %v1327_v30 = vmul.f32 %v7853_v25, %v6323_v17  ;;  %v4547_v49 = vadd.f32 %v4391_v1, %v3995_v0  ;;  %v4549_v28 = vadd.f32 %v4396_v9, %v3997_v8  ;;  %v3311_v8 = vld [vmem:[#allocation2 + $0x278] sm:$0xfc] }
 0x2e7   : > { %v1549_v14 = vmul.f32 %v6305_v2, %v1453_v35  ;;  %v1551_v6 = vmul.f32 %v7853_v25, %v6305_v2  ;;  %v4948_v46 = vsel %vm2221_vm4, %v4942_v19, %v4947_v13  ;;  %v1553_v62 = vmul.f32 %v6305_v2, %v1455_v22 }
 0x2e8   : > { %v2102_v45 = vmul.f32 %v6311_v12, %v2006_v58  ;;  %v2104_v29 = vmul.f32 %v7853_v25, %v6311_v12  ;;  %v5099_v23 = vadd.f32 %v4943_v7, %v4547_v49  ;;  %v5101_v31 = vadd.f32 %v4948_v46, %v4549_v28  ;;  %v3313_v28 = vld [vmem:[#allocation2 + $0x298] sm:$0x3] }
 0x2e9   : > { %v1792_v10 = vrot.slane %v1549_v14, 1  ;;  %v1793_v43 = vrot.slane %v1551_v6, 1  ;;  %v1797_v32 = vrot.slane %v1553_v62, 1  ;;  %v2106_v54 = vmul.f32 %v6311_v12, %v2008_v42  ;;  %v8068_v14 = vld [vmem:[#allocation2 + $0x2a8] sm:$0xff]  ;;  %v8071_v62 = vld [vmem:[#allocation2 + $0x2b8] sm:$0xff] }
 0x2ea   : > { %v2345_v50 = vrot.slane %v2102_v45, 2  ;;  %v2346_v38 = vrot.slane %v2104_v29, 2  ;;  %v5175_v33 = vadd.f32 %v6417_v63, %v5099_v23  ;;  %v5177_v39 = vadd.f32 %v6417_v63, %v5101_v31 }
 0x2eb   : > { %v1794_v51 = vsel %vm1668_vm3, %v1792_v10, %v1793_v43  ;;  %v2631_v20 = vmul.f32 %v7962_v34, %v6361_v55  ;;  %v1798_v25 = vsel %vm1668_vm3, %v1793_v43, %v1797_v32  ;;  %v2350_v61 = vrot.slane %v2106_v54, 2  ;;  %v4064_v10 = vld [vmem:[#allocation2 + $0x2a8] sm:$0xfe] }
 0x2ec   : > { %v1942_v11 = vadd.f32 %v1794_v51, %v1325_v59  ;;  %v2347_v18 = vsel %vm2221_vm4, %v2345_v50, %v2346_v38  ;;  %v5239_v57 = vmax.f32 %v5175_v33, 0.0  ;;  %v5241_v19 = vmax.f32 %v5177_v39, 0.0  ;;  %v4616_v33 = vld [vmem:[#allocation2 + $0x2a8] sm:$0xfc] }
 0x2ed   : > { %v1944_v35 = vadd.f32 %v1798_v25, %v1327_v30  ;;  %v2633_v0 = vmul.f32 %v7964_v15, %v6361_v55  ;;  %v2351_v1 = vsel %vm2221_vm4, %v2346_v38, %v2350_v61  ;;  %v2855_v58 = vmul.f32 %v6371_v60, %v2759_v21  ;;  %v4066_v38 = vld [vmem:[#allocation2 + $0x2c8] sm:$0x1] }
 0x2ee   : > { %v2495_v22 = vadd.f32 %v2347_v18, %v1942_v11  ;;  %v2857_v9 = vmul.f32 %v7964_v15, %v6371_v60  ;;  %v5303_v59 = vmin.f32 %v5239_v57, 6.0  ;;  %v5305_v7 = vmin.f32 %v5241_v19, 6.0 }
 0x2ef   : > { %v2497_v13 = vadd.f32 %v2351_v1, %v1944_v35  ;;  %v2859_v49 = vmul.f32 %v6371_v60, %v2761_v37  ;;  %v3097_v6 = vrot.slane %v2855_v58, 1  ;;  %v3407_v46 = vmul.f32 %v6378_v3, %v3311_v8  ;;  %v4618_v37 = vld [vmem:[#allocation2 + $0x2c8] sm:$0x3]  ;;  %v8090_v35 = vld [vmem:[%s8679_s3 + $0x18] ss:$0 sm:$0xff] }
 0x2f0   : > { %v2695_v30 = vadd.f32 %v2631_v20, %v2495_v22  ;;  %v3098_v42 = vrot.slane %v2857_v9, 1  ;;  %v5345_v45 = vpack.c.bf16 %v5305_v7, %v5303_v59  ;;  %v3409_v31 = vmul.f32 %v7964_v15, %v6378_v3 }
 0x2f1   : > { %v2697_v29 = vadd.f32 %v2633_v0, %v2497_v13  ;;  %v3102_v23 = vrot.slane %v2859_v49, 1  ;;  %v3411_v32 = vmul.f32 %v6378_v3, %v3313_v28  ;;  %v3649_v54 = vrot.slane %v3407_v46, 2  ;;  %v1452_v28 = vld [vmem:[#allocation2 + $0x240] sm:$0xfe] }
 0x2f2   : > { %v3099_v43 = vsel %vm1668_vm3, %v3097_v6, %v3098_v42  ;;  %v3936_v50 = vmul.f32 %v6404_v52, %v8068_v14  ;;  %5627 = vmatmul.mubr.bf16.gmra.mxu1 %v5345_v45  ;;  %v3650_v20 = vrot.slane %v3409_v31, 2  ;;  %v3938_v21 = vmul.f32 %v6404_v52, %v8071_v62  ;;  %v1454_v45 = vld [vmem:[#allocation2 + $0x260] sm:$0x1] }
 0x2f3   : > { %v3103_v39 = vsel %vm1668_vm3, %v3098_v42, %v3102_v23  ;;  %v3247_v51 = vadd.f32 %v3099_v43, %v2695_v30  ;;  %v3654_v11 = vrot.slane %v3411_v32, 2  ;;  %v4160_v18 = vmul.f32 %v6407_v53, %v4064_v10 }
 0x2f4   : > { %v3249_v25 = vadd.f32 %v3103_v39, %v2697_v29  ;;  %v4162_v61 = vmul.f32 %v6407_v53, %v8071_v62  ;;  %v3651_v57 = vsel %vm2221_vm4, %v3649_v54, %v3650_v20  ;;  %v4164_v19 = vmul.f32 %v6407_v53, %v4066_v38  ;;  %v2005_v29 = vld [vmem:[#allocation2 + $0x240] sm:$0xfc] }
 0x2f5   : > { %v4712_v0 = vmul.f32 %v8090_v35, %v4616_v33  ;;  %v4714_v8 = vmul.f32 %v8090_v35, %v8071_v62  ;;  %v3655_v1 = vsel %vm2221_vm4, %v3650_v20, %v3654_v11  ;;  %v3799_v22 = vadd.f32 %v3651_v57, %v3247_v51  ;;  %v2007_v33 = vld [vmem:[#allocation2 + $0x260] sm:$0x3] }
 0x2f6   : > { %v4402_v58 = vrot.slane %v4160_v18, 1  ;;  %v4403_v9 = vrot.slane %v4162_v61, 1  ;;  %v3801_v59 = vadd.f32 %v3655_v1, %v3249_v25  ;;  %v4407_v7 = vrot.slane %v4164_v19, 1 }
 0x2f7   : > { %v4716_v13 = vmul.f32 %v8090_v35, %v4618_v37  ;;  %v4954_v49 = vrot.slane %v4712_v0, 2  ;;  %v4000_v30 = vadd.f32 %v3936_v50, %v3799_v22  ;;  %v4955_v42 = vrot.slane %v4714_v8, 2 }
 0x2f8   : > { %v4404_v6 = vsel %vm1668_vm3, %v4402_v58, %v4403_v9  ;;  %v1324_v46 = vmul.f32 %v7905_v16, %v6365_v56  ;;  %v4002_v23 = vadd.f32 %v3938_v21, %v3801_v59  ;;  %v4408_v31 = vsel %vm1668_vm3, %v4403_v9, %v4407_v7  ;;  %v2758_v58 = vld [vmem:[#allocation2 + $0x270] sm:$0xfe] }
 0x2f9   : > { %v4959_v10 = vrot.slane %v4716_v13, 2  ;;  %v1326_v43 = vmul.f32 %v7907_v47, %v6365_v56  ;;  %v4552_v32 = vadd.f32 %v4404_v6, %v4000_v30  ;;  %v4956_v54 = vsel %vm2221_vm4, %v4954_v49, %v4955_v42  ;;  %v2760_v13 = vld [vmem:[#allocation2 + $0x290] sm:$0x1] }
 0x2fa   : > { %v1548_v50 = vmul.f32 %v6333_v27, %v1452_v28  ;;  %v1550_v38 = vmul.f32 %v7907_v47, %v6333_v27  ;;  %v4554_v39 = vadd.f32 %v4408_v31, %v4002_v23  ;;  %v1552_v51 = vmul.f32 %v6333_v27, %v1454_v45 }
 0x2fb   : > { %v4960_v16 = vsel %vm2221_vm4, %v4955_v42, %v4959_v10  ;;  %v2101_v20 = vmul.f32 %v6348_v41, %v2005_v29  ;;  %v5104_v21 = vadd.f32 %v4956_v54, %v4552_v32  ;;  %v2103_v18 = vmul.f32 %v7907_v47, %v6348_v41  ;;  %v3310_v42 = vld [vmem:[#allocation2 + $0x270] sm:$0xfc] }
 0x2fc   : > { %v1789_v25 = vrot.slane %v1548_v50, 1  ;;  %v1790_v11 = vrot.slane %v1550_v38, 1  ;;  %v5106_v61 = vadd.f32 %v4960_v16, %v4554_v39  ;;  %v1795_v37 = vrot.slane %v1552_v51, 1  ;;  %v8127_v50 = vld [vmem:[#allocation2 + $0x2a0] sm:$0xff]  ;;  %v8130_v51 = vld [vmem:[#allocation2 + $0x2b0] sm:$0xff] }
 0x2fd   : > { %v2105_v57 = vmul.f32 %v6348_v41, %v2007_v33  ;;  %v2342_v19 = vrot.slane %v2101_v20, 2  ;;  %v5180_v0 = vadd.f32 %v6420_v5, %v5104_v21  ;;  %v2343_v1 = vrot.slane %v2103_v18, 2  ;;  %v4063_v18 = vld [vmem:[#allocation2 + $0x2a0] sm:$0xfe] }
 0x2fe   : > { %v1791_v8 = vsel %vm1668_vm3, %v1789_v25, %v1790_v11  ;;  %v2630_v22 = vmul.f32 %v8014_v24, %v6355_v48  ;;  %v5182_v9 = vadd.f32 %v6420_v5, %v5106_v61  ;;  %v1796_v59 = vsel %vm1668_vm3, %v1790_v11, %v1795_v37 }
 0x2ff   : > { %v1941_v7 = vadd.f32 %v1791_v8, %v1324_v46  ;;  %v2348_v47 = vrot.slane %v2105_v57, 2  ;;  %v5244_v49 = vmax.f32 %v5180_v0, 0.0  ;;  %v1943_v28 = vadd.f32 %v1796_v59, %v1326_v43  ;;  %v3312_v43 = vld [vmem:[#allocation2 + $0x290] sm:$0x3]  ;;  %v4065_v0 = vld [vmem:[#allocation2 + $0x2c0] sm:$0x1] }
 0x300   : > { %v2344_v30 = vsel %vm2221_vm4, %v2342_v19, %v2343_v1  ;;  %v2632_v6 = vmul.f32 %v8016_v26, %v6355_v48  ;;  %v5246_v45 = vmax.f32 %v5182_v9, 0.0  ;;  %v2854_v31 = vmul.f32 %v6397_v44, %v2758_v58  ;;  %v4615_v8 = vld [vmem:[#allocation2 + $0x2a0] sm:$0xfc] }
 0x301   : > { %v2349_v29 = vsel %vm2221_vm4, %v2343_v1, %v2348_v47  ;;  %v2494_v23 = vadd.f32 %v2344_v30, %v1941_v7  ;;  %v5308_v10 = vmin.f32 %v5244_v49, 6.0  ;;  %v2856_v46 = vmul.f32 %v8016_v26, %v6397_v44  ;;  %v4617_v49 = vld [vmem:[#allocation2 + $0x2c0] sm:$0x3] }
 0x302   : > { %v2496_v32 = vadd.f32 %v2349_v29, %v1943_v28  ;;  %v2858_v54 = vmul.f32 %v6397_v44, %v2760_v13  ;;  %v5310_v38 = vmin.f32 %v5246_v45, 6.0  ;;  %v3094_v39 = vrot.slane %v2854_v31, 1 }
 0x303   : > { %v2694_v33 = vadd.f32 %v2630_v22, %v2494_v23  ;;  %v3406_v16 = vmul.f32 %v6412_v40, %v3310_v42  ;;  %v3095_v21 = vrot.slane %v2856_v46, 1  ;;  %v3408_v11 = vmul.f32 %v8016_v26, %v6412_v40  ;;  %v8150_v42 = vld [vmem:[%s8679_s3 + $0x10] ss:$0 sm:$0xff] }
 0x304   : > { %v2696_v20 = vadd.f32 %v2632_v6, %v2496_v32  ;;  %v3100_v25 = vrot.slane %v2858_v54, 1  ;;  %v5348_v61 = vpack.c.bf16 %v5310_v38, %v5308_v10  ;;  %v3410_v37 = vmul.f32 %v6412_v40, %v3312_v43  ;;  %v1457_v38 = vld [vmem:[#allocation2 + $0x278] sm:$0xfe] }
 0x305   : > { %v3646_v57 = vrot.slane %v3406_v16, 2  ;;  %v3935_v19 = vmul.f32 %v6393_v36, %v8127_v50  ;;  %v3096_v1 = vsel %vm1668_vm3, %v3094_v39, %v3095_v21  ;;  %v3647_v58 = vrot.slane %v3408_v11, 2 }
 0x306   : > { %v3101_v22 = vsel %vm1668_vm3, %v3095_v21, %v3100_v25  ;;  %v3937_v9 = vmul.f32 %v6393_v36, %v8130_v51  ;;  %5842 = vmatprep.mubr.msk.bf16.mxu1 %vm735_vm1, %v5348_v61  ;;  %v3246_v59 = vadd.f32 %v3096_v1, %v2694_v33  ;;  %v3652_v47 = vrot.slane %v3410_v37, 2  ;;  %v1459_v21 = vld [vmem:[#allocation2 + $0x298] sm:$0x1]  ;;  %v2010_v37 = vld [vmem:[#allocation2 + $0x278] sm:$0xfc] }
 0x307   : > { %v3248_v7 = vadd.f32 %v3101_v22, %v2696_v20  ;;  %v4159_v13 = vmul.f32 %v6423_v4, %v4063_v18  ;;  %v3648_v28 = vsel %vm2221_vm4, %v3646_v57, %v3647_v58  ;;  %v4161_v30 = vmul.f32 %v6423_v4, %v8130_v51  ;;  %v2012_v1 = vld [vmem:[#allocation2 + $0x298] sm:$0x3]  ;;  %v8165_v22 = vpop.f32.mrf.mxu0 }
 0x308   : > { %v4163_v6 = vmul.f32 %v6423_v4, %v4065_v0  ;;  %v4711_v45 = vmul.f32 %v8150_v42, %v4615_v8  ;;  %v3653_v29 = vsel %vm2221_vm4, %v3647_v58, %v3652_v47  ;;  %v3798_v23 = vadd.f32 %v3648_v28, %v3246_v59 }
 0x309   : > { %v4399_v31 = vrot.slane %v4159_v13, 1  ;;  %v4713_v10 = vmul.f32 %v8150_v42, %v8130_v51  ;;  %v3800_v32 = vadd.f32 %v3653_v29, %v3248_v7  ;;  %v4400_v46 = vrot.slane %v4161_v30, 1  ;;  %v5542_v30 = vpop.f32.mrf.mxu0 }
 0x30a   : > { %v4405_v54 = vrot.slane %v4163_v6, 1  ;;  %v4715_v43 = vmul.f32 %v8150_v42, %v4617_v49  ;;  %v3999_v33 = vadd.f32 %v3935_v19, %v3798_v23  ;;  %v4951_v39 = vrot.slane %v4711_v45, 2 }
 0x30b   : > { %v4952_v16 = vrot.slane %v4713_v10, 2  ;;  %v1329_v20 = vmul.f32 %v7962_v34, %v6323_v17  ;;  %v4001_v25 = vadd.f32 %v3937_v9, %v3800_v32  ;;  %v4401_v11 = vsel %vm1668_vm3, %v4399_v31, %v4400_v46  ;;  %v8167_v34 = vpop.f32.mrf.mxu1 }
 0x30c   : > { %v4406_v18 = vsel %vm1668_vm3, %v4400_v46, %v4405_v54  ;;  %v4957_v61 = vrot.slane %v4715_v43, 2  ;;  %v4551_v57 = vadd.f32 %v4401_v11, %v3999_v33  ;;  %v1331_v8 = vmul.f32 %v7964_v15, %v6323_v17  ;;  %v2763_v43 = vld [vmem:[#allocation2 + $0x2a8] sm:$0xfe] }
 0x30d   : > { %v4953_v0 = vsel %vm2221_vm4, %v4951_v39, %v4952_v16  ;;  %v1555_v19 = vmul.f32 %v6305_v2, %v1457_v38  ;;  %v4553_v58 = vadd.f32 %v4406_v18, %v4001_v25  ;;  %v1557_v59 = vmul.f32 %v7964_v15, %v6305_v2  ;;  %v5558_v6 = vpop.f32.mrf.mxu1  ;;  %v8180_v38 = vpop.f32.mrf.mxu0 }
 0x30e   : > { %v4958_v9 = vsel %vm2221_vm4, %v4952_v16, %v4957_v61  ;;  %v1559_v7 = vmul.f32 %v6305_v2, %v1459_v21  ;;  %v5103_v47 = vadd.f32 %v4953_v0, %v4551_v57  ;;  %v2108_v49 = vmul.f32 %v6311_v12, %v2010_v37  ;;  %v2765_v37 = vld [vmem:[#allocation2 + $0x2c8] sm:$0x1]  ;;  %v3315_v57 = vld [vmem:[#allocation2 + $0x2a8] sm:$0xfc] }
 0x30f   : > { %v1802_v13 = vrot.slane %v1555_v19, 1  ;;  %v2110_v28 = vmul.f32 %v7964_v15, %v6311_v12  ;;  %v5105_v45 = vadd.f32 %v4958_v9, %v4553_v58  ;;  %v1803_v29 = vrot.slane %v1557_v59, 1  ;;  %v8182_v33 = vpop.f32.mrf.mxu1  ;;  %v5545_v0 = vpop.f32.mrf.mxu0 }
 0x310   : > { %v1807_v23 = vrot.slane %v1559_v7, 1  ;;  %v2112_v31 = vmul.f32 %v6311_v12, %v2012_v1  ;;  %v5179_v10 = vadd.f32 %v6417_v63, %v5103_v47  ;;  %v2355_v32 = vrot.slane %v2108_v49, 2 }
 0x311   : > { %v2356_v46 = vrot.slane %v2110_v28, 2  ;;  %v2635_v54 = vmul.f32 %v8068_v14, %v6361_v55  ;;  %v5181_v15 = vadd.f32 %v6417_v63, %v5105_v45  ;;  %v1804_v39 = vsel %vm1668_vm3, %v1802_v13, %v1803_v29  ;;  %v5561_v19 = vpop.f32.mrf.mxu1  ;;  %v8194_v49 = vpop.f32.mrf.mxu0 }
 0x312   : > { %v1808_v16 = vsel %vm1668_vm3, %v1803_v29, %v1807_v23  ;;  %v2360_v21 = vrot.slane %v2112_v31, 2  ;;  %v5243_v25 = vmax.f32 %v5179_v10, 0.0  ;;  %v1946_v11 = vadd.f32 %v1804_v39, %v1329_v20  ;;  %v8200_v23 = vld [vmem:[#allocation2 + $0x2d8] sm:$0xff]  ;;  %v8202_v31 = vld [vmem:[#allocation2 + $0x2e8] sm:$0xff] }
 0x313   : > { %v1948_v18 = vadd.f32 %v1808_v16, %v1331_v8  ;;  %v2357_v61 = vsel %vm2221_vm4, %v2355_v32, %v2356_v46  ;;  %v5245_v1 = vmax.f32 %v5181_v15, 0.0  ;;  %v2637_v9 = vmul.f32 %v8071_v62, %v6361_v55  ;;  %v3317_v8 = vld [vmem:[#allocation2 + $0x2c8] sm:$0x3]  ;;  %v8196_v28 = vpop.f32.mrf.mxu1  ;;  %v4068_v15 = vld [vmem:[#allocation2 + $0x2d8] sm:$0xfe]  ;;  %v5550_v39 = vpop.f32.mrf.mxu0 }
 0x314   : > { %v2361_v58 = vsel %vm2221_vm4, %v2356_v46, %v2360_v21  ;;  %v2861_v59 = vmul.f32 %v6371_v60, %v2763_v43  ;;  %v5307_v7 = vmin.f32 %v5243_v25, 6.0  ;;  %v2499_v47 = vadd.f32 %v2357_v61, %v1946_v11  ;;  %v4070_v61 = vld [vmem:[#allocation2 + $0x2f8] sm:$0x1]  ;;  %v4620_v19 = vld [vmem:[#allocation2 + $0x2d8] sm:$0xfc] }
 0x315   : > { %v2501_v13 = vadd.f32 %v2361_v58, %v1948_v18  ;;  %v2863_v20 = vmul.f32 %v8071_v62, %v6371_v60  ;;  %v5309_v30 = vmin.f32 %v5245_v1, 6.0  ;;  %v2865_v6 = vmul.f32 %v6371_v60, %v2765_v37  ;;  %v5566_v16 = vpop.f32.mrf.mxu1  ;;  %v8212_v1 = vpop.f32.mrf.mxu0 }
 0x316   : > { %v3107_v45 = vrot.slane %v2861_v59, 1  ;;  %v3413_v29 = vmul.f32 %v6378_v3, %v3315_v57  ;;  %v2699_v10 = vadd.f32 %v2635_v54, %v2499_v47  ;;  %v3415_v43 = vmul.f32 %v8071_v62, %v6378_v3 }
 0x317   : > { %v2701_v32 = vadd.f32 %v2637_v9, %v2501_v13  ;;  %v3108_v46 = vrot.slane %v2863_v20, 1  ;;  %v5347_v21 = vpack.c.bf16 %v5309_v30, %v5307_v7  ;;  %v3112_v25 = vrot.slane %v2865_v6, 1  ;;  %v8214_v58 = vpop.f32.mrf.mxu1  ;;  %v4622_v6 = vld [vmem:[#allocation2 + $0x2f8] sm:$0x3] }
 0x318   : > { %v3417_v11 = vmul.f32 %v6378_v3, %v3317_v8  ;;  %v3659_v18 = vrot.slane %v3413_v29, 2  ;;  %v3660_v57 = vrot.slane %v3415_v43, 2  ;;  %v3940_v54 = vmul.f32 %v6404_v52, %v8200_v23 }
 0x319   : > { %v3109_v37 = vsel %vm1668_vm3, %v3107_v45, %v3108_v46  ;;  %v3942_v0 = vmul.f32 %v6404_v52, %v8202_v31  ;;  %5635 = vmatmul.mubr.bf16.gmra.mxu1 %v5347_v21  ;;  %v3113_v9 = vsel %vm1668_vm3, %v3108_v46, %v3112_v25  ;;  %v4166_v47 = vmul.f32 %v6407_v53, %v4068_v15  ;;  %v5553_v45 = vpop.f32.mrf.mxu0  ;;  %v5569_v29 = vpop.f32.mrf.mxu1  ;;  %v1456_v25 = vld [vmem:[#allocation2 + $0x270] sm:$0xfe] }
 0x31a   : > { %v3251_v59 = vadd.f32 %v3109_v37, %v2699_v10  ;;  %v3664_v7 = vrot.slane %v3417_v11, 2  ;;  %v3253_v13 = vadd.f32 %v3113_v9, %v2701_v32  ;;  %v3661_v20 = vsel %vm2221_vm4, %v3659_v18, %v3660_v57  ;;  %v1458_v9 = vld [vmem:[#allocation2 + $0x290] sm:$0x1] }
 0x31b   : > { %v4168_v8 = vmul.f32 %v6407_v53, %v8202_v31  ;;  %v4170_v30 = vmul.f32 %v6407_v53, %v4070_v61  ;;  %v4412_v16 = vrot.slane %v4166_v47, 1  ;;  %v4718_v10 = vmul.f32 %v8090_v35, %v4620_v19  ;;  %v8226_v11 = vpop.f32.mrf.mxu1 }
 0x31c   : > { %v3665_v43 = vsel %vm2221_vm4, %v3660_v57, %v3664_v7  ;;  %v3803_v39 = vadd.f32 %v3661_v20, %v3251_v59  ;;  %v4720_v32 = vmul.f32 %v8090_v35, %v8202_v31  ;;  %v4722_v61 = vmul.f32 %v8090_v35, %v4622_v6 }
 0x31d   : > { %v3805_v46 = vadd.f32 %v3665_v43, %v3253_v13  ;;  %v4413_v21 = vrot.slane %v4168_v8, 1  ;;  %v4417_v15 = vrot.slane %v4170_v30, 1  ;;  %v4964_v37 = vrot.slane %v4718_v10, 2  ;;  %v2009_v13 = vld [vmem:[#allocation2 + $0x270] sm:$0xfc]  ;;  %v5574_v20 = vpop.f32.mrf.mxu1 }
 0x31e   : > { %v4004_v18 = vadd.f32 %v3940_v54, %v3803_v39  ;;  %v1328_v57 = vmul.f32 %v8014_v24, %v6365_v56  ;;  %v4965_v47 = vrot.slane %v4720_v32, 2  ;;  %v4969_v30 = vrot.slane %v4722_v61, 2  ;;  %v2011_v43 = vld [vmem:[#allocation2 + $0x290] sm:$0x3] }
 0x31f   : > { %v4006_v59 = vadd.f32 %v3942_v0, %v3805_v46  ;;  %v4414_v19 = vsel %vm1668_vm3, %v4412_v16, %v4413_v21  ;;  %v4418_v7 = vsel %vm1668_vm3, %v4413_v21, %v4417_v15  ;;  %v1330_v54 = vmul.f32 %v8016_v26, %v6365_v56  ;;  %v8240_v39 = vpop.f32.mrf.mxu1 }
 0x320   : > { %v4556_v8 = vadd.f32 %v4414_v19, %v4004_v18  ;;  %v1554_v6 = vmul.f32 %v6333_v27, %v1456_v25  ;;  %v4966_v29 = vsel %vm2221_vm4, %v4964_v37, %v4965_v47  ;;  %v1556_v24 = vmul.f32 %v8016_v26, %v6333_v27  ;;  %8684 = vst [vmem:[#allocation3_spill] sm:$0xff] %v8240_v39 }
 0x321   : > { %v4558_v45 = vadd.f32 %v4418_v7, %v4006_v59  ;;  %v1558_v0 = vmul.f32 %v6333_v27, %v1458_v9  ;;  %v4970_v16 = vsel %vm2221_vm4, %v4965_v47, %v4969_v30  ;;  %v2107_v21 = vmul.f32 %v6348_v41, %v2009_v13  ;;  %v5577_v61 = vpop.f32.mrf.mxu1  ;;  %v2762_v7 = vld [vmem:[#allocation2 + $0x2a0] sm:$0xfe] }
 0x322   : > { %v5108_v10 = vadd.f32 %v4966_v29, %v4556_v8  ;;  %v1799_v46 = vrot.slane %v1554_v6, 1  ;;  %v1800_v32 = vrot.slane %v1556_v24, 1  ;;  %v2109_v18 = vmul.f32 %v8016_v26, %v6348_v41  ;;  %v2764_v24 = vld [vmem:[#allocation2 + $0x2c0] sm:$0x1] }
 0x323   : > { %v5110_v15 = vadd.f32 %v4970_v16, %v4558_v45  ;;  %v1805_v25 = vrot.slane %v1558_v0, 1  ;;  %v2111_v9 = vmul.f32 %v6348_v41, %v2011_v43  ;;  %v2352_v59 = vrot.slane %v2107_v21, 2  ;;  %v8253_v30 = vpop.f32.mrf.mxu1  ;;  %v3314_v21 = vld [vmem:[#allocation2 + $0x2a0] sm:$0xfc] }
 0x324   : > { %v5184_v37 = vadd.f32 %v6420_v5, %v5108_v10  ;;  %v2634_v19 = vmul.f32 %v8127_v50, %v6355_v48  ;;  %v1801_v13 = vsel %vm1668_vm3, %v1799_v46, %v1800_v32  ;;  %v2353_v8 = vrot.slane %v2109_v18, 2  ;;  %8685 = vst [vmem:[#allocation4_spill] sm:$0xff] %v8253_v30  ;;  %v1461_v30 = vld [vmem:[#allocation2 + $0x2a8] sm:$0xfe] }
 0x325   : > { %v5186_v47 = vadd.f32 %v6420_v5, %v5110_v15  ;;  %v1806_v20 = vsel %vm1668_vm3, %v1800_v32, %v1805_v25  ;;  %v1945_v6 = vadd.f32 %v1801_v13, %v1328_v57  ;;  %v2358_v29 = vrot.slane %v2111_v9, 2  ;;  %v5582_v46 = vpop.f32.mrf.mxu1 }
 0x326   : > { %v5248_v26 = vmax.f32 %v5184_v37, 0.0  ;;  %v1947_v45 = vadd.f32 %v1806_v20, %v1330_v54  ;;  %v2354_v43 = vsel %vm2221_vm4, %v2352_v59, %v2353_v8  ;;  %v2636_v16 = vmul.f32 %v8130_v51, %v6355_v48  ;;  %v3316_v54 = vld [vmem:[#allocation2 + $0x2c0] sm:$0x3]  ;;  %v8263_v59 = vld [vmem:[#allocation2 + $0x2d0] sm:$0xff] }
 0x327   : > { %v5250_v0 = vmax.f32 %v5186_v47, 0.0  ;;  %v2860_v10 = vmul.f32 %v6397_v44, %v2762_v7  ;;  %v2359_v32 = vsel %vm2221_vm4, %v2353_v8, %v2358_v29  ;;  %v2498_v25 = vadd.f32 %v2354_v43, %v1945_v6  ;;  %v8265_v47 = vpop.f32.mrf.mxu1 }
 0x328   : > { %v5312_v15 = vmin.f32 %v5248_v26, 6.0  ;;  %v2862_v57 = vmul.f32 %v8130_v51, %v6397_v44  ;;  %v2500_v61 = vadd.f32 %v2359_v32, %v1947_v45  ;;  %v2864_v37 = vmul.f32 %v6397_v44, %v2764_v24  ;;  %8686 = vst [vmem:[#allocation5_spill] sm:$0xff] %v8265_v47  ;;  %v8270_v26 = vld [vmem:[#allocation2 + $0x2e0] sm:$0xff]  ;;  %v4067_v24 = vld [vmem:[#allocation2 + $0x2d0] sm:$0xfe] }
 0x329   : > { %v5314_v18 = vmin.f32 %v5250_v0, 6.0  ;;  %v3104_v9 = vrot.slane %v2860_v10, 1  ;;  %v2698_v7 = vadd.f32 %v2634_v19, %v2498_v25  ;;  %v3412_v20 = vmul.f32 %v6412_v40, %v3314_v21  ;;  %v5585_v43 = vpop.f32.mrf.mxu1  ;;  %v4069_v21 = vld [vmem:[#allocation2 + $0x2f0] sm:$0x1]  ;;  %v4619_v25 = vld [vmem:[#allocation2 + $0x2d0] sm:$0xfc] }
 0x32a   : > { %v3105_v13 = vrot.slane %v2862_v57, 1  ;;  %v3414_v8 = vmul.f32 %v8130_v51, %v6412_v40  ;;  %v2700_v29 = vadd.f32 %v2636_v16, %v2500_v61  ;;  %v3110_v0 = vrot.slane %v2864_v37, 1 }
 0x32b   : > { %v5350_v6 = vpack.c.bf16 %v5314_v18, %v5312_v15  ;;  %v3416_v45 = vmul.f32 %v6412_v40, %v3316_v54  ;;  %v3656_v46 = vrot.slane %v3412_v20, 2  ;;  %v3939_v19 = vmul.f32 %v6393_v36, %v8263_v59  ;;  %v8280_v18 = vpop.f32.mrf.mxu1 }
 0x32c   : > { %v3106_v10 = vsel %vm1668_vm3, %v3104_v9, %v3105_v13  ;;  %v3657_v32 = vrot.slane %v3414_v8, 2  ;;  %v3111_v57 = vsel %vm1668_vm3, %v3105_v13, %v3110_v0  ;;  %v3941_v54 = vmul.f32 %v6393_v36, %v8270_v26  ;;  %8687 = vst [vmem:[#allocation6_spill] sm:$0xff] %v8280_v18  ;;  %v4621_v8 = vld [vmem:[#allocation2 + $0x2f0] sm:$0x3] }
 0x32d   : > { %5843 = vmatprep.mubr.msk.bf16.mxu1 %vm735_vm1, %v5350_v6  ;;  %v3250_v15 = vadd.f32 %v3106_v10, %v2698_v7  ;;  %v3662_v16 = vrot.slane %v3416_v45, 2  ;;  %v3252_v61 = vadd.f32 %v3111_v57, %v2700_v29  ;;  %v4165_v9 = vmul.f32 %v6423_v4, %v4067_v24  ;;  %v5590_v0 = vpop.f32.mrf.mxu1 }
 0x32e   : > { %v3658_v37 = vsel %vm2221_vm4, %v3656_v46, %v3657_v32  ;;  %v4167_v20 = vmul.f32 %v6423_v4, %v8270_v26  ;;  %v4169_v7 = vmul.f32 %v6423_v4, %v4069_v21  ;;  %v4717_v13 = vmul.f32 %v8150_v42, %v4619_v25 }
 0x32f   : > { %v3663_v6 = vsel %vm2221_vm4, %v3657_v32, %v3662_v16  ;;  %v3802_v43 = vadd.f32 %v3658_v37, %v3250_v15  ;;  %v4409_v10 = vrot.slane %v4165_v9, 1  ;;  %v4719_v29 = vmul.f32 %v8150_v42, %v8270_v26  ;;  %v8292_v39 = vpop.f32.mrf.mxu1  ;;  %v1463_v16 = vld [vmem:[#allocation2 + $0x2c8] sm:$0x1] }
 0x330   : > { %v3804_v45 = vadd.f32 %v3663_v6, %v3252_v61  ;;  %v4410_v18 = vrot.slane %v4167_v20, 1  ;;  %v4415_v24 = vrot.slane %v4169_v7, 1  ;;  %v4721_v57 = vmul.f32 %v8150_v42, %v4621_v8  ;;  %8688 = vst [vmem:[#allocation7_spill] sm:$0xff] %v8292_v39  ;;  %v2014_v61 = vld [vmem:[#allocation2 + $0x2a8] sm:$0xfc] }
 0x331   : > { %v4003_v46 = vadd.f32 %v3939_v19, %v3802_v43  ;;  %v4961_v47 = vrot.slane %v4717_v13, 2  ;;  %v4962_v15 = vrot.slane %v4719_v29, 2  ;;  %v1333_v25 = vmul.f32 %v8068_v14, %v6323_v17  ;;  %v5593_v8 = vpop.f32.mrf.mxu1  ;;  %v2016_v13 = vld [vmem:[#allocation2 + $0x2c8] sm:$0x3] }
 0x332   : > { %v4005_v32 = vadd.f32 %v3941_v54, %v3804_v45  ;;  %v4411_v21 = vsel %vm1668_vm3, %v4409_v10, %v4410_v18  ;;  %v4416_v37 = vsel %vm1668_vm3, %v4410_v18, %v4415_v24  ;;  %v4967_v19 = vrot.slane %v4721_v57, 2 }
 0x333   : > { %v4555_v9 = vadd.f32 %v4411_v21, %v4003_v46  ;;  %v1335_v20 = vmul.f32 %v8071_v62, %v6323_v17  ;;  %v4963_v43 = vsel %vm2221_vm4, %v4961_v47, %v4962_v15  ;;  %v1561_v54 = vmul.f32 %v6305_v2, %v1461_v30  ;;  %v8307_v10 = vpop.f32.mrf.mxu1 }
 0x334   : > { %v4557_v6 = vadd.f32 %v4416_v37, %v4005_v32  ;;  %v1563_v7 = vmul.f32 %v8071_v62, %v6305_v2  ;;  %v4968_v14 = vsel %vm2221_vm4, %v4962_v15, %v4967_v19  ;;  %v1565_v18 = vmul.f32 %v6305_v2, %v1463_v16  ;;  %8689 = vst [vmem:[#allocation8_spill] sm:$0xff] %v8307_v10  ;;  %v2767_v19 = vld [vmem:[#allocation2 + $0x2d8] sm:$0xfe] }
 0x335   : > { %v5107_v0 = vadd.f32 %v4963_v43, %v4555_v9  ;;  %v2114_v45 = vmul.f32 %v6311_v12, %v2014_v61  ;;  %v1812_v46 = vrot.slane %v1561_v54, 1  ;;  %v2116_v47 = vmul.f32 %v8071_v62, %v6311_v12  ;;  %v5598_v15 = vpop.f32.mrf.mxu1  ;;  %v2769_v54 = vld [vmem:[#allocation2 + $0x2f8] sm:$0x1] }
 0x336   : > { %v5109_v29 = vadd.f32 %v4968_v14, %v4557_v6  ;;  %v1813_v24 = vrot.slane %v1563_v7, 1  ;;  %v1817_v57 = vrot.slane %v1565_v18, 1  ;;  %v2118_v32 = vmul.f32 %v6311_v12, %v2016_v13  ;;  %v3321_v15 = vld [vmem:[#allocation2 + $0x2f8] sm:$0x3] }
 0x337   : > { %v5183_v30 = vadd.f32 %v6417_v63, %v5107_v0  ;;  %v2365_v21 = vrot.slane %v2114_v45, 2  ;;  %v2366_v61 = vrot.slane %v2116_v47, 2  ;;  %v2639_v9 = vmul.f32 %v8200_v23, %v6361_v55  ;;  %v8318_v7 = vpop.f32.mrf.mxu1  ;;  %v3319_v45 = vld [vmem:[#allocation2 + $0x2d8] sm:$0xfc] }
 0x338   : > { %v5185_v37 = vadd.f32 %v6417_v63, %v5109_v29  ;;  %v1814_v16 = vsel %vm1668_vm3, %v1812_v46, %v1813_v24  ;;  %v1818_v6 = vsel %vm1668_vm3, %v1813_v24, %v1817_v57  ;;  %v2370_v43 = vrot.slane %v2118_v32, 2  ;;  %8690 = vst [vmem:[#allocation9_spill] sm:$0xff] %v8318_v7 }
 0x339   : > { %v5247_v8 = vmax.f32 %v5183_v30, 0.0  ;;  %v1950_v62 = vadd.f32 %v1814_v16, %v1333_v25  ;;  %v1952_v14 = vadd.f32 %v1818_v6, %v1335_v20  ;;  %v2367_v0 = vsel %vm2221_vm4, %v2365_v21, %v2366_v61  ;;  %v5601_v24 = vpop.f32.mrf.mxu1  ;;  %v8328_v21 = vld [vmem:[#allocation2 + $0x308] sm:$0xff]  ;;  %v8333_v6 = vld [vmem:[#allocation2 + $0x318] sm:$0xff] }
 0x33a   : > { %v5249_v13 = vmax.f32 %v5185_v37, 0.0  ;;  %v2641_v18 = vmul.f32 %v8202_v31, %v6361_v55  ;;  %v2371_v46 = vsel %vm2221_vm4, %v2366_v61, %v2370_v43  ;;  %v2867_v30 = vmul.f32 %v6371_v60, %v2767_v19  ;;  %v4072_v19 = vld [vmem:[#allocation2 + $0x308] sm:$0xfe] }
 0x33b   : > { %v5311_v29 = vmin.f32 %v5247_v8, 6.0  ;;  %v2503_v47 = vadd.f32 %v2367_v0, %v1950_v62  ;;  %v2505_v57 = vadd.f32 %v2371_v46, %v1952_v14  ;;  %v2869_v32 = vmul.f32 %v8202_v31, %v6371_v60  ;;  %v8335_v62 = vpop.f32.mrf.mxu1 }
 0x33c   : > { %v5313_v25 = vmin.f32 %v5249_v13, 6.0  ;;  %v2871_v20 = vmul.f32 %v6371_v60, %v2769_v54  ;;  %v3117_v16 = vrot.slane %v2867_v30, 1  ;;  %v3419_v8 = vmul.f32 %v6378_v3, %v3319_v45  ;;  %8691 = vst [vmem:[#allocation10_spill] sm:$0xff] %v8335_v62  ;;  %v4074_v45 = vld [vmem:[#allocation2 + $0x328] sm:$0x1] }
 0x33d   : > { %v2703_v37 = vadd.f32 %v2639_v9, %v2503_v47  ;;  %v3421_v61 = vmul.f32 %v8202_v31, %v6378_v3  ;;  %v2705_v13 = vadd.f32 %v2641_v18, %v2505_v57  ;;  %v3118_v14 = vrot.slane %v2869_v32, 1  ;;  %v4624_v47 = vld [vmem:[#allocation2 + $0x308] sm:$0xfc]  ;;  %v5606_v30 = vpop.f32.mrf.mxu1 }
 0x33e   : > { %v5349_v43 = vpack.c.bf16 %v5313_v25, %v5311_v29  ;;  %v3122_v0 = vrot.slane %v2871_v20, 1  ;;  %v3423_v54 = vmul.f32 %v6378_v3, %v3321_v15  ;;  %v3669_v46 = vrot.slane %v3419_v8, 2  ;;  %v4626_v25 = vld [vmem:[#allocation2 + $0x328] sm:$0x3] }
 0x33f   : > { %v3670_v24 = vrot.slane %v3421_v61, 2  ;;  %v3944_v9 = vmul.f32 %v6404_v52, %v8328_v21  ;;  %v3119_v7 = vsel %vm1668_vm3, %v3117_v16, %v3118_v14  ;;  %v3946_v18 = vmul.f32 %v6404_v52, %v8333_v6  ;;  %v8346_v8 = vpop.f32.mrf.mxu1 }
 0x340   : > { %5643 = vmatmul.mubr.bf16.gmra.mxu1 %v5349_v43  ;;  %v3123_v10 = vsel %vm1668_vm3, %v3118_v14, %v3122_v0  ;;  %v4172_v29 = vmul.f32 %v6407_v53, %v4072_v19  ;;  %v3255_v57 = vadd.f32 %v3119_v7, %v2703_v37  ;;  %v3674_v15 = vrot.slane %v3423_v54, 2  ;;  %8692 = vst [vmem:[#allocation11_spill] sm:$0xff] %v8346_v8  ;;  %v1460_v8 = vld [vmem:[#allocation2 + $0x2a0] sm:$0xfe] }
 0x341   : > { %v3257_v32 = vadd.f32 %v3123_v10, %v2705_v13  ;;  %v3671_v20 = vsel %vm2221_vm4, %v3669_v46, %v3670_v24  ;;  %v4174_v61 = vmul.f32 %v6407_v53, %v8333_v6  ;;  %v4176_v16 = vmul.f32 %v6407_v53, %v4074_v45  ;;  %v5609_v37 = vpop.f32.mrf.mxu1 }
 0x342   : > { %v4422_v43 = vrot.slane %v4172_v29, 1  ;;  %v4724_v14 = vmul.f32 %v8090_v35, %v4624_v47  ;;  %v3675_v0 = vsel %vm2221_vm4, %v3670_v24, %v3674_v15  ;;  %v3807_v30 = vadd.f32 %v3671_v20, %v3255_v57  ;;  %v1462_v29 = vld [vmem:[#allocation2 + $0x2c0] sm:$0x1]  ;;  %v2013_v24 = vld [vmem:[#allocation2 + $0x2a0] sm:$0xfc] }
 0x343   : > { %v4726_v7 = vmul.f32 %v8090_v35, %v8333_v6  ;;  %v4728_v10 = vmul.f32 %v8090_v35, %v4626_v25  ;;  %v3809_v19 = vadd.f32 %v3675_v0, %v3257_v32  ;;  %v4423_v13 = vrot.slane %v4174_v61, 1  ;;  %v2015_v25 = vld [vmem:[#allocation2 + $0x2c0] sm:$0x3] }
 0x344   : > { %v4427_v54 = vrot.slane %v4176_v16, 1  ;;  %v4974_v46 = vrot.slane %v4724_v14, 2  ;;  %v4008_v62 = vadd.f32 %v3944_v9, %v3807_v30  ;;  %v1332_v47 = vmul.f32 %v8127_v50, %v6365_v56 }
 0x345   : > { %v4975_v39 = vrot.slane %v4726_v7, 2  ;;  %v4979_v45 = vrot.slane %v4728_v10, 2  ;;  %v4010_v57 = vadd.f32 %v3946_v18, %v3809_v19  ;;  %v4424_v20 = vsel %vm1668_vm3, %v4422_v43, %v4423_v13 }
 0x346   : > { %v4428_v15 = vsel %vm1668_vm3, %v4423_v13, %v4427_v54  ;;  %v1334_v35 = vmul.f32 %v8130_v51, %v6365_v56  ;;  %v4560_v32 = vadd.f32 %v4424_v20, %v4008_v62  ;;  %v1560_v16 = vmul.f32 %v6333_v27, %v1460_v8  ;;  %v2768_v20 = vld [vmem:[#allocation2 + $0x2f0] sm:$0x1] }
 0x347   : > { %v4976_v61 = vsel %vm2221_vm4, %v4974_v46, %v4975_v39  ;;  %v4980_v9 = vsel %vm2221_vm4, %v4975_v39, %v4979_v45  ;;  %v4562_v14 = vadd.f32 %v4428_v15, %v4010_v57  ;;  %v1562_v50 = vmul.f32 %v8130_v51, %v6333_v27  ;;  %v2766_v45 = vld [vmem:[#allocation2 + $0x2d0] sm:$0xfe] }
 0x348   : > { %v1564_v18 = vmul.f32 %v6333_v27, %v1462_v29  ;;  %v2113_v43 = vmul.f32 %v6348_v41, %v2013_v24  ;;  %v5112_v0 = vadd.f32 %v4976_v61, %v4560_v32  ;;  %v1809_v30 = vrot.slane %v1560_v16, 1 }
 0x349   : > { %v2115_v7 = vmul.f32 %v8130_v51, %v6348_v41  ;;  %v2117_v62 = vmul.f32 %v6348_v41, %v2015_v25  ;;  %v5114_v10 = vadd.f32 %v4980_v9, %v4562_v14  ;;  %v1810_v37 = vrot.slane %v1562_v50, 1  ;;  %v3318_v9 = vld [vmem:[#allocation2 + $0x2d0] sm:$0xfc] }
 0x34a   : > { %v1815_v39 = vrot.slane %v1564_v18, 1  ;;  %v2362_v19 = vrot.slane %v2113_v43, 2  ;;  %v5188_v8 = vadd.f32 %v6420_v5, %v5112_v0  ;;  %v2638_v46 = vmul.f32 %v8263_v59, %v6355_v48 }
 0x34b   : > { %v2363_v13 = vrot.slane %v2115_v7, 2  ;;  %v2368_v54 = vrot.slane %v2117_v62, 2  ;;  %v5190_v29 = vadd.f32 %v6420_v5, %v5114_v10  ;;  %v1811_v24 = vsel %vm1668_vm3, %v1809_v30, %v1810_v37  ;;  %v3320_v62 = vld [vmem:[#allocation2 + $0x2f0] sm:$0x3] }
 0x34c   : > { %v1816_v51 = vsel %vm1668_vm3, %v1810_v37, %v1815_v39  ;;  %v2640_v57 = vmul.f32 %v8270_v26, %v6355_v48  ;;  %v5252_v15 = vmax.f32 %v5188_v8, 0.0  ;;  %v1949_v25 = vadd.f32 %v1811_v24, %v1332_v47  ;;  %v8387_v39 = vld [vmem:[#allocation2 + $0x300] sm:$0xff] }
 0x34d   : > { %v1951_v32 = vadd.f32 %v1816_v51, %v1334_v35  ;;  %v2364_v61 = vsel %vm2221_vm4, %v2362_v19, %v2363_v13  ;;  %v5254_v16 = vmax.f32 %v5190_v29, 0.0  ;;  %v2369_v14 = vsel %vm2221_vm4, %v2363_v13, %v2368_v54  ;;  %v4071_v29 = vld [vmem:[#allocation2 + $0x300] sm:$0xfe] }
 0x34e   : > { %v2866_v50 = vmul.f32 %v6397_v44, %v2766_v45  ;;  %v2868_v18 = vmul.f32 %v8270_v26, %v6397_v44  ;;  %v5316_v43 = vmin.f32 %v5252_v15, 6.0  ;;  %v2502_v0 = vadd.f32 %v2364_v61, %v1949_v25  ;;  %v8391_v45 = vld [vmem:[#allocation2 + $0x310] sm:$0xff]  ;;  %v4073_v25 = vld [vmem:[#allocation2 + $0x320] sm:$0x1] }
 0x34f   : > { %v2504_v30 = vadd.f32 %v2369_v14, %v1951_v32  ;;  %v2870_v7 = vmul.f32 %v6397_v44, %v2768_v20  ;;  %v5318_v10 = vmin.f32 %v5254_v16, 6.0  ;;  %v3418_v37 = vmul.f32 %v6412_v40, %v3318_v9  ;;  %v4623_v32 = vld [vmem:[#allocation2 + $0x300] sm:$0xfc] }
 0x350   : > { %v3114_v47 = vrot.slane %v2866_v50, 1  ;;  %v3115_v35 = vrot.slane %v2868_v18, 1  ;;  %v2702_v19 = vadd.f32 %v2638_v46, %v2502_v0  ;;  %v3420_v54 = vmul.f32 %v8270_v26, %v6412_v40 }
 0x351   : > { %v2704_v8 = vadd.f32 %v2640_v57, %v2504_v30  ;;  %v3120_v13 = vrot.slane %v2870_v7, 1  ;;  %v5352_v24 = vpack.c.bf16 %v5318_v10, %v5316_v43  ;;  %v3422_v20 = vmul.f32 %v6412_v40, %v3320_v62  ;;  %v4625_v43 = vld [vmem:[#allocation2 + $0x320] sm:$0x3] }
 0x352   : > { %v3116_v51 = vsel %vm1668_vm3, %v3114_v47, %v3115_v35  ;;  %v3666_v15 = vrot.slane %v3418_v37, 2  ;;  %v3667_v46 = vrot.slane %v3420_v54, 2  ;;  %v3943_v57 = vmul.f32 %v6393_v36, %v8387_v39 }
 0x353   : > { %v3121_v61 = vsel %vm1668_vm3, %v3115_v35, %v3120_v13  ;;  %v3254_v9 = vadd.f32 %v3116_v51, %v2702_v19  ;;  %5844 = vmatprep.mubr.msk.bf16.mxu1 %vm735_vm1, %v5352_v24  ;;  %v3672_v14 = vrot.slane %v3422_v20, 2  ;;  %v3945_v50 = vmul.f32 %v6393_v36, %v8391_v45 }
 0x354   : > { %v3256_v16 = vadd.f32 %v3121_v61, %v2704_v8  ;;  %v4171_v18 = vmul.f32 %v6423_v4, %v4071_v29  ;;  %v3668_v0 = vsel %vm2221_vm4, %v3666_v15, %v3667_v46  ;;  %v4173_v30 = vmul.f32 %v6423_v4, %v8391_v45  ;;  %v1465_v29 = vld [vmem:[#allocation2 + $0x2d8] sm:$0xfe] }
 0x355   : > { %v4175_v7 = vmul.f32 %v6423_v4, %v4073_v25  ;;  %v4723_v62 = vmul.f32 %v8150_v42, %v4623_v32  ;;  %v3673_v10 = vsel %vm2221_vm4, %v3667_v46, %v3672_v14  ;;  %v3806_v47 = vadd.f32 %v3668_v0, %v3254_v9  ;;  %v1467_v25 = vld [vmem:[#allocation2 + $0x2f8] sm:$0x1]  ;;  %v2018_v14 = vld [vmem:[#allocation2 + $0x2d8] sm:$0xfc] }
 0x356   : > { %v4419_v35 = vrot.slane %v4171_v18, 1  ;;  %v4725_v37 = vmul.f32 %v8150_v42, %v8391_v45  ;;  %v3808_v19 = vadd.f32 %v3673_v10, %v3256_v16  ;;  %v4420_v8 = vrot.slane %v4173_v30, 1 }
 0x357   : > { %v4425_v13 = vrot.slane %v4175_v7, 1  ;;  %v4727_v54 = vmul.f32 %v8150_v42, %v4625_v43  ;;  %v4007_v24 = vadd.f32 %v3943_v57, %v3806_v47  ;;  %v4971_v51 = vrot.slane %v4723_v62, 2  ;;  %v2020_v43 = vld [vmem:[#allocation2 + $0x2f8] sm:$0x3] }
 0x358   : > { %v4972_v20 = vrot.slane %v4725_v37, 2  ;;  %v1337_v15 = vmul.f32 %v8200_v23, %v6323_v17  ;;  %v4009_v32 = vadd.f32 %v3945_v50, %v3808_v19  ;;  %v4421_v61 = vsel %vm1668_vm3, %v4419_v35, %v4420_v8 }
 0x359   : > { %v4426_v9 = vsel %vm1668_vm3, %v4420_v8, %v4425_v13  ;;  %v4977_v46 = vrot.slane %v4727_v54, 2  ;;  %v4559_v16 = vadd.f32 %v4421_v61, %v4007_v24  ;;  %v1339_v42 = vmul.f32 %v8202_v31, %v6323_v17 }
 0x35a   : > { %v4973_v18 = vsel %vm2221_vm4, %v4971_v51, %v4972_v20  ;;  %v1567_v57 = vmul.f32 %v6305_v2, %v1465_v29  ;;  %v4561_v0 = vadd.f32 %v4426_v9, %v4009_v32  ;;  %v1569_v50 = vmul.f32 %v8202_v31, %v6305_v2  ;;  %v2773_v9 = vld [vmem:[#allocation2 + $0x328] sm:$0x1] }
 0x35b   : > { %v4978_v23 = vsel %vm2221_vm4, %v4972_v20, %v4977_v46  ;;  %v1571_v30 = vmul.f32 %v6305_v2, %v1467_v25  ;;  %v5111_v7 = vadd.f32 %v4973_v18, %v4559_v16  ;;  %v2120_v10 = vmul.f32 %v6311_v12, %v2018_v14  ;;  %v2771_v2 = vld [vmem:[#allocation2 + $0x308] sm:$0xfe] }
 0x35c   : > { %v1822_v62 = vrot.slane %v1567_v57, 1  ;;  %v2122_v47 = vmul.f32 %v8202_v31, %v6311_v12  ;;  %v5113_v35 = vadd.f32 %v4978_v23, %v4561_v0  ;;  %v1823_v17 = vrot.slane %v1569_v50, 1  ;;  %v3323_v46 = vld [vmem:[#allocation2 + $0x308] sm:$0xfc] }
 0x35d   : > { %v1827_v37 = vrot.slane %v1571_v30, 1  ;;  %v2124_v19 = vmul.f32 %v6311_v12, %v2020_v43  ;;  %v5187_v8 = vadd.f32 %v6417_v63, %v5111_v7  ;;  %v2375_v13 = vrot.slane %v2120_v10, 2  ;;  %v3878_v10 = vld [vmem:[#allocation2 + $0x348] sm:$0xff] }
 0x35e   : > { %v2376_v54 = vrot.slane %v2122_v47, 2  ;;  %v2643_v29 = vmul.f32 %v8328_v21, %v6361_v55  ;;  %v5189_v24 = vadd.f32 %v6417_v63, %v5113_v35  ;;  %v1824_v51 = vsel %vm1668_vm3, %v1822_v62, %v1823_v17  ;;  %v3876_v62 = vld [vmem:[#allocation2 + $0x338] sm:$0xff] }
 0x35f   : > { %v1828_v20 = vsel %vm1668_vm3, %v1823_v17, %v1827_v37  ;;  %v2380_v31 = vrot.slane %v2124_v19, 2  ;;  %v5251_v25 = vmax.f32 %v5187_v8, 0.0  ;;  %v1954_v32 = vadd.f32 %v1824_v51, %v1337_v15  ;;  %v3325_v15 = vld [vmem:[#allocation2 + $0x328] sm:$0x3]  ;;  %v4076_v37 = vld [vmem:[#allocation2 + $0x338] sm:$0xfe] }
 0x360   : > { %v1956_v61 = vadd.f32 %v1828_v20, %v1339_v42  ;;  %v2377_v12 = vsel %vm2221_vm4, %v2375_v13, %v2376_v54  ;;  %v5253_v14 = vmax.f32 %v5189_v24, 0.0  ;;  %v2645_v21 = vmul.f32 %v8333_v6, %v6361_v55 }
 0x361   : > { %v2381_v16 = vsel %vm2221_vm4, %v2376_v54, %v2380_v31  ;;  %v2873_v18 = vmul.f32 %v6371_v60, %v2771_v2  ;;  %v5315_v57 = vmin.f32 %v5251_v25, 6.0  ;;  %v2507_v43 = vadd.f32 %v2377_v12, %v1954_v32  ;;  %v4628_v31 = vld [vmem:[#allocation2 + $0x338] sm:$0xfc] }
 0x362   : > { %v2509_v0 = vadd.f32 %v2381_v16, %v1956_v61  ;;  %v2875_v23 = vmul.f32 %v8333_v6, %v6371_v60  ;;  %v5317_v42 = vmin.f32 %v5253_v14, 6.0  ;;  %v2877_v50 = vmul.f32 %v6371_v60, %v2773_v9  ;;  %v4078_v60 = vld [vmem:[#allocation2 + $0x358] sm:$0x1] }
 0x363   : > { %v3127_v30 = vrot.slane %v2873_v18, 1  ;;  %v3425_v7 = vmul.f32 %v6378_v3, %v3323_v46  ;;  %v2707_v47 = vadd.f32 %v2643_v29, %v2507_v43  ;;  %v3427_v17 = vmul.f32 %v8333_v6, %v6378_v3  ;;  %v4630_v16 = vld [vmem:[#allocation2 + $0x358] sm:$0x3] }
 0x364   : > { %v2709_v35 = vadd.f32 %v2645_v21, %v2509_v0  ;;  %v3128_v55 = vrot.slane %v2875_v23, 1  ;;  %v8444_v19 = vpop.f32.mrf.mxu1  ;;  %v5351_v8 = vpack.c.bf16 %v5317_v42, %v5315_v57  ;;  %v3132_v13 = vrot.slane %v2877_v50, 1  ;;  %v5910_v43 = vld [vmem:[%s8679_s3 + $0x18] ss:$0 sm:$0xff] }
 0x365   : > { %v3429_v54 = vmul.f32 %v6378_v3, %v3325_v15  ;;  %v3679_v2 = vrot.slane %v3425_v7, 2  ;;  %v3680_v51 = vrot.slane %v3427_v17, 2  ;;  %v3948_v20 = vmul.f32 %v6404_v52, %v3876_v62 }
 0x366   : > { %v3129_v24 = vsel %vm1668_vm3, %v3127_v30, %v3128_v55  ;;  %v3950_v29 = vmul.f32 %v6404_v52, %v3878_v10  ;;  %v5614_v25 = vpop.f32.mrf.mxu1  ;;  %5651 = vmatmul.mubr.bf16.gmra.mxu1 %v5351_v8  ;;  %v3133_v6 = vsel %vm1668_vm3, %v3128_v55, %v3132_v13  ;;  %v4178_v12 = vmul.f32 %v6407_v53, %v4076_v37  ;;  %v1464_v30 = vld [vmem:[#allocation2 + $0x2d0] sm:$0xfe]  ;;  %v1466_v55 = vld [vmem:[#allocation2 + $0x2f0] sm:$0x1] }
 0x367   : > { %v3259_v32 = vadd.f32 %v3129_v24, %v2707_v47  ;;  %v3684_v61 = vrot.slane %v3429_v54, 2  ;;  %v3261_v9 = vadd.f32 %v3133_v6, %v2709_v35  ;;  %v3681_v3 = vsel %vm2221_vm4, %v3679_v2, %v3680_v51  ;;  %v2017_v54 = vld [vmem:[#allocation2 + $0x2d0] sm:$0xfc] }
 0x368   : > { %v4180_v46 = vmul.f32 %v6407_v53, %v3878_v10  ;;  %v4182_v14 = vmul.f32 %v6407_v53, %v4078_v60  ;;  %v8455_v21 = vpop.f32.mrf.mxu1  ;;  %v4432_v57 = vrot.slane %v4178_v12, 1  ;;  %v4730_v0 = vmul.f32 %v5910_v43, %v4628_v31  ;;  %v2019_v31 = vld [vmem:[#allocation2 + $0x2f0] sm:$0x3] }
 0x369   : > { %v3685_v52 = vsel %vm2221_vm4, %v3680_v51, %v3684_v61  ;;  %v3811_v18 = vadd.f32 %v3681_v3, %v3259_v32  ;;  %v4732_v50 = vmul.f32 %v5910_v43, %v3878_v10  ;;  %v4734_v53 = vmul.f32 %v5910_v43, %v4630_v16 }
 0x36a   : > { %v3813_v23 = vadd.f32 %v3685_v52, %v3261_v9  ;;  %v4433_v15 = vrot.slane %v4180_v46, 1  ;;  %v4437_v42 = vrot.slane %v4182_v14, 1  ;;  %v5617_v7 = vpop.f32.mrf.mxu1  ;;  %v4984_v47 = vrot.slane %v4730_v0, 2  ;;  %v2770_v52 = vld [vmem:[#allocation2 + $0x300] sm:$0xfe] }
 0x36b   : > { %v4012_v62 = vadd.f32 %v3948_v20, %v3811_v18  ;;  %v1336_v35 = vmul.f32 %v8263_v59, %v6365_v56  ;;  %v4985_v13 = vrot.slane %v4732_v50, 2  ;;  %v4989_v60 = vrot.slane %v4734_v53, 2  ;;  %v2772_v50 = vld [vmem:[#allocation2 + $0x320] sm:$0x1] }
 0x36c   : > { %v4014_v17 = vadd.f32 %v3950_v29, %v3813_v23  ;;  %v4434_v37 = vsel %vm1668_vm3, %v4432_v57, %v4433_v15  ;;  %v4438_v8 = vsel %vm1668_vm3, %v4433_v15, %v4437_v42  ;;  %v1338_v10 = vmul.f32 %v8270_v26, %v6365_v56 }
 0x36d   : > { %v4564_v2 = vadd.f32 %v4434_v37, %v4012_v62  ;;  %v1566_v24 = vmul.f32 %v6333_v27, %v1464_v30  ;;  %v4986_v20 = vsel %vm2221_vm4, %v4984_v47, %v4985_v13  ;;  %v1568_v59 = vmul.f32 %v8270_v26, %v6333_v27  ;;  %v3322_v62 = vld [vmem:[#allocation2 + $0x300] sm:$0xfc] }
 0x36e   : > { %v4566_v51 = vadd.f32 %v4438_v8, %v4014_v17  ;;  %v1570_v29 = vmul.f32 %v6333_v27, %v1466_v55  ;;  %v4990_v25 = vsel %vm2221_vm4, %v4985_v13, %v4989_v60  ;;  %v2119_v61 = vmul.f32 %v6348_v41, %v2017_v54 }
 0x36f   : > { %v5116_v6 = vadd.f32 %v4986_v20, %v4564_v2  ;;  %v1819_v32 = vrot.slane %v1566_v24, 1  ;;  %v1820_v9 = vrot.slane %v1568_v59, 1  ;;  %v2121_v3 = vmul.f32 %v8270_v26, %v6348_v41 }
 0x370   : > { %v5118_v12 = vadd.f32 %v4990_v25, %v4566_v51  ;;  %v1825_v56 = vrot.slane %v1570_v29, 1  ;;  %v2123_v14 = vmul.f32 %v6348_v41, %v2019_v31  ;;  %v2372_v16 = vrot.slane %v2119_v61, 2  ;;  %v4077_v29 = vld [vmem:[#allocation2 + $0x350] sm:$0x1]  ;;  %v4627_v61 = vld [vmem:[#allocation2 + $0x330] sm:$0xfc] }
 0x371   : > { %v5192_v46 = vadd.f32 %v6420_v5, %v5116_v6  ;;  %v2642_v27 = vmul.f32 %v8387_v39, %v6355_v48  ;;  %v1821_v57 = vsel %vm1668_vm3, %v1819_v32, %v1820_v9  ;;  %v2373_v0 = vrot.slane %v2121_v3, 2 }
 0x372   : > { %v5194_v18 = vadd.f32 %v6420_v5, %v5118_v12  ;;  %v1826_v43 = vsel %vm1668_vm3, %v1820_v9, %v1825_v56  ;;  %v1953_v15 = vadd.f32 %v1821_v57, %v1336_v35  ;;  %v2378_v26 = vrot.slane %v2123_v14, 2  ;;  %v3324_v35 = vld [vmem:[#allocation2 + $0x320] sm:$0x3]  ;;  %v5912_v57 = vld [vmem:[%s8679_s3 + $0x10] ss:$0 sm:$0xff] }
 0x373   : > { %v5256_v23 = vmax.f32 %v5192_v46, 0.0  ;;  %v1955_v42 = vadd.f32 %v1826_v43, %v1338_v10  ;;  %v2374_v41 = vsel %vm2221_vm4, %v2372_v16, %v2373_v0  ;;  %v2644_v7 = vmul.f32 %v8391_v45, %v6355_v48  ;;  %v4075_v10 = vld [vmem:[#allocation2 + $0x330] sm:$0xfe] }
 0x374   : > { %v5258_v30 = vmax.f32 %v5194_v18, 0.0  ;;  %v2872_v39 = vmul.f32 %v6397_v44, %v2770_v52  ;;  %v2379_v53 = vsel %vm2221_vm4, %v2373_v0, %v2378_v26  ;;  %v2506_v47 = vadd.f32 %v2374_v41, %v1953_v15  ;;  %v4629_v16 = vld [vmem:[#allocation2 + $0x350] sm:$0x3] }
 0x375   : > { %v5320_v5 = vmin.f32 %v5256_v23, 6.0  ;;  %v2874_v55 = vmul.f32 %v8391_v45, %v6397_v44  ;;  %v2508_v37 = vadd.f32 %v2379_v53, %v1955_v42  ;;  %v2876_v8 = vmul.f32 %v6397_v44, %v2772_v50  ;;  %v5911_v44 = vld [vmem:[#allocation2] sm:$0xff] }
 0x376   : > { %v5322_v17 = vmin.f32 %v5258_v30, 6.0  ;;  %v3124_v13 = vrot.slane %v2872_v39, 1  ;;  %v2706_v54 = vadd.f32 %v2642_v27, %v2506_v47  ;;  %v3424_v48 = vmul.f32 %v6412_v40, %v3322_v62  ;;  %v5913_v47 = vld [vmem:[%s6025_s14] sm:$0xff] }
 0x377   : > { %v3125_v2 = vrot.slane %v2874_v55, 1  ;;  %v3426_v60 = vmul.f32 %v8391_v45, %v6412_v40  ;;  %v2708_v51 = vadd.f32 %v2644_v7, %v2508_v37  ;;  %v3130_v20 = vrot.slane %v2876_v8, 1 }
 0x378   : > { %v5354_v24 = vpack.c.bf16 %v5322_v17, %v5320_v5  ;;  %v3428_v59 = vmul.f32 %v6412_v40, %v3324_v35  ;;  %v3676_v25 = vrot.slane %v3424_v48, 2  ;;  %v3947_v32 = vmul.f32 %v5911_v44, %v6393_v36  ;;  %v8506_v36 = vld [vmem:[%s8682_s6] ss:$0 sm:$0xff] }
 0x379   : > { %v3126_v31 = vsel %vm1668_vm3, %v3124_v13, %v3125_v2  ;;  %v3677_v6 = vrot.slane %v3426_v60, 2  ;;  %v3131_v12 = vsel %vm1668_vm3, %v3125_v2, %v3130_v20  ;;  %v4177_v56 = vmul.f32 %v6423_v4, %v4075_v10  ;;  %v5914_v2 = vld [vmem:[%s6025_s14 + $0x8] sm:$0xff]  ;;  %v5915_v10 = vld [vmem:[%s6025_s14 + $0x10] sm:$0xff] }
 0x37a   : > { %5845 = vmatprep.mubr.msk.bf16.mxu1 %vm735_vm1, %v5354_v24  ;;  %v3258_v45 = vadd.f32 %v3126_v31, %v2706_v54  ;;  %v3682_v9 = vrot.slane %v3428_v59, 2  ;;  %v3260_v3 = vadd.f32 %v3131_v12, %v2708_v51  ;;  %v4179_v46 = vmul.f32 %v5911_v44, %v6423_v4  ;;  %v5916_v24 = vld [vmem:[%s6025_s14 + $0x18] sm:$0xff]  ;;  %v5917_v59 = vld [vmem:[%s6025_s14 + $0x20] sm:$0xff] }
 0x37b   : > { %v3678_v40 = vsel %vm2221_vm4, %v3676_v25, %v3677_v6  ;;  %v4181_v14 = vmul.f32 %v6423_v4, %v4077_v29  ;;  %v4429_v18 = vrot.slane %v4177_v56, 1  ;;  %v4729_v43 = vmul.f32 %v5912_v57, %v4627_v61  ;;  %v5920_v12 = vld [vmem:[%s6025_s14 + $0x38] sm:$0xff] }
 0x37c   : > { %v3683_v27 = vsel %vm2221_vm4, %v3677_v6, %v3682_v9  ;;  %v3810_v52 = vadd.f32 %v3678_v40, %v3258_v45  ;;  %v4430_v23 = vrot.slane %v4179_v46, 1  ;;  %v4731_v15 = vmul.f32 %v5912_v57, %v5911_v44  ;;  %v8694_v9 = vld [vmem:[#allocation4_spill] sm:$0xff] }
 0x37d   : > { %v3812_v0 = vadd.f32 %v3683_v27, %v3260_v3  ;;  %v4435_v4 = vrot.slane %v4181_v14, 1  ;;  %v4733_v26 = vmul.f32 %v5912_v57, %v4629_v16  ;;  %v4981_v50 = vrot.slane %v4729_v43, 2  ;;  %v5922_v46 = vld [vmem:[%s6025_s14 + $0x48] sm:$0xff]  ;;  %v8695_v16 = vld [vmem:[#allocation5_spill] sm:$0xff]  ;;  %v8696_v43 = vld [vmem:[#allocation6_spill] sm:$0xff] }
 0x37e   : > { %v4011_v42 = vadd.f32 %v3947_v32, %v3810_v52  ;;  %v5541_v30 = vadd.f32 %v8506_v36, %v8165_v22  ;;  %v4431_v7 = vsel %vm1668_vm3, %v4429_v18, %v4430_v23  ;;  %v4982_v62 = vrot.slane %v4731_v15, 2  ;;  %v5923_v18 = vld [vmem:[%s6025_s14 + $0x50] sm:$0xff] }
 0x37f   : > { %v4013_v41 = vadd.f32 %v3947_v32, %v3812_v0  ;;  %v4436_v39 = vsel %vm1668_vm3, %v4430_v23, %v4435_v4  ;;  %v4987_v53 = vrot.slane %v4733_v26, 2  ;;  %v5544_v55 = vadd.f32 %v8506_v36, %v8180_v38  ;;  %v8693_v32 = vld [vmem:[#allocation3_spill] sm:$0xff] }
 0x380   : > { %v4563_v5 = vadd.f32 %v4431_v7, %v4011_v42  ;;  %v5667_v22 = vadd.f32 %v5913_v47, %v5541_v30  ;;  %v4983_v17 = vsel %vm2221_vm4, %v4981_v50, %v4982_v62  ;;  %v5549_v37 = vadd.f32 %v8506_v36, %v8194_v49  ;;  %v8697_v23 = vld [vmem:[#allocation7_spill] sm:$0xff]  ;;  %v5924_v42 = vld [vmem:[%s6025_s14 + $0x58] sm:$0xff]  ;;  %v8698_v50 = vld [vmem:[#allocation8_spill] sm:$0xff] }
 0x381   : > { %v4565_v35 = vadd.f32 %v4436_v39, %v4013_v41  ;;  %v5552_v8 = vadd.f32 %v8506_v36, %v8212_v1  ;;  %v4988_v13 = vsel %vm2221_vm4, %v4982_v62, %v4987_v53  ;;  %v5668_v48 = vadd.f32 %v5914_v2, %v5544_v55  ;;  %v8699_v41 = vld [vmem:[#allocation9_spill] sm:$0xff]  ;;  %v5925_v39 = vld [vmem:[%s6025_s14 + $0x60] sm:$0xff]  ;;  %v8700_v47 = vld [vmem:[#allocation10_spill] sm:$0xff] }
 0x382   : > { %v5115_v54 = vadd.f32 %v4983_v17, %v4563_v5  ;;  %5699 = vst.msk [vmem:[%s8521_s18] sm:$0xff] %vm364_vm0, %v5667_v22  ;;  %v5557_v38 = vadd.f32 %v8506_v36, %v8167_v34  ;;  %v5669_v49 = vadd.f32 %v5915_v10, %v5549_v37  ;;  %v5560_v1 = vadd.f32 %v8506_v36, %v8182_v33  ;;  %v5918_v33 = vld [vmem:[%s6025_s14 + $0x28] sm:$0xff]  ;;  %v8701_v55 = vld [vmem:[#allocation11_spill] sm:$0xff]  ;;  %v5927_v37 = vld [vmem:[%s6025_s14 + $0x70] sm:$0xff] }
 0x383   : > { %v5117_v60 = vadd.f32 %v4988_v13, %v4565_v35  ;;  %v5670_v51 = vadd.f32 %v5916_v24, %v5552_v8  ;;  %5700 = vst.msk [vmem:[%s8521_s18 + $0x8] sm:$0xff] %vm364_vm0, %v5668_v48  ;;  %v5565_v34 = vadd.f32 %v8506_v36, %v8196_v28  ;;  %v5568_v31 = vadd.f32 %v8506_v36, %v8214_v58  ;;  %v5926_v5 = vld [vmem:[%s6025_s14 + $0x68] sm:$0xff]  ;;  %v5928_v13 = vld [vmem:[%s6025_s14 + $0x78] sm:$0xff]  ;;  %v5929_v48 = vld [vmem:[%s6025_s14 + $0x80] sm:$0xff] }
 0x384   : > { %v5191_v20 = vadd.f32 %v6417_v63, %v5115_v54  ;;  %v5671_v29 = vadd.f32 %v5917_v59, %v5557_v38  ;;  %5701 = vst.msk [vmem:[%s8521_s18 + $0x10] sm:$0xff] %vm364_vm0, %v5669_v49  ;;  %v5672_v6 = vadd.f32 %v5918_v33, %v5560_v1  ;;  %v5573_v44 = vadd.f32 %v8506_v36, %v8226_v11  ;;  %v5921_v11 = vld [vmem:[%s6025_s14 + $0x40] sm:$0xff]  ;;  %v5932_v1 = vld [vmem:[%s6025_s14 + $0x98] sm:$0xff] }
 0x385   : > { %v5193_v25 = vadd.f32 %v6417_v63, %v5117_v60  ;;  %5702 = vst.msk [vmem:[%s8521_s18 + $0x18] sm:$0xff] %vm364_vm0, %v5670_v51  ;;  %v5576_v28 = vadd.f32 %v8506_v36, %v8693_v32  ;;  %v5919_v63 = vld [vmem:[%s6025_s14 + $0x30] sm:$0xff]  ;;  %v5674_v45 = vadd.f32 %v5920_v12, %v5568_v31  ;;  %v5581_v56 = vadd.f32 %v8506_v36, %v8694_v9  ;;  %v5930_v60 = vld [vmem:[%s6025_s14 + $0x88] sm:$0xff] }
 0x386   : > { %v5255_v61 = vmax.f32 %v5191_v20, 0.0  ;;  %5703 = vst.msk [vmem:[%s8521_s18 + $0x20] sm:$0xff] %vm364_vm0, %v5671_v29  ;;  %v5673_v58 = vadd.f32 %v5919_v63, %v5565_v34  ;;  %5704 = vst.msk [vmem:[%s8521_s18 + $0x28] sm:$0xff] %vm364_vm0, %v5672_v6  ;;  %v5675_v40 = vadd.f32 %v5921_v11, %v5573_v44  ;;  %v5584_v27 = vadd.f32 %v8506_v36, %v8695_v16  ;;  %v5933_v29 = vld [vmem:[%s6025_s14 + $0xa0] sm:$0xff]  ;;  %v5934_v6 = vld [vmem:[%s6025_s14 + $0xa8] sm:$0xff] }
 0x387   : > { %v5257_v3 = vmax.f32 %v5193_v25, 0.0  ;;  %v5676_v14 = vadd.f32 %v5922_v46, %v5576_v28  ;;  %5706 = vst.msk [vmem:[%s8521_s18 + $0x38] sm:$0xff] %vm364_vm0, %v5674_v45  ;;  %v5677_v57 = vadd.f32 %v5923_v18, %v5581_v56  ;;  %v5589_v0 = vadd.f32 %v8506_v36, %v8696_v43  ;;  %v5935_v63 = vld [vmem:[%s6025_s14 + $0xb0] sm:$0xff]  ;;  %v5936_v56 = vld [vmem:[%s6025_s14 + $0xb8] sm:$0xff] }
 0x388   : > { %v5319_v52 = vmin.f32 %v5255_v61, 6.0  ;;  %5705 = vst.msk [vmem:[%s8521_s18 + $0x30] sm:$0xff] %vm364_vm0, %v5673_v58  ;;  %v5592_v4 = vadd.f32 %v8506_v36, %v8697_v23  ;;  %5707 = vst.msk [vmem:[%s8521_s18 + $0x40] sm:$0xff] %vm364_vm0, %v5675_v40  ;;  %v5678_v26 = vadd.f32 %v5924_v42, %v5584_v27  ;;  %v5597_v30 = vadd.f32 %v8506_v36, %v8698_v50 }
 0x389   : > { %v5321_v15 = vmin.f32 %v5257_v3, 6.0  ;;  %5708 = vst.msk [vmem:[%s8521_s18 + $0x48] sm:$0xff] %vm364_vm0, %v5676_v14  ;;  %v5600_v7 = vadd.f32 %v8506_v36, %v8699_v41  ;;  %5709 = vst.msk [vmem:[%s8521_s18 + $0x50] sm:$0xff] %vm364_vm0, %v5677_v57  ;;  %v5679_v62 = vadd.f32 %v5925_v39, %v5589_v0  ;;  %v5605_v22 = vadd.f32 %v8506_v36, %v8700_v47  ;;  %v5937_v14 = vld [vmem:[%s6025_s14 + $0xc0] sm:$0xff]  ;;  %v5938_v57 = vld [vmem:[%s6025_s14 + $0xc8] sm:$0xff] }
 0x38a   : > { %v5680_v53 = vadd.f32 %v5926_v5, %v5592_v4  ;;  %v5608_v35 = vadd.f32 %v8506_v36, %v8701_v55  ;;  %5710 = vst.msk [vmem:[%s8521_s18 + $0x58] sm:$0xff] %vm364_vm0, %v5678_v26  ;;  %v5681_v8 = vadd.f32 %v5927_v37, %v5597_v30  ;;  %v5613_v2 = vadd.f32 %v8506_v36, %v8444_v19  ;;  %v5931_v19 = vld [vmem:[%s6025_s14 + $0x90] sm:$0xff]  ;;  %v5940_v41 = vld [vmem:[%s6025_s14 + $0xd8] sm:$0xff] }
 0x38b   : > { %v5353_v17 = vpack.c.bf16 %v5321_v15, %v5319_v52  ;;  %v5682_v54 = vadd.f32 %v5928_v13, %v5600_v7  ;;  %5711 = vst.msk [vmem:[%s8521_s18 + $0x60] sm:$0xff] %vm364_vm0, %v5679_v62  ;;  %v5683_v38 = vadd.f32 %v5929_v48, %v5605_v22  ;;  %v5616_v49 = vadd.f32 %v8506_v36, %v8455_v21  ;;  %v5939_v15 = vld [vmem:[%s6025_s14 + $0xd0] sm:$0xff] }
 0x38c   : > { %5712 = vst.msk [vmem:[%s8521_s18 + $0x68] sm:$0xff] %vm364_vm0, %v5680_v53  ;;  %v5684_v10 = vadd.f32 %v5930_v60, %v5608_v35  ;;  %5713 = vst.msk [vmem:[%s8521_s18 + $0x70] sm:$0xff] %vm364_vm0, %v5681_v8  ;;  %v5685_v24 = vadd.f32 %v5931_v19, %v5613_v2  ;;  %v5620_v51 = vpop.f32.mrf.mxu1  ;;  %v5941_v53 = vld [vmem:[%s6025_s14 + $0xe0] sm:$0xff]  ;;  %v5943_v2 = vld [vmem:[%s6025_s14 + $0xf0] sm:$0xff] }
 0x38d   : > { %5659 = vmatmul.mubr.bf16.gmra.mxu1 %v5353_v17  ;;  %5714 = vst.msk [vmem:[%s8521_s18 + $0x78] sm:$0xff] %vm364_vm0, %v5682_v54  ;;  %5715 = vst.msk [vmem:[%s8521_s18 + $0x80] sm:$0xff] %vm364_vm0, %v5683_v38  ;;  %v5686_v20 = vadd.f32 %v5932_v1, %v5616_v49  ;;  %v5621_v59 = vadd.f32 %v8506_v36, %v5620_v51  ;;  %v5942_v17 = vld [vmem:[%s6025_s14 + $0xe8] sm:$0xff]  ;;  %v5944_v49 = vld [vmem:[%s6025_s14 + $0xf8] sm:$0xff] }
 0x38e   : > { %5716 = vst.msk [vmem:[%s8521_s18 + $0x88] sm:$0xff] %vm364_vm0, %v5684_v10  ;;  %5717 = vst.msk [vmem:[%s8521_s18 + $0x90] sm:$0xff] %vm364_vm0, %v5685_v24  ;;  %v5622_v21 = vpop.f32.mrf.mxu1 }
 0x38f   : > { %5718 = vst.msk [vmem:[%s8521_s18 + $0x98] sm:$0xff] %vm364_vm0, %v5686_v20  ;;  %v5687_v34 = vadd.f32 %v5933_v29, %v5621_v59 }
 0x390   : > { %v5623_v31 = vpop.f32.mrf.mxu1 }
 0x391   : > { %5719 = vst.msk [vmem:[%s8521_s18 + $0xa0] sm:$0xff] %vm364_vm0, %v5687_v34  ;;  %v5624_v25 = vadd.f32 %v8506_v36, %v5623_v31 }
 0x392   : > { %v5625_v33 = vpop.f32.mrf.mxu1 }
 0x393   : > { %v5688_v44 = vadd.f32 %v5934_v6, %v5624_v25 }
 0x395   : > { %5720 = vst.msk [vmem:[%s8521_s18 + $0xa8] sm:$0xff] %vm364_vm0, %v5688_v44 }
 0x3b2   : > { %v5628_v32 = vpop.f32.mrf.mxu1 }
 0x3b3   : > { %v5629_v28 = vadd.f32 %v8506_v36, %v5628_v32 }
 0x3b4   : > { %v5630_v61 = vpop.f32.mrf.mxu1 }
 0x3b5   : > { %v5689_v58 = vadd.f32 %v5935_v63, %v5629_v28 }
 0x3b6   : > { %v5631_v12 = vpop.f32.mrf.mxu1 }
 0x3b7   : > { %5721 = vst.msk [vmem:[%s8521_s18 + $0xb0] sm:$0xff] %vm364_vm0, %v5689_v58  ;;  %v5632_v45 = vadd.f32 %v8506_v36, %v5631_v12 }
 0x3b8   : > { %v5633_v9 = vpop.f32.mrf.mxu1 }
 0x3b9   : > { %v5690_v3 = vadd.f32 %v5936_v56, %v5632_v45 }
 0x3bb   : > { %5722 = vst.msk [vmem:[%s8521_s18 + $0xb8] sm:$0xff] %vm364_vm0, %v5690_v3 }
 0x3d9   : > { %v5636_v11 = vpop.f32.mrf.mxu1 }
 0x3da   : > { %v5637_v40 = vadd.f32 %v8506_v36, %v5636_v11 }
 0x3db   : > { %v5638_v46 = vpop.f32.mrf.mxu1 }
 0x3dc   : > { %v5691_v16 = vadd.f32 %v5937_v14, %v5637_v40 }
 0x3dd   : > { %v5639_v27 = vpop.f32.mrf.mxu1 }
 0x3de   : > { %5723 = vst.msk [vmem:[%s8521_s18 + $0xc0] sm:$0xff] %vm364_vm0, %v5691_v16  ;;  %v5640_v52 = vadd.f32 %v8506_v36, %v5639_v27 }
 0x3df   : > { %v5641_v18 = vpop.f32.mrf.mxu1 }
 0x3e0   : > { %v5692_v43 = vadd.f32 %v5938_v57, %v5640_v52 }
 0x3e2   : > { %5724 = vst.msk [vmem:[%s8521_s18 + $0xc8] sm:$0xff] %vm364_vm0, %v5692_v43 }
 0x400   : > { %v5644_v0 = vpop.f32.mrf.mxu1 }
 0x401   : > { %v5645_v23 = vadd.f32 %v8506_v36, %v5644_v0 }
 0x402   : > { %v5646_v4 = vpop.f32.mrf.mxu1 }
 0x403   : > { %v5693_v42 = vadd.f32 %v5939_v15, %v5645_v23 }
 0x404   : > { %v5647_v26 = vpop.f32.mrf.mxu1 }
 0x405   : > { %5725 = vst.msk [vmem:[%s8521_s18 + $0xd0] sm:$0xff] %vm364_vm0, %v5693_v42  ;;  %v5648_v50 = vadd.f32 %v8506_v36, %v5647_v26 }
 0x406   : > { %v5649_v30 = vpop.f32.mrf.mxu1 }
 0x407   : > { %v5694_v7 = vadd.f32 %v5940_v41, %v5648_v50 }
 0x409   : > { %5726 = vst.msk [vmem:[%s8521_s18 + $0xd8] sm:$0xff] %vm364_vm0, %v5694_v7 }
 0x426   : > { %v5652_v39 = vpop.f32.mrf.mxu1 }
 0x427   : > { %v5653_v62 = vadd.f32 %v8506_v36, %v5652_v39 }
 0x428   : > { %v5654_v5 = vpop.f32.mrf.mxu1 }
 0x429   : > { %v5695_v47 = vadd.f32 %v5941_v53, %v5653_v62 }
 0x42a   : > { %v5655_v22 = vpop.f32.mrf.mxu1 }
 0x42b   : > { %5727 = vst.msk [vmem:[%s8521_s18 + $0xe0] sm:$0xff] %vm364_vm0, %v5695_v47  ;;  %v5656_v55 = vadd.f32 %v8506_v36, %v5655_v22 }
 0x42c   : > { %v5657_v35 = vpop.f32.mrf.mxu1 }
 0x42d   : > { %v5696_v37 = vadd.f32 %v5942_v17, %v5656_v55 }
 0x42f   : > { %5728 = vst.msk [vmem:[%s8521_s18 + $0xe8] sm:$0xff] %vm364_vm0, %v5696_v37 }
 0x44d   : > { %v5660_v8 = vpop.f32.mrf.mxu1 }
 0x44e   : > { %v5661_v13 = vadd.f32 %v8506_v36, %v5660_v8 }
 0x44f   : > { %v5662_v54 = vpop.f32.mrf.mxu1 }
 0x450   : > { %v5697_v48 = vadd.f32 %v5943_v2, %v5661_v13 }
 0x451   : > { %v5663_v38 = vpop.f32.mrf.mxu1 }
 0x452   : > { %5729 = vst.msk [vmem:[%s8521_s18 + $0xf0] sm:$0xff] %vm364_vm0, %v5697_v48  ;;  %v5664_v60 = vadd.f32 %v8506_v36, %v5663_v38 }
 0x453   : > { %v5665_v10 = vpop.f32.mrf.mxu1 }
 0x454   : > { %v5698_v19 = vadd.f32 %v5944_v49, %v5664_v60 }
 0x456   : > { %5730 = vst.msk [vmem:[%s8521_s18 + $0xf8] sm:$0xff] %vm364_vm0, %v5698_v19 }
 0x457 PF: > { %s17_s24 = sadd.s32 1, %s5951_s24  }
 0x458   : > { %p14_p4 = scmp.ge.s32.totalorder %s17_s24, 4  }
 0x45a   :  { %16 = sbr.rel (!%p14_p4) target bundleno = 1 (0x1), region = 80 }

</bundles_post_ra>
